<compile_context>
chip_gen: v6e
topology: v6e:2x2x1
jax: 0.10.0
libtpu: 0.0.40
codegen_flags: <defaults>
</compile_context>

<pallas_src>
import jax
import jax.numpy as jnp
from jax import lax
from jax.experimental import pallas as pl
from jax.experimental.pallas import tpu as pltpu

EPS = 1e-5


def bn_relu_conv_kernel(x_ref, g_ref, b_ref, w_ref, o_ref):
    # x_ref: (C_in, M) f32      g_ref / b_ref: (C_in, 1) f32
    # w_ref: (TN, C_in) bf16    o_ref: (TN, M) f32
    x = x_ref[...]
    inv_m = 1.0 / x.shape[1]

    # --- BatchNorm2d, training-mode batch stats (biased variance), two-pass ---
    mean = jnp.sum(x, axis=1, keepdims=True) * inv_m          # (C, 1)
    xc = x - mean
    var = jnp.sum(xc * xc, axis=1, keepdims=True) * inv_m     # (C, 1), biased
    scale = g_ref[...] * lax.rsqrt(var + EPS)                 # (C, 1)
    bias = b_ref[...] - mean * scale                          # (C, 1)

    # --- folded affine + ReLU (single VPU pass) ---
    y = jnp.maximum(x * scale + bias, 0.0)

    # --- 1x1 conv == matmul over channels: bf16 on the MXU, f32 accumulate ---
    o_ref[...] = jnp.dot(
        w_ref[...], y.astype(jnp.bfloat16), preferred_element_type=jnp.float32
    )


def _pick_tiling(c_out):
    """TN and number of C_out slabs.

    v7x has 2 TensorCores per chip -> 2 'parallel' slabs (one per core).
    v5e/v6e have 1 TC -> collapse to a single grid step.
    """
    try:
        kind = jax.devices()[0].device_kind.lower()
    except Exception:
        kind = ""
    if "v7" in kind and c_out % 2 == 0 and (c_out // 2) % 8 == 0:
        return c_out // 2, 2
    return c_out, 1


def prepare_params(gamma, beta, conv_weight):
    """Hoist reshapes and the weight bf16 cast out of the per-call path."""
    c_out, c_in = conv_weight.shape[0], conv_weight.shape[1]
    g2 = gamma.reshape(c_in, 1).astype(jnp.float32)
    b2 = beta.reshape(c_in, 1).astype(jnp.float32)
    w_bf16 = conv_weight.reshape(c_out, c_in).astype(jnp.bfloat16)
    return g2, b2, w_bf16


def bn_relu_conv1x1(x_nchw, g2, b2, w_bf16):
    """x_nchw: (N, C_in, H, W) f32; w_bf16: (C_out, C_in) bf16 (pre-cast)."""
    N, C, H, W = x_nchw.shape
    C_out = w_bf16.shape[0]
    M = N * H * W

    # Channel-major view. For N=1 this is a pure reshape (no HBM transpose).
    if N == 1:
        x_cm = x_nchw.reshape(C, M)
    else:
        x_cm = jnp.moveaxis(x_nchw, 1, 0).reshape(C, M)

    TN, n_blocks = _pick_tiling(C_out)

    cost = pl.CostEstimate(
        flops=2 * C_out * C * M,
        transcendentals=0,
        bytes_accessed=C * M * 4 + C_out * C * 2 + C_out * M * 4 + 2 * C * 4,
    )

    out_cm = pl.pallas_call(
        bn_relu_conv_kernel,
        out_shape=jax.ShapeDtypeStruct((C_out, M), jnp.float32),
        grid=(n_blocks,),
        in_specs=[
            pl.BlockSpec((C, M), lambda j: (0, 0)),    # x: constant block -> 1 DMA
            pl.BlockSpec((C, 1), lambda j: (0, 0)),    # gamma
            pl.BlockSpec((C, 1), lambda j: (0, 0)),    # beta
            pl.BlockSpec((TN, C), lambda j: (j, 0)),   # weight slab (bf16)
        ],
        out_specs=pl.BlockSpec((TN, M), lambda j: (j, 0)),
        compiler_params=pltpu.CompilerParams(
            dimension_semantics=("parallel",)
        ),
        cost_estimate=cost,
    )(x_cm, g2, b2, w_bf16)

    # Back to NCHW. For N=1 this is a free reshape.
    if N == 1:
        return out_cm.reshape(1, C_out, H, W)
    return out_cm.reshape(C_out, N, H, W).transpose(1, 0, 2, 3)


def reference(x_nchw, gamma, beta, conv_weight):
    # Pure-JAX f32 reference mirroring PyTorch training-mode BN + ReLU + 1x1 conv.
    mean = jnp.mean(x_nchw, axis=(0, 2, 3), keepdims=True)
    var = jnp.mean((x_nchw - mean) ** 2, axis=(0, 2, 3), keepdims=True)
    y = (x_nchw - mean) / jnp.sqrt(var + EPS)
    y = y * gamma[None, :, None, None] + beta[None, :, None, None]
    y = jnp.maximum(y, 0.0)
    w = conv_weight.reshape(conv_weight.shape[0], conv_weight.shape[1])  # (Cout, Cin)
    return jnp.einsum("nchw,oc->nohw", y, w)


if __name__ == "__main__":
    # Shapes implied by the module: x64 = randn([1, 128, 28, 28]), conv 128->512.
    N, C_in, H, W = 1, 128, 28, 28
    C_out = 512

    key = jax.random.PRNGKey(0)
    kx, kg, kb, kw = jax.random.split(key, 4)

    x = jax.random.normal(kx, (N, C_in, H, W), dtype=jnp.float32)
    gamma = 1.0 + 0.1 * jax.random.normal(kg, (C_in,), dtype=jnp.float32)
    beta = 0.1 * jax.random.normal(kb, (C_in,), dtype=jnp.float32)
    conv_w = jax.random.normal(kw, (C_out, C_in, 1, 1), dtype=jnp.float32) * 0.05

    g2, b2, w_bf16 = prepare_params(gamma, beta, conv_w)

    out = jax.block_until_ready(bn_relu_conv1x1(x, g2, b2, w_bf16))
    assert out.shape == (N, C_out, H, W), out.shape

    ref = jax.block_until_ready(reference(x, gamma, beta, conv_w))
    # bf16 matmul (f32 accumulation): use a relative tolerance.
    max_err = float(jnp.max(jnp.abs(out - ref)))
    ref_scale = float(jnp.max(jnp.abs(ref))) + 1e-6
    assert max_err / ref_scale < 1.5e-2, f"rel err {max_err / ref_scale}"

    print("KERNEL_OK")
</pallas_src>

<mosaic_0001>
module attributes {stable_mosaic.version = 11 : i64} {
  func.func @bn_relu_conv_kernel(%arg0: i32, %arg1: memref<128x784xf32, #tpu.memory_space<vmem>>, %arg2: memref<128x1xf32, #tpu.memory_space<vmem>>, %arg3: memref<128x1xf32, #tpu.memory_space<vmem>>, %arg4: memref<512x128xbf16, #tpu.memory_space<vmem>>, %arg5: memref<512x784xf32, #tpu.memory_space<vmem>>) attributes {dimension_semantics = [#tpu.dimension_semantics<parallel>], iteration_bounds = array<i64: 1>, scalar_prefetch = 0 : i64, scratch_operands = 0 : i64, tpu.core_type = #tpu.core_type<tc>, window_params = [{pipeline_mode = #tpu.pipeline_mode<synchronous>, transform_indices = @transform_0, window_bounds = array<i64: 128, 784>}, {pipeline_mode = #tpu.pipeline_mode<synchronous>, transform_indices = @transform_1, window_bounds = array<i64: 128, 1>}, {pipeline_mode = #tpu.pipeline_mode<synchronous>, transform_indices = @transform_2, window_bounds = array<i64: 128, 1>}, {transform_indices = @transform_3, window_bounds = array<i64: 512, 128>}, {transform_indices = @transform_4, window_bounds = array<i64: 512, 784>}]} {
    %c0 = arith.constant 0 : index
    %c0_0 = arith.constant 0 : index
    %0 = vector.load %arg1[%c0, %c0_0] : memref<128x784xf32, #tpu.memory_space<vmem>>, vector<128x784xf32>
    %cst = arith.constant dense<0.000000e+00> : vector<128xf32>
    %1 = vector.multi_reduction <add>, %0, %cst [1] : vector<128x784xf32> to vector<128xf32>
    %2 = vector.shape_cast %1 : vector<128xf32> to vector<128x1xf32>
    %cst_1 = arith.constant 0.00127551018 : f32
    %3 = vector.broadcast %cst_1 : f32 to vector<128x1xf32>
    %4 = arith.mulf %2, %3 : vector<128x1xf32>
    %5 = vector.broadcast %4 : vector<128x1xf32> to vector<128x784xf32>
    %6 = arith.subf %0, %5 : vector<128x784xf32>
    %7 = arith.mulf %6, %6 : vector<128x784xf32>
    %cst_2 = arith.constant dense<0.000000e+00> : vector<128xf32>
    %8 = vector.multi_reduction <add>, %7, %cst_2 [1] : vector<128x784xf32> to vector<128xf32>
    %9 = vector.shape_cast %8 : vector<128xf32> to vector<128x1xf32>
    %cst_3 = arith.constant 0.00127551018 : f32
    %10 = vector.broadcast %cst_3 : f32 to vector<128x1xf32>
    %11 = arith.mulf %9, %10 : vector<128x1xf32>
    %c0_4 = arith.constant 0 : index
    %c0_5 = arith.constant 0 : index
    %12 = vector.load %arg2[%c0_4, %c0_5] : memref<128x1xf32, #tpu.memory_space<vmem>>, vector<128x1xf32>
    %cst_6 = arith.constant 9.99999974E-6 : f32
    %13 = vector.broadcast %cst_6 : f32 to vector<128x1xf32>
    %14 = arith.addf %11, %13 : vector<128x1xf32>
    %15 = math.rsqrt %14 : vector<128x1xf32>
    %16 = arith.mulf %12, %15 : vector<128x1xf32>
    %c0_7 = arith.constant 0 : index
    %c0_8 = arith.constant 0 : index
    %17 = vector.load %arg3[%c0_7, %c0_8] : memref<128x1xf32, #tpu.memory_space<vmem>>, vector<128x1xf32>
    %18 = arith.mulf %4, %16 : vector<128x1xf32>
    %19 = arith.subf %17, %18 : vector<128x1xf32>
    %20 = vector.broadcast %16 : vector<128x1xf32> to vector<128x784xf32>
    %21 = arith.mulf %0, %20 : vector<128x784xf32>
    %22 = vector.broadcast %19 : vector<128x1xf32> to vector<128x784xf32>
    %23 = arith.addf %21, %22 : vector<128x784xf32>
    %cst_9 = arith.constant 0.000000e+00 : f32
    %24 = vector.broadcast %cst_9 : f32 to vector<128x784xf32>
    %25 = arith.maximumf %23, %24 : vector<128x784xf32>
    %c0_10 = arith.constant 0 : index
    %c0_11 = arith.constant 0 : index
    %26 = vector.load %arg4[%c0_10, %c0_11] : memref<512x128xbf16, #tpu.memory_space<vmem>>, vector<512x128xbf16>
    %27 = arith.truncf %25 : vector<128x784xf32> to vector<128x784xbf16>
    %cst_12 = arith.constant dense<0.000000e+00> : vector<512x784xf32>
    %28 = tpu.matmul %26, %27, %cst_12 {dimension_numbers = #tpu.dot_dimension_numbers<[1], [0], [0], [1], [0, 0, 1, 1], [], []>} : vector<512x128xbf16>, vector<128x784xbf16>, vector<512x784xf32> -> vector<512x784xf32>
    %c0_13 = arith.constant 0 : index
    %c0_14 = arith.constant 0 : index
    %29 = vector.load %arg5[%c0_13, %c0_14] : memref<512x784xf32, #tpu.memory_space<vmem>>, vector<512x784xf32>
    tpu.vector_store %arg5[%c0_13, %c0_14], %28 {strides = array<i32>} : memref<512x784xf32, #tpu.memory_space<vmem>>, vector<512x784xf32>,
    return
  }
  func.func @transform_0(%arg0: i32) -> (i32, i32) {
    %c0_i32 = arith.constant 0 : i32
    %c0_i32_0 = arith.constant 0 : i32
    %c0_i32_1 = arith.constant 0 : i32
    return %c0_i32, %c0_i32_0 : i32, i32
  }
  func.func @transform_1(%arg0: i32) -> (i32, i32) {
    %c0_i32 = arith.constant 0 : i32
    %c0_i32_0 = arith.constant 0 : i32
    %c0_i32_1 = arith.constant 0 : i32
    return %c0_i32, %c0_i32_0 : i32, i32
  }
  func.func @transform_2(%arg0: i32) -> (i32, i32) {
    %c0_i32 = arith.constant 0 : i32
    %c0_i32_0 = arith.constant 0 : i32
    %c0_i32_1 = arith.constant 0 : i32
    return %c0_i32, %c0_i32_0 : i32, i32
  }
  func.func @transform_3(%arg0: i32) -> (i32, i32) {
    %c0_i32 = arith.constant 0 : i32
    %c0_i32_0 = arith.constant 0 : i32
    return %arg0, %c0_i32 : i32, i32
  }
  func.func @transform_4(%arg0: i32) -> (i32, i32) {
    %c0_i32 = arith.constant 0 : i32
    %c0_i32_0 = arith.constant 0 : i32
    return %arg0, %c0_i32 : i32, i32
  }
}

</mosaic_0001>

<bundles_post_ra>
// kernel: tpu_custom_call.1
= control target key start
LH: loop header
LB: loop body
LE: loop exit
PB: predicated region body
PF: predicated region fallthrough
CT: control target
= control target key end

     0   :  { %9 = vsyncpa [#allocation3], 0  ;;  %s3800_s15 = smov [#allocation2]   ;;  %s7667_s0 = inlined_call_operand.vmem [shape: f32[128,784], index: 0, kind: input, shape index: {}]   ;;  %s7668_s1 = inlined_call_operand.vmem [shape: f32[128,1], index: 1, kind: input, shape index: {}]   ;;  %s7669_s2 = inlined_call_operand.vmem [shape: f32[128,1], index: 2, kind: input, shape index: {}]   ;;  %s7670_s3 = inlined_call_operand.hbm [shape: bf16[512,128], index: 3, kind: input, shape index: {}]   ;;  %s7671_s4 = inlined_call_operand.vmem [shape: f32[512,784], index: 4, kind: output, shape index: {}]  }
   0x1   :  { %s21_s16 = sshll.u32 %s3800_s15, 4  ;;  %s22_s16 = int_to_ptr.vmem [resolvable:$true] %s21_s16 }
   0x2   :  { %s3786_s17 = scalar_lea.vmem %s22_s16, 4096  ;;  %p3791_p1 = scmp.lt.s32.totalorder %s22_s16, %s22_s16 }
   0x3   :  { %p3787_p0 = scmp.ne.s32.totalorder %s22_s16, %s3786_s17  ;;  %p3792_p2 = scmp.lt.s32.totalorder %s3786_s17, %s3786_s17 }
   0x5   :  { %p3793_p3 = por %p3792_p2, %p3791_p1 }
   0x7   :  { %p3794_p4 = pnand %p3793_p3, %p3787_p0 }
   0x9   :  { %3797 = shalt.err (!%p3794_p4)
}
   0xa   :  { %s3801_s18 = smov 64   ;;  %s3802_s19 = smov 4  }
   0xb   :  { %27 = dma.hbm_to_vmem [thread:$0]  %s7670_s3, 4096, %s22_s16, [#allocation3], %s3801_s18, %s3801_s18, %s3802_s19  }
   0xc   :  { %3798 = dma.done.wait [#allocation3], 4096  }
   0xd   :  { %3799 = vsyncadd [#allocation3], 4294963200  ;;  %v3835_v0 = vld [vmem:[%s7667_s0 + $0x310] sm:$0xff]  ;;  %v3840_v1 = vld [vmem:[%s7667_s0 + $0x318] sm:$0xff]  ;;  %vm149_vm0 = vcmask 130048  }
   0xe   :  { %v3845_v2 = vld [vmem:[%s7667_s0 + $0x320] sm:$0xff]  ;;  %v271_v3 = vadd.f32 %v3840_v1, %v3835_v0  ;;  %v3852_v4 = vld [vmem:[%s7667_s0 + $0x328] sm:$0xff]  ;;  %v3867_v7 = vld [vmem:[%s7667_s0 + $0x330] sm:$0xff] }
   0xf   :  { %v3857_v5 = vld [vmem:[%s7667_s0 + $0x2a0] sm:$0xff]  ;;  %v3862_v6 = vld [vmem:[%s7667_s0 + $0x2a8] sm:$0xff]  ;;  %v3873_v9 = vld [vmem:[%s7667_s0 + $0x2b0] sm:$0xff] }
  0x10   :  { %v272_v8 = vadd.f32 %v271_v3, %v3845_v2  ;;  %v253_v10 = vadd.f32 %v3862_v6, %v3857_v5  ;;  %v3880_v11 = vld [vmem:[%s7667_s0 + $0x338] sm:$0xff]  ;;  %v3890_v13 = vld [vmem:[%s7667_s0 + $0x348] sm:$0xff]  ;;  %v3895_v14 = vld [vmem:[%s7667_s0 + $0x340] sm:$0xff] }
  0x11   :  { %v3885_v12 = vld [vmem:[%s7667_s0 + $0x2b8] sm:$0xff]  ;;  %v3902_v17 = vld [vmem:[%s7667_s0 + $0x350] sm:$0xff]  ;;  %v3912_v19 = vld [vmem:[%s7667_s0 + $0x2c0] sm:$0xff]  ;;  %v276_v28 = vsel %vm149_vm0, %v3895_v14, 0.0 }
  0x12   :  { %v273_v15 = vadd.f32 %v272_v8, %v3852_v4  ;;  %v254_v16 = vadd.f32 %v253_v10, %v3873_v9  ;;  %v3907_v18 = vld [vmem:[%s7667_s0 + $0x358] sm:$0xff]  ;;  %v3917_v20 = vld [vmem:[%s7667_s0 + $0x2d0] sm:$0xff]  ;;  %v3922_v21 = vld [vmem:[%s7667_s0 + $0x360] sm:$0xff]  ;;  %v280_v22 = vadd.f32 %v3902_v17, %v3890_v13 }
  0x13   :  { %v3931_v25 = vld [vmem:[%s7667_s0 + $0x2d8] sm:$0xff]  ;;  %v3936_v26 = vld [vmem:[%s7667_s0 + $0x2e0] sm:$0xff]  ;;  %v3941_v27 = vld [vmem:[%s7667_s0 + $0x2e8] sm:$0xff]  ;;  %v258_v39 = vsel %vm149_vm0, %v3917_v20, 0.0 }
  0x14   :  { %v274_v23 = vadd.f32 %v273_v15, %v3867_v7  ;;  %v255_v24 = vadd.f32 %v254_v16, %v3885_v12  ;;  %v3948_v29 = vld [vmem:[%s7667_s0 + $0x2c8] sm:$0xff]  ;;  %v281_v31 = vadd.f32 %v280_v22, %v3907_v18  ;;  %v262_v32 = vadd.f32 %v3936_v26, %v3931_v25  ;;  %v3963_v35 = vld [vmem:[%s7667_s0 + $0x370] sm:$0xff]  ;;  %v3978_v38 = vld [vmem:[%s7667_s0 + $0x238] sm:$0xff] }
  0x15   :  { %v3953_v30 = vld [vmem:[%s7667_s0 + $0x368] sm:$0xff]  ;;  %v3968_v36 = vld [vmem:[%s7667_s0 + $0x2f0] sm:$0xff]  ;;  %v3985_v40 = vld [vmem:[%s7667_s0 + $0x378] sm:$0xff] }
  0x16   :  { %v275_v33 = vadd.f32 %v274_v23, %v3880_v11  ;;  %v256_v34 = vadd.f32 %v255_v24, %v3912_v19  ;;  %v3973_v37 = vld [vmem:[%s7667_s0 + $0x230] sm:$0xff]  ;;  %v282_v41 = vadd.f32 %v281_v31, %v3922_v21  ;;  %v3991_v42 = vld [vmem:[%s7667_s0 + $0x2f8] sm:$0xff]  ;;  %v263_v43 = vadd.f32 %v262_v32, %v3941_v27  ;;  %v3997_v44 = vld [vmem:[%s7667_s0 + $0x240] sm:$0xff] }
  0x17   :  { %v235_v45 = vadd.f32 %v3978_v38, %v3973_v37  ;;  %v4005_v48 = vld [vmem:[%s7667_s0 + $0x300] sm:$0xff]  ;;  %v4010_v49 = vld [vmem:[%s7667_s0 + $0x248] sm:$0xff]  ;;  %v4028_v55 = vld [vmem:[%s7667_s0 + $0x270] sm:$0xff]  ;;  %v285_v58 = vsel %vm149_vm0, %v3985_v40, 0.0 }
  0x18   :  { %v277_v46 = vadd.f32 %v276_v28, %v275_v33  ;;  %v257_v47 = vadd.f32 %v256_v34, %v3948_v29  ;;  %v4015_v50 = vld [vmem:[%s7667_s0 + $0x268] sm:$0xff]  ;;  %v283_v51 = vadd.f32 %v282_v41, %v3953_v30  ;;  %v264_v53 = vadd.f32 %v263_v43, %v3968_v36  ;;  %v4033_v56 = vld [vmem:[%s7667_s0 + $0x278] sm:$0xff]  ;;  %v4040_v59 = vld [vmem:[%s7667_s0 + $0x250] sm:$0xff] }
  0x19   :  { %v4021_v52 = vld [vmem:[%s7667_s0 + $0x308] sm:$0xff]  ;;  %v236_v54 = vadd.f32 %v235_v45, %v3997_v44  ;;  %v4045_v60 = vld [vmem:[%s7667_s0 + $0x260] sm:$0xff]  ;;  %v244_v62 = vadd.f32 %v4028_v55, %v4015_v50  ;;  %v4070_v16 = vld [vmem:[%s7667_s0 + $0x1d0] sm:$0xff] }
  0x1a   :  { %278 = vadd.xlane.f32.xlu0 %v277_v46  ;;  %v259_v57 = vadd.f32 %v258_v39, %v257_v47  ;;  %v4050_v61 = vld [vmem:[%s7667_s0 + $0x280] sm:$0xff]  ;;  %v284_v63 = vadd.f32 %v283_v51, %v3963_v35  ;;  %v265_v3 = vadd.f32 %v264_v53, %v3991_v42  ;;  %v4065_v15 = vld [vmem:[%s7667_s0 + $0x1c8] sm:$0xff]  ;;  %7746 = vst [vmem:[#allocation7_spill] sm:$0xff] %v4070_v16  ;;  %v267_v22 = vsel %vm149_vm0, %v4021_v52, 0.0  ;;  %v4077_v23 = vld [vmem:[%s7667_s0 + $0x258] sm:$0xff] }
  0x1b   :  { %v237_v8 = vadd.f32 %v236_v54, %v4010_v49  ;;  %v4060_v10 = vld [vmem:[%s7667_s0 + $0x1c0] sm:$0xff]  ;;  %7745 = vst [vmem:[#allocation6_spill] sm:$0xff] %v4065_v15  ;;  %v4082_v24 = vld [vmem:[%s7667_s0 + $0x288] sm:$0xff]  ;;  %v245_v28 = vadd.f32 %v244_v62, %v4033_v56  ;;  %v4092_v39 = vld [vmem:[%s7667_s0 + $0x290] sm:$0xff]  ;;  %v240_v46 = vsel %vm149_vm0, %v4045_v60, 0.0 }
  0x1c   :  { %7744 = vst [vmem:[#allocation5_spill] sm:$0xff] %v4060_v10  ;;  %260 = vadd.xlane.f32.xlu1 %v259_v57  ;;  %v217_v31 = vadd.f32 %v4065_v15, %v4060_v10  ;;  %v286_v32 = vadd.f32 %v285_v58, %v284_v63  ;;  %v266_v33 = vadd.f32 %v265_v3, %v4005_v48  ;;  %7747 = vst [vmem:[#allocation8_spill] sm:$0xff] %v4092_v39  ;;  %v4097_v41 = vld [vmem:[%s7667_s0 + $0x1d8] sm:$0xff]  ;;  %v4107_v45 = vld [vmem:[%s7667_s0 + $0x200] sm:$0xff] }
  0x1d   :  { %v238_v34 = vadd.f32 %v237_v8, %v4040_v59  ;;  %7748 = vst [vmem:[#allocation9_spill] sm:$0xff] %v4097_v41  ;;  %v4102_v43 = vld [vmem:[%s7667_s0 + $0x1f8] sm:$0xff]  ;;  %7750 = vst [vmem:[#allocation11_spill] sm:$0xff] %v4107_v45  ;;  %v246_v51 = vadd.f32 %v245_v28, %v4050_v61  ;;  %v4120_v53 = vld [vmem:[%s7667_s0 + $0x1e0] sm:$0xff] }
  0x1e   :  { %7749 = vst [vmem:[#allocation10_spill] sm:$0xff] %v4102_v43  ;;  %v4114_v47 = vld [vmem:[%s7667_s0 + $0x298] sm:$0xff]  ;;  %7752 = vst [vmem:[#allocation13_spill] sm:$0xff] %v4120_v53  ;;  %v218_v54 = vadd.f32 %v217_v31, %v4070_v16  ;;  %v4126_v57 = vld [vmem:[%s7667_s0 + $0x208] sm:$0xff]  ;;  %v226_v58 = vadd.f32 %v4107_v45, %v4102_v43  ;;  %287 = vadd.xlane.f32.xlu0 %v286_v32  ;;  %v268_v62 = vadd.f32 %v267_v22, %v266_v33 }
  0x1f   :  { %7751 = vst [vmem:[#allocation12_spill] sm:$0xff] %v4114_v47  ;;  %7753 = vst [vmem:[#allocation14_spill] sm:$0xff] %v4126_v57  ;;  %v239_v63 = vadd.f32 %v238_v34, %v4077_v23  ;;  %v4134_v3 = vld [vmem:[%s7667_s0 + $0x1e8] sm:$0xff]  ;;  %v4139_v8 = vld [vmem:[%s7667_s0 + $0x210] sm:$0xff]  ;;  %v247_v31 = vadd.f32 %v246_v51, %v4082_v24  ;;  %v249_v43 = vsel %vm149_vm0, %v4114_v47, 0.0 }
  0x20   :  { %7754 = vst [vmem:[#allocation15_spill] sm:$0xff] %v4134_v3  ;;  %7755 = vst [vmem:[#allocation16_spill] sm:$0xff] %v4139_v8  ;;  %v4144_v28 = vld [vmem:[%s7667_s0 + $0x150] sm:$0xff]  ;;  %v219_v32 = vadd.f32 %v218_v54, %v4097_v41  ;;  %v227_v33 = vadd.f32 %v226_v58, %v4126_v57  ;;  %v4157_v34 = vld [vmem:[%s7667_s0 + $0x158] sm:$0xff]  ;;  %269 = vadd.xlane.f32.xlu1 %v268_v62 }
  0x21   :  { %7756 = vst [vmem:[#allocation17_spill] sm:$0xff] %v4144_v28  ;;  %v4150_v22 = vld [vmem:[%s7667_s0 + $0x1f0] sm:$0xff]  ;;  %7758 = vst [vmem:[#allocation19_spill] sm:$0xff] %v4157_v34  ;;  %v4162_v45 = vld [vmem:[%s7667_s0 + $0x160] sm:$0xff]  ;;  %v241_v51 = vadd.f32 %v240_v46, %v239_v63  ;;  %v199_v46 = vadd.f32 %v4157_v34, %v4144_v28  ;;  %v248_v62 = vadd.f32 %v247_v31, %v4092_v39 }
  0x22   :  { %7757 = vst [vmem:[#allocation18_spill] sm:$0xff] %v4150_v22  ;;  %7759 = vst [vmem:[#allocation20_spill] sm:$0xff] %v4162_v45  ;;  %v4169_v54 = vld [vmem:[%s7667_s0 + $0x218] sm:$0xff]  ;;  %v4174_v58 = vld [vmem:[%s7667_s0 + $0x228] sm:$0xff]  ;;  %v220_v63 = vadd.f32 %v219_v32, %v4120_v53  ;;  %v228_v41 = vadd.f32 %v227_v33, %v4139_v8  ;;  %v222_v31 = vsel %vm149_vm0, %v4150_v22, 0.0 }
  0x23   :  { %7760 = vst [vmem:[#allocation21_spill] sm:$0xff] %v4169_v54  ;;  %7761 = vst [vmem:[#allocation22_spill] sm:$0xff] %v4174_v58  ;;  %v4179_v57 = vld [vmem:[%s7667_s0 + $0x168] sm:$0xff]  ;;  %v4194_v15 = vld [vmem:[%s7667_s0 + $0x190] sm:$0xff]  ;;  %242 = vadd.xlane.f32.xlu0 %v241_v51  ;;  %v200_v28 = vadd.f32 %v199_v46, %v4162_v45  ;;  %v250_v53 = vadd.f32 %v249_v43, %v248_v62 }
  0x24   :  { %7762 = vst [vmem:[#allocation23_spill] sm:$0xff] %v4179_v57  ;;  %v4189_v16 = vld [vmem:[%s7667_s0 + $0x188] sm:$0xff]  ;;  %7764 = vst [vmem:[#allocation25_spill] sm:$0xff] %v4194_v15  ;;  %v4199_v34 = vld [vmem:[%s7667_s0 + $0x198] sm:$0xff]  ;;  %v221_v51 = vadd.f32 %v220_v63, %v4134_v3  ;;  %v229_v22 = vadd.f32 %v228_v41, %v4169_v54  ;;  %v231_v41 = vsel %vm149_vm0, %v4174_v58, 0.0 }
  0x25   :  { %7763 = vst [vmem:[#allocation24_spill] sm:$0xff] %v4189_v16  ;;  %7765 = vst [vmem:[#allocation26_spill] sm:$0xff] %v4199_v34  ;;  %v4206_v32 = vld [vmem:[%s7667_s0 + $0x220] sm:$0xff]  ;;  %v4211_v33 = vld [vmem:[%s7667_s0 + $0x170] sm:$0xff]  ;;  %v208_v8 = vadd.f32 %v4194_v15, %v4189_v16  ;;  %v201_v63 = vadd.f32 %v200_v28, %v4179_v57  ;;  %251 = vadd.xlane.f32.xlu1 %v250_v53 }
  0x26   :  { %7766 = vst [vmem:[#allocation27_spill] sm:$0xff] %v4206_v32  ;;  %7767 = vst [vmem:[#allocation28_spill] sm:$0xff] %v4211_v33  ;;  %v4221_v10 = vld [vmem:[%s7667_s0 + $0x178] sm:$0xff]  ;;  %v4226_v39 = vld [vmem:[%s7667_s0 + $0x1a0] sm:$0xff]  ;;  %v223_v54 = vadd.f32 %v222_v31, %v221_v51  ;;  %v230_v3 = vadd.f32 %v229_v22, %v4206_v32 }
  0x27   :  { %7768 = vst [vmem:[#allocation29_spill] sm:$0xff] %v4221_v10  ;;  %7769 = vst [vmem:[#allocation30_spill] sm:$0xff] %v4226_v39  ;;  %v4231_v46 = vld [vmem:[%s7667_s0 + $0xe0] sm:$0xff]  ;;  %v4236_v43 = vld [vmem:[%s7667_s0 + $0xe8] sm:$0xff]  ;;  %v209_v16 = vadd.f32 %v208_v8, %v4199_v34  ;;  %v202_v53 = vadd.f32 %v201_v63, %v4211_v33 }
  0x28   :  { %7770 = vst [vmem:[#allocation31_spill] sm:$0xff] %v4231_v46  ;;  %7771 = vst [vmem:[#allocation32_spill] sm:$0xff] %v4236_v43  ;;  %v4243_v62 = vld [vmem:[%s7667_s0 + $0x180] sm:$0xff]  ;;  %v4249_v15 = vld [vmem:[%s7667_s0 + $0x1a8] sm:$0xff]  ;;  %v181_v58 = vadd.f32 %v4236_v43, %v4231_v46  ;;  %224 = vadd.xlane.f32.xlu0 %v223_v54  ;;  %v232_v63 = vadd.f32 %v231_v41, %v230_v3 }
  0x29   :  { %7772 = vst [vmem:[#allocation33_spill] sm:$0xff] %v4243_v62  ;;  %7773 = vst [vmem:[#allocation34_spill] sm:$0xff] %v4249_v15  ;;  %v4255_v45 = vld [vmem:[%s7667_s0 + $0xf0] sm:$0xff]  ;;  %v4268_v8 = vld [vmem:[%s7667_s0 + $0xf8] sm:$0xff]  ;;  %v210_v31 = vadd.f32 %v209_v16, %v4226_v39  ;;  %v204_v33 = vsel %vm149_vm0, %v4243_v62, 0.0  ;;  %v203_v54 = vadd.f32 %v202_v53, %v4221_v10 }
  0x2a   :  { %7774 = vst [vmem:[#allocation35_spill] sm:$0xff] %v4255_v45  ;;  %v4263_v28 = vld [vmem:[%s7667_s0 + $0x1b0] sm:$0xff]  ;;  %7776 = vst [vmem:[#allocation37_spill] sm:$0xff] %v4268_v8  ;;  %v4273_v34 = vld [vmem:[%s7667_s0 + $0x118] sm:$0xff]  ;;  %v182_v51 = vadd.f32 %v181_v58, %v4255_v45  ;;  %233 = vadd.xlane.f32.xlu1 %v232_v63 }
  0x2b   :  { %7775 = vst [vmem:[#allocation36_spill] sm:$0xff] %v4263_v28  ;;  %7777 = vst [vmem:[#allocation38_spill] sm:$0xff] %v4273_v34  ;;  %v4279_v22 = vld [vmem:[%s7667_s0 + $0x1b8] sm:$0xff]  ;;  %v4286_v43 = vld [vmem:[%s7667_s0 + $0x120] sm:$0xff]  ;;  %v211_v41 = vadd.f32 %v210_v31, %v4249_v15  ;;  %v205_v15 = vadd.f32 %v204_v33, %v203_v54 }
  0x2c   :  { %7778 = vst [vmem:[#allocation39_spill] sm:$0xff] %v4279_v22  ;;  %7779 = vst [vmem:[#allocation40_spill] sm:$0xff] %v4286_v43  ;;  %v4291_v46 = vld [vmem:[%s7667_s0 + $0x128] sm:$0xff]  ;;  %v4298_v16 = vld [vmem:[%s7667_s0 + $0x100] sm:$0xff]  ;;  %v190_v3 = vadd.f32 %v4286_v43, %v4273_v34  ;;  %v183_v39 = vadd.f32 %v182_v51, %v4268_v8  ;;  %v213_v53 = vsel %vm149_vm0, %v4279_v22, 0.0 }
  0x2d   :  { %7780 = vst [vmem:[#allocation41_spill] sm:$0xff] %v4291_v46  ;;  %7781 = vst [vmem:[#allocation42_spill] sm:$0xff] %v4298_v16  ;;  %v4303_v58 = vld [vmem:[%s7667_s0 + $0x110] sm:$0xff]  ;;  %v4323_v57 = vld [vmem:[%s7667_s0 + $0x78] sm:$0xff]  ;;  %v212_v63 = vadd.f32 %v211_v41, %v4263_v28  ;;  %206 = vadd.xlane.f32.xlu0 %v205_v15 }
  0x2e   :  { %7782 = vst [vmem:[#allocation43_spill] sm:$0xff] %v4303_v58  ;;  %v4308_v45 = vld [vmem:[%s7667_s0 + $0x130] sm:$0xff]  ;;  %7785 = vst [vmem:[#allocation46_spill] sm:$0xff] %v4323_v57  ;;  %v4328_v43 = vld [vmem:[%s7667_s0 + $0x80] sm:$0xff]  ;;  %v191_v34 = vadd.f32 %v190_v3, %v4291_v46  ;;  %v184_v22 = vadd.f32 %v183_v39, %v4298_v16  ;;  %v186_v39 = vsel %vm149_vm0, %v4303_v58, 0.0 }
  0x2f   :  { %7783 = vst [vmem:[#allocation44_spill] sm:$0xff] %v4308_v45  ;;  %v4318_v62 = vld [vmem:[%s7667_s0 + $0x70] sm:$0xff]  ;;  %7786 = vst [vmem:[#allocation47_spill] sm:$0xff] %v4328_v43  ;;  %v4335_v31 = vld [vmem:[%s7667_s0 + $0x108] sm:$0xff]  ;;  %v214_v16 = vadd.f32 %v213_v53, %v212_v63 }
  0x30   :  { %7784 = vst [vmem:[#allocation45_spill] sm:$0xff] %v4318_v62  ;;  %7787 = vst [vmem:[#allocation48_spill] sm:$0xff] %v4335_v31  ;;  %v4340_v51 = vld [vmem:[%s7667_s0 + $0x138] sm:$0xff]  ;;  %v163_v8 = vadd.f32 %v4323_v57, %v4318_v62  ;;  %v4350_v10 = vld [vmem:[%s7667_s0 + $0x140] sm:$0xff]  ;;  %v192_v41 = vadd.f32 %v191_v34, %v4308_v45  ;;  %v185_v28 = vadd.f32 %v184_v22, %v4335_v31 }
  0x31   :  { %7788 = vst [vmem:[#allocation49_spill] sm:$0xff] %v4340_v51  ;;  %7789 = vst [vmem:[#allocation50_spill] sm:$0xff] %v4350_v10  ;;  %v4355_v32 = vld [vmem:[%s7667_s0 + $0x88] sm:$0xff]  ;;  %v4365_v33 = vld [vmem:[%s7667_s0 + $0xb0] sm:$0xff]  ;;  %215 = vadd.xlane.f32.xlu1 %v214_v16 }
  0x32   :  { %7790 = vst [vmem:[#allocation51_spill] sm:$0xff] %v4355_v32  ;;  %v4360_v3 = vld [vmem:[%s7667_s0 + $0xa8] sm:$0xff]  ;;  %7792 = vst [vmem:[#allocation53_spill] sm:$0xff] %v4365_v33  ;;  %v4378_v57 = vld [vmem:[%s7667_s0 + $0x90] sm:$0xff]  ;;  %v164_v62 = vadd.f32 %v163_v8, %v4328_v43  ;;  %v193_v22 = vadd.f32 %v192_v41, %v4340_v51  ;;  %v187_v41 = vadd.f32 %v186_v39, %v185_v28 }
  0x33   :  { %7791 = vst [vmem:[#allocation52_spill] sm:$0xff] %v4360_v3  ;;  %v4372_v54 = vld [vmem:[%s7667_s0 + $0x148] sm:$0xff]  ;;  %7794 = vst [vmem:[#allocation55_spill] sm:$0xff] %v4378_v57  ;;  %v4384_v46 = vld [vmem:[%s7667_s0 + $0xb8] sm:$0xff]  ;;  %v172_v58 = vadd.f32 %v4365_v33, %v4360_v3 }
  0x34   :  { %7793 = vst [vmem:[#allocation54_spill] sm:$0xff] %v4372_v54  ;;  %7795 = vst [vmem:[#allocation56_spill] sm:$0xff] %v4384_v46  ;;  %v4392_v34 = vld [vmem:[%s7667_s0 + $0x98] sm:$0xff]  ;;  %v4397_v8 = vld [vmem:[%s7667_s0 + $0xa0] sm:$0xff]  ;;  %v165_v53 = vadd.f32 %v164_v62, %v4355_v32  ;;  %v195_v62 = vsel %vm149_vm0, %v4372_v54, 0.0  ;;  %v194_v16 = vadd.f32 %v193_v22, %v4350_v10  ;;  %188 = vadd.xlane.f32.xlu0 %v187_v41 }
  0x35   :  { %7796 = vst [vmem:[#allocation57_spill] sm:$0xff] %v4397_v8  ;;  %v4402_v43 = vld [vmem:[%s7667_s0 + $0xc0] sm:$0xff]  ;;  %v4414_v63 = vld [vmem:[%s7667_s0 + $0xd8] sm:$0xff]  ;;  %v173_v33 = vadd.f32 %v172_v58, %v4384_v46  ;;  %v4420_v3 = vld [vmem:[%s7667_s0 + $0x8] sm:$0xff]  ;;  %v168_v22 = vsel %vm149_vm0, %v4397_v8, 0.0 }
  0x36   :  { %7797 = vst [vmem:[#allocation58_spill] sm:$0xff] %v4402_v43  ;;  %v4407_v15 = vld [vmem:[%s7667_s0] sm:$0xff]  ;;  %7799 = vst [vmem:[#allocation60_spill] sm:$0xff] %v4414_v63  ;;  %v4425_v45 = vld [vmem:[%s7667_s0 + $0x10] sm:$0xff]  ;;  %v166_v39 = vadd.f32 %v165_v53, %v4378_v57  ;;  %v177_v53 = vsel %vm149_vm0, %v4414_v63, 0.0  ;;  %v196_v57 = vadd.f32 %v195_v62, %v194_v16 }
  0x37   :  { %7798 = vst [vmem:[#allocation59_spill] sm:$0xff] %v4407_v15  ;;  %7800 = vst [vmem:[#allocation61_spill] sm:$0xff] %v4420_v3  ;;  %v4432_v32 = vld [vmem:[%s7667_s0 + $0xc8] sm:$0xff]  ;;  %v4437_v58 = vld [vmem:[%s7667_s0 + $0x18] sm:$0xff]  ;;  %v144_v28 = vadd.f32 %v4420_v3, %v4407_v15  ;;  %v174_v54 = vadd.f32 %v173_v33, %v4402_v43 }
  0x38   :  { %7801 = vst [vmem:[#allocation62_spill] sm:$0xff] %v4425_v45  ;;  %7802 = vst [vmem:[#allocation63_spill] sm:$0xff] %v4432_v32  ;;  %v4442_v46 = vld [vmem:[%s7667_s0 + $0x30] sm:$0xff]  ;;  %v4452_v51 = vld [vmem:[%s7667_s0 + $0x38] sm:$0xff]  ;;  %v167_v10 = vadd.f32 %v166_v39, %v4392_v34  ;;  %197 = vadd.xlane.f32.xlu1 %v196_v57 }
  0x39   :  { %7803 = vst [vmem:[#allocation64_spill] sm:$0xff] %v4437_v58  ;;  %7804 = vst [vmem:[#allocation65_spill] sm:$0xff] %v4442_v46  ;;  %v4457_v31 = vld [vmem:[%s7667_s0 + $0x40] sm:$0xff]  ;;  %v4462_v3 = vld [vmem:[%s7667_s0 + $0x48] sm:$0xff]  ;;  %v145_v43 = vadd.f32 %v144_v28, %v4425_v45  ;;  %v175_v63 = vadd.f32 %v174_v54, %v4432_v32  ;;  %v150_v28 = vsel %vm149_vm0, %v4442_v46, 0.0 }
  0x3a   :  { %7805 = vst [vmem:[#allocation66_spill] sm:$0xff] %v4452_v51  ;;  %7806 = vst [vmem:[#allocation67_spill] sm:$0xff] %v4457_v31  ;;  %v4469_v33 = vld [vmem:[%s7667_s0 + $0xd0] sm:$0xff]  ;;  %v4476_v15 = vld [vmem:[%s7667_s0 + $0x20] sm:$0xff]  ;;  %v154_v8 = vadd.f32 %v4457_v31, %v4452_v51  ;;  %v169_v39 = vadd.f32 %v168_v22, %v167_v10 }
  0x3b   :  { %7807 = vst [vmem:[#allocation68_spill] sm:$0xff] %v4462_v3  ;;  %7808 = vst [vmem:[#allocation69_spill] sm:$0xff] %v4469_v33  ;;  %v4482_v41 = vld [vmem:[%s7667_s0 + $0x50] sm:$0xff]  ;;  %v4491_v47 = vld [vmem:[%s7667_s0 + $0x28] sm:$0xff]  ;;  %v146_v31 = vadd.f32 %v145_v43, %v4437_v58  ;;  %v176_v51 = vadd.f32 %v175_v63, %v4469_v33 }
  0x3c   :  { %v4498_v45 = vld [vmem:[%s7667_s0 + $0x68] sm:$0xff]  ;;  %v4504_v62 = vld [vmem:[%s7667_s0 + $0x58] sm:$0xff]  ;;  %v155_v54 = vadd.f32 %v154_v8, %v4462_v3  ;;  %v4513_v46 = vld [vmem:[%s7667_s0 + $0x60] sm:$0xff]  ;;  %170 = vadd.xlane.f32.xlu0 %v169_v39 }
  0x3d   :  { %7809 = vst [vmem:[#allocation70_spill] sm:$0xff] %v4498_v45  ;;  %v159_v16 = vsel %vm149_vm0, %v4498_v45, 0.0  ;;  %v147_v43 = vadd.f32 %v146_v31, %v4476_v15  ;;  %v178_v32 = vadd.f32 %v177_v53, %v176_v51 }
  0x3e   :  { %v156_v58 = vadd.f32 %v155_v54, %v4482_v41 }
  0x3f   :  { %v148_v8 = vadd.f32 %v147_v43, %v4491_v47  ;;  %179 = vadd.xlane.f32.xlu1 %v178_v32 }
  0x40   :  { %v157_v3 = vadd.f32 %v156_v58, %v4504_v62 }
  0x41   :  { %v151_v57 = vadd.f32 %v150_v28, %v148_v8 }
  0x42   :  { %v158_v10 = vadd.f32 %v157_v3, %v4513_v46 }
  0x43   :  { %152 = vadd.xlane.f32.xlu0 %v151_v57 }
  0x44   :  { %v160_v63 = vadd.f32 %v159_v16, %v158_v10 }
  0x46   :  { %161 = vadd.xlane.f32.xlu1 %v160_v63 }
  0xa3   :  { %v279_v22 = vpop.xlane.xlu0 %278 }
  0xa4   :  { %v4520_v45 = vmul.f32 0.0012755102, %v279_v22 }
  0xa5   :  { %v261_v33 = vpop.xlane.xlu1 %260 }
  0xa6   :  { %v4522_v31 = vmul.f32 0.0012755102, %v261_v33  ;;  %v403_v51 = vsub.f32 %v3835_v0, %v4520_v45  ;;  %v404_v53 = vsub.f32 %v3840_v1, %v4520_v45  ;;  %v405_v32 = vsub.f32 %v3845_v2, %v4520_v45 }
  0xa7   :  { %v406_v3 = vsub.f32 %v3852_v4, %v4520_v45  ;;  %v407_v58 = vsub.f32 %v3867_v7, %v4520_v45  ;;  %v408_v28 = vsub.f32 %v3880_v11, %v4520_v45  ;;  %v409_v33 = vsub.f32 %v3895_v14, %v4520_v45  ;;  %v288_v54 = vpop.xlane.xlu0 %287 }
  0xa8   :  { %v515_v0 = vmul.f32 %v403_v51, %v403_v51  ;;  %v516_v16 = vmul.f32 %v404_v53, %v404_v53  ;;  %v4538_v39 = vmul.f32 0.0012755102, %v288_v54  ;;  %v517_v1 = vmul.f32 %v405_v32, %v405_v32 }
  0xa9   :  { %v389_v2 = vsub.f32 %v3857_v5, %v4522_v31  ;;  %v518_v43 = vmul.f32 %v406_v3, %v406_v3  ;;  %v519_v4 = vmul.f32 %v407_v58, %v407_v58  ;;  %v521_v8 = vmul.f32 %v409_v33, %v409_v33  ;;  %v270_v7 = vpop.xlane.xlu1 %269 }
  0xaa   :  { %v655_v57 = vadd.f32 %v516_v16, %v515_v0  ;;  %v520_v10 = vmul.f32 %v408_v28, %v408_v28  ;;  %v410_v11 = vsub.f32 %v3890_v13, %v4538_v39  ;;  %v411_v14 = vsub.f32 %v3902_v17, %v4538_v39 }
  0xab   :  { %v412_v63 = vsub.f32 %v3907_v18, %v4538_v39  ;;  %v413_v5 = vsub.f32 %v3922_v21, %v4538_v39  ;;  %v414_v53 = vsub.f32 %v3953_v30, %v4538_v39  ;;  %v390_v32 = vsub.f32 %v3862_v6, %v4522_v31 }
  0xac   :  { %v243_v22 = vpop.xlane.xlu0 %242  ;;  %v656_v51 = vadd.f32 %v655_v57, %v517_v1  ;;  %v415_v13 = vsub.f32 %v3963_v35, %v4538_v39  ;;  %v416_v17 = vsub.f32 %v3985_v40, %v4538_v39  ;;  %v522_v3 = vmul.f32 %v410_v11, %v410_v11 }
  0xad   :  { %v391_v18 = vsub.f32 %v3873_v9, %v4522_v31  ;;  %v4560_v58 = vmul.f32 0.0012755102, %v270_v7  ;;  %v660_v21 = vsel %vm149_vm0, %v521_v8, 0.0  ;;  %v523_v33 = vmul.f32 %v411_v14, %v411_v14 }
  0xae   :  { %v657_v28 = vadd.f32 %v656_v51, %v518_v43  ;;  %v4563_v30 = vmul.f32 0.0012755102, %v243_v22  ;;  %v252_v54 = vpop.xlane.xlu1 %251  ;;  %v524_v6 = vmul.f32 %v412_v63, %v412_v63  ;;  %v525_v0 = vmul.f32 %v413_v5, %v413_v5 }
  0xaf   :  { %v528_v16 = vmul.f32 %v416_v17, %v416_v17  ;;  %v526_v1 = vmul.f32 %v414_v53, %v414_v53  ;;  %v664_v57 = vadd.f32 %v523_v33, %v522_v3  ;;  %v392_v40 = vsub.f32 %v3885_v12, %v4522_v31 }
  0xb0   :  { %v658_v35 = vadd.f32 %v657_v28, %v519_v4  ;;  %v527_v9 = vmul.f32 %v415_v13, %v415_v13  ;;  %v393_v43 = vsub.f32 %v3912_v19, %v4522_v31  ;;  %v395_v8 = vsub.f32 %v3917_v20, %v4522_v31 }
  0xb1   :  { %v225_v11 = vpop.xlane.xlu0 %224  ;;  %v501_v7 = vmul.f32 %v389_v2, %v389_v2  ;;  %v665_v22 = vadd.f32 %v664_v57, %v524_v6  ;;  %v394_v63 = vsub.f32 %v3948_v29, %v4522_v31  ;;  %v502_v4 = vmul.f32 %v390_v32, %v390_v32 }
  0xb2   :  { %v659_v14 = vadd.f32 %v658_v35, %v520_v10  ;;  %v4573_v51 = vmul.f32 0.0012755102, %v252_v54  ;;  %v4575_v5 = vmul.f32 0.0012755102, %v225_v11  ;;  %v669_v53 = vsel %vm149_vm0, %v528_v16, 0.0 }
  0xb3   :  { %v234_v12 = vpop.xlane.xlu1 %233  ;;  %v503_v13 = vmul.f32 %v391_v18, %v391_v18  ;;  %v666_v19 = vadd.f32 %v665_v22, %v525_v0  ;;  %v504_v3 = vmul.f32 %v392_v40, %v392_v40  ;;  %v507_v28 = vmul.f32 %v395_v8, %v395_v8 }
  0xb4   :  { %v661_v17 = vadd.f32 %v660_v21, %v659_v14  ;;  %v637_v20 = vadd.f32 %v502_v4, %v501_v7  ;;  %v396_v2 = vsub.f32 %v3931_v25, %v4560_v58  ;;  %v397_v29 = vsub.f32 %v3936_v26, %v4560_v58 }
  0xb5   :  { %v398_v10 = vsub.f32 %v3941_v27, %v4560_v58  ;;  %v667_v33 = vadd.f32 %v666_v19, %v526_v1  ;;  %v505_v54 = vmul.f32 %v393_v43, %v393_v43  ;;  %v506_v6 = vmul.f32 %v394_v63, %v394_v63 }
  0xb6   :  { %v207_v32 = vpop.xlane.xlu0 %206  ;;  %662 = vadd.xlane.f32.xlu0 %v661_v17  ;;  %v399_v18 = vsub.f32 %v3968_v36, %v4560_v58  ;;  %v4586_v21 = vmul.f32 0.0012755102, %v234_v12  ;;  %v638_v0 = vadd.f32 %v637_v20, %v503_v13  ;;  %v400_v25 = vsub.f32 %v3991_v42, %v4560_v58 }
  0xb7   :  { %v402_v26 = vsub.f32 %v4021_v52, %v4560_v58  ;;  %v668_v35 = vadd.f32 %v667_v33, %v527_v9  ;;  %v508_v27 = vmul.f32 %v396_v2, %v396_v2  ;;  %v509_v57 = vmul.f32 %v397_v29, %v397_v29 }
  0xb8   :  { %v510_v40 = vmul.f32 %v398_v10, %v398_v10  ;;  %v4592_v1 = vmul.f32 0.0012755102, %v207_v32  ;;  %v639_v11 = vadd.f32 %v638_v0, %v504_v3  ;;  %v642_v43 = vsel %vm149_vm0, %v507_v28, 0.0 }
  0xb9   :  { %v401_v36 = vsub.f32 %v4005_v48, %v4560_v58  ;;  %v670_v42 = vadd.f32 %v669_v53, %v668_v35  ;;  %v511_v14 = vmul.f32 %v399_v18, %v399_v18  ;;  %v646_v22 = vadd.f32 %v509_v57, %v508_v27 }
  0xba   :  { %v216_v16 = vpop.xlane.xlu1 %215  ;;  %v640_v52 = vadd.f32 %v639_v11, %v505_v54  ;;  %v514_v63 = vmul.f32 %v402_v26, %v402_v26  ;;  %v375_v9 = vsub.f32 %v3973_v37, %v4563_v30  ;;  %v376_v4 = vsub.f32 %v3978_v38, %v4563_v30 }
  0xbb   :  { %v4597_v8 = vmul.f32 0.0012755102, %v216_v16  ;;  %671 = vadd.xlane.f32.xlu1 %v670_v42  ;;  %v512_v12 = vmul.f32 %v400_v25, %v400_v25  ;;  %v647_v13 = vadd.f32 %v646_v22, %v510_v40  ;;  %v377_v48 = vsub.f32 %v3997_v44, %v4563_v30 }
  0xbc   :  { %v378_v17 = vsub.f32 %v4010_v49, %v4563_v30  ;;  %v641_v19 = vadd.f32 %v640_v52, %v506_v6  ;;  %v513_v28 = vmul.f32 %v401_v36, %v401_v36  ;;  %v381_v37 = vsub.f32 %v4045_v60, %v4563_v30 }
  0xbd   :  { %v189_v7 = vpop.xlane.xlu0 %188  ;;  %v648_v20 = vadd.f32 %v647_v13, %v511_v14  ;;  %v379_v38 = vsub.f32 %v4040_v59, %v4563_v30  ;;  %v487_v2 = vmul.f32 %v375_v9, %v375_v9  ;;  %v488_v29 = vmul.f32 %v376_v4, %v376_v4 }
  0xbe   :  { %v4607_v53 = vmul.f32 0.0012755102, %v189_v7  ;;  %v643_v10 = vadd.f32 %v642_v43, %v641_v19  ;;  %v651_v44 = vsel %vm149_vm0, %v514_v63, 0.0  ;;  %v380_v49 = vsub.f32 %v4077_v23, %v4563_v30  ;;  %v7811_v63 = vld [vmem:[#allocation8_spill] sm:$0xff] }
  0xbf   :  { %v489_v33 = vmul.f32 %v377_v48, %v377_v48  ;;  %v649_v6 = vadd.f32 %v648_v20, %v512_v12  ;;  %v490_v18 = vmul.f32 %v378_v17, %v378_v17  ;;  %v493_v0 = vmul.f32 %v381_v37, %v381_v37  ;;  %v7813_v17 = vld [vmem:[#allocation6_spill] sm:$0xff]  ;;  %v7815_v37 = vld [vmem:[#allocation9_spill] sm:$0xff] }
  0xc0   :  { %644 = vadd.xlane.f32.xlu0 %v643_v10  ;;  %v619_v60 = vadd.f32 %v488_v29, %v487_v2  ;;  %v382_v59 = vsub.f32 %v4015_v50, %v4573_v51  ;;  %v383_v25 = vsub.f32 %v4028_v55, %v4573_v51  ;;  %v384_v26 = vsub.f32 %v4033_v56, %v4573_v51  ;;  %v7810_v50 = vld [vmem:[#allocation12_spill] sm:$0xff]  ;;  %v7816_v29 = vld [vmem:[#allocation13_spill] sm:$0xff] }
  0xc1   :  { %v198_v3 = vpop.xlane.xlu1 %197  ;;  %v650_v23 = vadd.f32 %v649_v6, %v513_v28  ;;  %v491_v35 = vmul.f32 %v379_v38, %v379_v38  ;;  %v385_v57 = vsub.f32 %v4050_v61, %v4573_v51  ;;  %v492_v40 = vmul.f32 %v380_v49, %v380_v49 }
  0xc2   :  { %v4616_v54 = vmul.f32 0.0012755102, %v198_v3  ;;  %v620_v11 = vadd.f32 %v619_v60, %v489_v33  ;;  %v386_v43 = vsub.f32 %v4082_v24, %v4573_v51  ;;  %v388_v36 = vsub.f32 %v7810_v50, %v4573_v51  ;;  %v7812_v24 = vld [vmem:[#allocation5_spill] sm:$0xff]  ;;  %v7814_v3 = vld [vmem:[#allocation7_spill] sm:$0xff]  ;;  %v7818_v33 = vld [vmem:[#allocation18_spill] sm:$0xff] }
  0xc3   :  { %v652_v55 = vadd.f32 %v651_v44, %v650_v23  ;;  %v494_v7 = vmul.f32 %v382_v59, %v382_v59  ;;  %v495_v42 = vmul.f32 %v383_v25, %v383_v25  ;;  %v496_v56 = vmul.f32 %v384_v26, %v384_v26  ;;  %v7819_v50 = vld [vmem:[#allocation10_spill] sm:$0xff] }
  0xc4   :  { %v621_v14 = vadd.f32 %v620_v11, %v490_v18  ;;  %v624_v22 = vsel %vm149_vm0, %v493_v0, 0.0  ;;  %v387_v61 = vsub.f32 %v7811_v63, %v4573_v51  ;;  %v497_v9 = vmul.f32 %v385_v57, %v385_v57 }
  0xc5   :  { %v171_v32 = vpop.xlane.xlu0 %170  ;;  %653 = vadd.xlane.f32.xlu1 %v652_v55  ;;  %v500_v4 = vmul.f32 %v388_v36, %v388_v36  ;;  %v628_v12 = vadd.f32 %v495_v42, %v494_v7  ;;  %v361_v13 = vsub.f32 %v7812_v24, %v4575_v5  ;;  %v362_v19 = vsub.f32 %v7813_v17, %v4575_v5  ;;  %v7824_v24 = vld [vmem:[#allocation27_spill] sm:$0xff] }
  0xc6   :  { %v4624_v16 = vmul.f32 0.0012755102, %v171_v32  ;;  %v622_v48 = vadd.f32 %v621_v14, %v491_v35  ;;  %v363_v28 = vsub.f32 %v7814_v3, %v4575_v5  ;;  %v364_v20 = vsub.f32 %v7815_v37, %v4575_v5  ;;  %v7817_v32 = vld [vmem:[#allocation15_spill] sm:$0xff]  ;;  %v7821_v14 = vld [vmem:[#allocation14_spill] sm:$0xff] }
  0xc7   :  { %v498_v38 = vmul.f32 %v386_v43, %v386_v43  ;;  %v629_v2 = vadd.f32 %v628_v12, %v496_v56  ;;  %v365_v10 = vsub.f32 %v7816_v29, %v4575_v5  ;;  %v366_v44 = vsub.f32 %v7817_v32, %v4575_v5 }
  0xc8   :  { %v180_v27 = vpop.xlane.xlu1 %179  ;;  %v623_v49 = vadd.f32 %v622_v48, %v492_v40  ;;  %v367_v6 = vsub.f32 %v7818_v33, %v4575_v5  ;;  %v473_v18 = vmul.f32 %v361_v13, %v361_v13  ;;  %v474_v0 = vmul.f32 %v362_v19, %v362_v19  ;;  %v7820_v40 = vld [vmem:[#allocation11_spill] sm:$0xff]  ;;  %v7825_v48 = vld [vmem:[#allocation22_spill] sm:$0xff] }
  0xc9   :  { %v4633_v52 = vmul.f32 0.0012755102, %v180_v27  ;;  %v499_v60 = vmul.f32 %v387_v61, %v387_v61  ;;  %v630_v59 = vadd.f32 %v629_v2, %v497_v9  ;;  %v633_v25 = vsel %vm149_vm0, %v500_v4, 0.0  ;;  %v7823_v4 = vld [vmem:[#allocation21_spill] sm:$0xff] }
  0xca   :  { %v475_v26 = vmul.f32 %v363_v28, %v363_v28  ;;  %v625_v23 = vadd.f32 %v624_v22, %v623_v49  ;;  %v476_v35 = vmul.f32 %v364_v20, %v364_v20  ;;  %v477_v27 = vmul.f32 %v365_v10, %v365_v10  ;;  %v7822_v22 = vld [vmem:[#allocation16_spill] sm:$0xff]  ;;  %v7826_v49 = vld [vmem:[#allocation17_spill] sm:$0xff] }
  0xcb   :  { %v601_v57 = vadd.f32 %v474_v0, %v473_v18  ;;  %v631_v11 = vadd.f32 %v630_v59, %v498_v38  ;;  %v479_v43 = vmul.f32 %v367_v6, %v367_v6  ;;  %v368_v36 = vsub.f32 %v7819_v50, %v4586_v21  ;;  %v7827_v18 = vld [vmem:[#allocation19_spill] sm:$0xff] }
  0xcc   :  { %v369_v55 = vsub.f32 %v7820_v40, %v4586_v21  ;;  %626 = vadd.xlane.f32.xlu0 %v625_v23  ;;  %v153_v7 = vpop.xlane.xlu0 %152  ;;  %v478_v42 = vmul.f32 %v366_v44, %v366_v44  ;;  %v370_v63 = vsub.f32 %v7821_v14, %v4586_v21  ;;  %v371_v61 = vsub.f32 %v7822_v22, %v4586_v21 }
  0xcd   :  { %v602_v56 = vadd.f32 %v601_v57, %v475_v26  ;;  %v632_v9 = vadd.f32 %v631_v11, %v499_v60  ;;  %v372_v12 = vsub.f32 %v7823_v4, %v4586_v21  ;;  %v373_v13 = vsub.f32 %v7824_v24, %v4586_v21  ;;  %v7828_v60 = vld [vmem:[#allocation20_spill] sm:$0xff]  ;;  %v7829_v26 = vld [vmem:[#allocation23_spill] sm:$0xff] }
  0xce   :  { %v374_v17 = vsub.f32 %v7825_v48, %v4586_v21  ;;  %v480_v3 = vmul.f32 %v368_v36, %v368_v36  ;;  %v481_v28 = vmul.f32 %v369_v55, %v369_v55  ;;  %v482_v37 = vmul.f32 %v370_v63, %v370_v63  ;;  %v7832_v63 = vld [vmem:[#allocation29_spill] sm:$0xff]  ;;  %v7833_v4 = vld [vmem:[#allocation24_spill] sm:$0xff] }
  0xcf   :  { %v603_v19 = vadd.f32 %v602_v56, %v476_v35  ;;  %v4666_v20 = vmul.f32 0.0012755102, %v153_v7  ;;  %v634_v38 = vadd.f32 %v633_v25, %v632_v9  ;;  %v606_v2 = vsel %vm149_vm0, %v479_v43, 0.0  ;;  %v7831_v43 = vld [vmem:[#allocation33_spill] sm:$0xff] }
  0xd0   :  { %v483_v29 = vmul.f32 %v371_v61, %v371_v61  ;;  %v486_v32 = vmul.f32 %v374_v17, %v374_v17  ;;  %v610_v44 = vadd.f32 %v481_v28, %v480_v3  ;;  %v347_v33 = vsub.f32 %v7826_v49, %v4592_v1  ;;  %v7835_v17 = vld [vmem:[#allocation26_spill] sm:$0xff]  ;;  %v7839_v49 = vld [vmem:[#allocation39_spill] sm:$0xff] }
  0xd1   :  { %v604_v10 = vadd.f32 %v603_v19, %v477_v27  ;;  %635 = vadd.xlane.f32.xlu1 %v634_v38  ;;  %v484_v6 = vmul.f32 %v372_v12, %v372_v12  ;;  %v348_v0 = vsub.f32 %v7827_v18, %v4592_v1  ;;  %v349_v59 = vsub.f32 %v7828_v60, %v4592_v1  ;;  %v7830_v27 = vld [vmem:[#allocation28_spill] sm:$0xff]  ;;  %v7836_v3 = vld [vmem:[#allocation30_spill] sm:$0xff] }
  0xd2   :  { %v350_v25 = vsub.f32 %v7829_v26, %v4592_v1  ;;  %v485_v35 = vmul.f32 %v373_v13, %v373_v13  ;;  %v611_v57 = vadd.f32 %v610_v44, %v482_v37  ;;  %v351_v11 = vsub.f32 %v7830_v27, %v4592_v1  ;;  %v7834_v13 = vld [vmem:[#allocation25_spill] sm:$0xff] }
  0xd3   :  { %v605_v23 = vadd.f32 %v604_v10, %v478_v42  ;;  %v353_v50 = vsub.f32 %v7831_v43, %v4592_v1  ;;  %v459_v36 = vmul.f32 %v347_v33, %v347_v33  ;;  %v460_v40 = vmul.f32 %v348_v0, %v348_v0  ;;  %v7838_v10 = vld [vmem:[#allocation36_spill] sm:$0xff]  ;;  %v7840_v43 = vld [vmem:[#allocation31_spill] sm:$0xff] }
  0xd4   :  { %v461_v55 = vmul.f32 %v349_v59, %v349_v59  ;;  %v612_v56 = vadd.f32 %v611_v57, %v483_v29  ;;  %v615_v14 = vsel %vm149_vm0, %v486_v32, 0.0  ;;  %v352_v22 = vsub.f32 %v7832_v63, %v4592_v1 }
  0xd5   :  { %v607_v7 = vadd.f32 %v606_v2, %v605_v23  ;;  %v462_v61 = vmul.f32 %v350_v25, %v350_v25  ;;  %v465_v42 = vmul.f32 %v353_v50, %v353_v50  ;;  %v583_v9 = vadd.f32 %v460_v40, %v459_v36  ;;  %v7837_v2 = vld [vmem:[#allocation34_spill] sm:$0xff]  ;;  %v7842_v40 = vld [vmem:[#allocation35_spill] sm:$0xff] }
  0xd6   :  { %v354_v12 = vsub.f32 %v7833_v4, %v4597_v8  ;;  %v613_v24 = vadd.f32 %v612_v56, %v484_v6  ;;  %v355_v48 = vsub.f32 %v7834_v13, %v4597_v8  ;;  %v356_v19 = vsub.f32 %v7835_v17, %v4597_v8  ;;  %v7846_v17 = vld [vmem:[#allocation48_spill] sm:$0xff] }
  0xd7   :  { %608 = vadd.xlane.f32.xlu0 %v607_v7  ;;  %v357_v28 = vsub.f32 %v7836_v3, %v4597_v8  ;;  %v463_v37 = vmul.f32 %v351_v11, %v351_v11  ;;  %v584_v38 = vadd.f32 %v583_v9, %v461_v55  ;;  %v358_v29 = vsub.f32 %v7837_v2, %v4597_v8  ;;  %v162_v7 = vpop.xlane.xlu1 %161  ;;  %v7844_v9 = vld [vmem:[#allocation42_spill] sm:$0xff] }
  0xd8   :  { %v359_v32 = vsub.f32 %v7838_v10, %v4597_v8  ;;  %v614_v44 = vadd.f32 %v613_v24, %v485_v35  ;;  %v360_v33 = vsub.f32 %v7839_v49, %v4597_v8  ;;  %v466_v6 = vmul.f32 %v354_v12, %v354_v12  ;;  %v7841_v35 = vld [vmem:[#allocation32_spill] sm:$0xff]  ;;  %v7845_v12 = vld [vmem:[#allocation43_spill] sm:$0xff] }
  0xd9   :  { %v467_v18 = vmul.f32 %v355_v48, %v355_v48  ;;  %v464_v0 = vmul.f32 %v352_v22, %v352_v22  ;;  %v585_v60 = vadd.f32 %v584_v38, %v462_v61  ;;  %v588_v59 = vsel %vm149_vm0, %v465_v42, 0.0 }
  0xda   :  { %v468_v26 = vmul.f32 %v356_v19, %v356_v19  ;;  %v616_v25 = vadd.f32 %v615_v14, %v614_v44  ;;  %v469_v23 = vmul.f32 %v357_v28, %v357_v28  ;;  %v470_v57 = vmul.f32 %v358_v29, %v358_v29  ;;  %v7843_v14 = vld [vmem:[#allocation37_spill] sm:$0xff]  ;;  %v7847_v44 = vld [vmem:[#allocation38_spill] sm:$0xff] }
  0xdb   :  { %v592_v27 = vadd.f32 %v467_v18, %v466_v6  ;;  %v586_v11 = vadd.f32 %v585_v60, %v463_v37  ;;  %v333_v50 = vsub.f32 %v7840_v43, %v4607_v53  ;;  %v334_v36 = vsub.f32 %v7841_v35, %v4607_v53  ;;  %v7849_v60 = vld [vmem:[#allocation41_spill] sm:$0xff] }
  0xdc   :  { %v335_v55 = vsub.f32 %v7842_v40, %v4607_v53  ;;  %617 = vadd.xlane.f32.xlu1 %v616_v25  ;;  %v471_v56 = vmul.f32 %v359_v32, %v359_v32  ;;  %v472_v63 = vmul.f32 %v360_v33, %v360_v33  ;;  %v336_v61 = vsub.f32 %v7843_v14, %v4607_v53  ;;  %v7848_v33 = vld [vmem:[#allocation40_spill] sm:$0xff]  ;;  %v7853_v14 = vld [vmem:[#allocation50_spill] sm:$0xff] }
  0xdd   :  { %v593_v22 = vadd.f32 %v592_v27, %v468_v26  ;;  %v587_v42 = vadd.f32 %v586_v11, %v464_v0  ;;  %v337_v4 = vsub.f32 %v7844_v9, %v4607_v53  ;;  %v339_v24 = vsub.f32 %v7845_v12, %v4607_v53  ;;  %v7850_v25 = vld [vmem:[#allocation44_spill] sm:$0xff]  ;;  %v7851_v11 = vld [vmem:[#allocation49_spill] sm:$0xff]  ;;  %v7855_v12 = vld [vmem:[#allocation46_spill] sm:$0xff] }
  0xde   :  { %v445_v13 = vmul.f32 %v333_v50, %v333_v50  ;;  %v338_v19 = vsub.f32 %v7846_v17, %v4607_v53  ;;  %v446_v3 = vmul.f32 %v334_v36, %v334_v36  ;;  %v447_v28 = vmul.f32 %v335_v55, %v335_v55  ;;  %v7852_v50 = vld [vmem:[#allocation54_spill] sm:$0xff]  ;;  %v7854_v9 = vld [vmem:[#allocation45_spill] sm:$0xff]  ;;  %v7856_v17 = vld [vmem:[#allocation47_spill] sm:$0xff] }
  0xdf   :  { %v594_v48 = vadd.f32 %v593_v22, %v469_v23  ;;  %v4713_v37 = vmul.f32 0.0012755102, %v162_v7  ;;  %v589_v38 = vadd.f32 %v588_v59, %v587_v42  ;;  %v448_v2 = vmul.f32 %v336_v61, %v336_v61 }
  0xe0   :  { %v451_v29 = vmul.f32 %v339_v24, %v339_v24  ;;  %v565_v32 = vadd.f32 %v446_v3, %v445_v13  ;;  %v340_v49 = vsub.f32 %v7847_v44, %v4616_v54  ;;  %v341_v6 = vsub.f32 %v7848_v33, %v4616_v54  ;;  %v7857_v3 = vld [vmem:[#allocation51_spill] sm:$0xff] }
  0xe1   :  { %v595_v10 = vadd.f32 %v594_v48, %v470_v57  ;;  %590 = vadd.xlane.f32.xlu0 %v589_v38  ;;  %v597_v18 = vsel %vm149_vm0, %v472_v63, 0.0  ;;  %v449_v0 = vmul.f32 %v337_v4, %v337_v4  ;;  %v342_v26 = vsub.f32 %v7849_v60, %v4616_v54 }
  0xe2   :  { %v343_v59 = vsub.f32 %v7850_v25, %v4616_v54  ;;  %v450_v27 = vmul.f32 %v338_v19, %v338_v19  ;;  %v566_v57 = vadd.f32 %v565_v32, %v447_v28  ;;  %v344_v43 = vsub.f32 %v7851_v11, %v4616_v54  ;;  %v7859_v32 = vld [vmem:[#allocation57_spill] sm:$0xff]  ;;  %v7860_v11 = vld [vmem:[#allocation52_spill] sm:$0xff] }
  0xe3   :  { %v596_v23 = vadd.f32 %v595_v10, %v471_v56  ;;  %v346_v35 = vsub.f32 %v7852_v50, %v4616_v54  ;;  %v452_v36 = vmul.f32 %v340_v49, %v340_v49  ;;  %v453_v40 = vmul.f32 %v341_v6, %v341_v6 }
  0xe4   :  { %v454_v55 = vmul.f32 %v342_v26, %v342_v26  ;;  %v567_v63 = vadd.f32 %v566_v57, %v448_v2  ;;  %v570_v22 = vsel %vm149_vm0, %v451_v29, 0.0  ;;  %v345_v61 = vsub.f32 %v7853_v14, %v4616_v54  ;;  %v7858_v29 = vld [vmem:[#allocation55_spill] sm:$0xff] }
  0xe5   :  { %v598_v7 = vadd.f32 %v597_v18, %v596_v23  ;;  %v455_v42 = vmul.f32 %v343_v59, %v343_v59  ;;  %v574_v56 = vadd.f32 %v453_v40, %v452_v36  ;;  %v319_v4 = vsub.f32 %v7854_v9, %v4624_v16  ;;  %v7864_v14 = vld [vmem:[#allocation63_spill] sm:$0xff] }
  0xe6   :  { %v320_v24 = vsub.f32 %v7855_v12, %v4624_v16  ;;  %v568_v13 = vadd.f32 %v567_v63, %v449_v0  ;;  %v456_v48 = vmul.f32 %v344_v43, %v344_v43  ;;  %v321_v19 = vsub.f32 %v7856_v17, %v4624_v16 }
  0xe7   :  { %599 = vadd.xlane.f32.xlu1 %v598_v7  ;;  %v322_v28 = vsub.f32 %v7857_v3, %v4624_v16  ;;  %v458_v38 = vmul.f32 %v346_v35, %v346_v35  ;;  %v575_v2 = vadd.f32 %v574_v56, %v454_v55  ;;  %v323_v10 = vsub.f32 %v7858_v29, %v4624_v16  ;;  %v7861_v35 = vld [vmem:[#allocation53_spill] sm:$0xff]  ;;  %v7863_v55 = vld [vmem:[#allocation58_spill] sm:$0xff] }
  0xe8   :  { %v325_v44 = vsub.f32 %v7859_v32, %v4624_v16  ;;  %v569_v49 = vadd.f32 %v568_v13, %v450_v27  ;;  %v431_v33 = vmul.f32 %v319_v4, %v319_v4  ;;  %v432_v6 = vmul.f32 %v320_v24, %v320_v24  ;;  %v7862_v27 = vld [vmem:[#allocation56_spill] sm:$0xff]  ;;  %v7865_v56 = vld [vmem:[#allocation69_spill] sm:$0xff] }
  0xe9   :  { %v433_v18 = vmul.f32 %v321_v19, %v321_v19  ;;  %v457_v0 = vmul.f32 %v345_v61, %v345_v61  ;;  %v576_v60 = vadd.f32 %v575_v2, %v455_v42  ;;  %v324_v26 = vsub.f32 %v4392_v34, %v4624_v16 }
  0xea   :  { %v434_v25 = vmul.f32 %v322_v28, %v322_v28  ;;  %v571_v59 = vadd.f32 %v570_v22, %v569_v49  ;;  %v437_v23 = vmul.f32 %v325_v44, %v325_v44  ;;  %v547_v57 = vadd.f32 %v432_v6, %v431_v33  ;;  %v7868_v44 = vld [vmem:[#allocation61_spill] sm:$0xff]  ;;  %v7869_v33 = vld [vmem:[#allocation62_spill] sm:$0xff] }
  0xeb   :  { %v326_v43 = vsub.f32 %v7860_v11, %v4633_v52  ;;  %v577_v50 = vadd.f32 %v576_v60, %v456_v48  ;;  %v327_v36 = vsub.f32 %v7861_v35, %v4633_v52  ;;  %v328_v40 = vsub.f32 %v7862_v27, %v4633_v52  ;;  %v7866_v48 = vld [vmem:[#allocation60_spill] sm:$0xff] }
  0xec   :  { %v329_v7 = vsub.f32 %v7863_v55, %v4633_v52  ;;  %572 = vadd.xlane.f32.xlu0 %v571_v59  ;;  %v579_v34 = vsel %vm149_vm0, %v458_v38, 0.0  ;;  %v435_v63 = vmul.f32 %v323_v10, %v323_v10  ;;  %v548_v22 = vadd.f32 %v547_v57, %v433_v18  ;;  %v7867_v10 = vld [vmem:[#allocation59_spill] sm:$0xff] }
  0xed   :  { %v330_v61 = vsub.f32 %v7864_v14, %v4633_v52  ;;  %v578_v42 = vadd.f32 %v577_v50, %v457_v0  ;;  %v331_v9 = vsub.f32 %v7865_v56, %v4633_v52  ;;  %v438_v4 = vmul.f32 %v326_v43, %v326_v43  ;;  %v7871_v50 = vld [vmem:[#allocation65_spill] sm:$0xff]  ;;  %v7874_v56 = vld [vmem:[#allocation68_spill] sm:$0xff] }
  0xee   :  { %v439_v12 = vmul.f32 %v327_v36, %v327_v36  ;;  %v436_v24 = vmul.f32 %v324_v26, %v324_v26  ;;  %v549_v13 = vadd.f32 %v548_v22, %v434_v25  ;;  %v332_v17 = vsub.f32 %v7866_v48, %v4633_v52  ;;  %v7870_v26 = vld [vmem:[#allocation64_spill] sm:$0xff]  ;;  %v7872_v22 = vld [vmem:[#allocation66_spill] sm:$0xff] }
  0xef   :  { %v440_v19 = vmul.f32 %v328_v40, %v328_v40  ;;  %v580_v3 = vadd.f32 %v579_v34, %v578_v42  ;;  %v552_v28 = vsel %vm149_vm0, %v437_v23, 0.0  ;;  %v441_v38 = vmul.f32 %v329_v7, %v329_v7 }
  0xf0   :  { %v556_v2 = vadd.f32 %v439_v12, %v438_v4  ;;  %v550_v29 = vadd.f32 %v549_v13, %v435_v63  ;;  %v305_v32 = vsub.f32 %v7867_v10, %v4666_v20  ;;  %v306_v49 = vsub.f32 %v7868_v44, %v4666_v20 }
  0xf1   :  { %v307_v6 = vsub.f32 %v7869_v33, %v4666_v20  ;;  %581 = vadd.xlane.f32.xlu1 %v580_v3  ;;  %v442_v18 = vmul.f32 %v330_v61, %v330_v61  ;;  %v443_v0 = vmul.f32 %v331_v9, %v331_v9  ;;  %v308_v25 = vsub.f32 %v7870_v26, %v4666_v20  ;;  %v7873_v61 = vld [vmem:[#allocation67_spill] sm:$0xff] }
  0xf2   :  { %v557_v60 = vadd.f32 %v556_v2, %v440_v19  ;;  %v551_v59 = vadd.f32 %v550_v29, %v436_v24  ;;  %v444_v23 = vmul.f32 %v332_v17, %v332_v17  ;;  %v309_v57 = vsub.f32 %v4476_v15, %v4666_v20  ;;  %v7875_v29 = vld [vmem:[#allocation70_spill] sm:$0xff] }
  0xf3   :  { %v417_v11 = vmul.f32 %v305_v32, %v305_v32  ;;  %v311_v35 = vsub.f32 %v7871_v50, %v4666_v20  ;;  %v418_v36 = vmul.f32 %v306_v49, %v306_v49  ;;  %v419_v27 = vmul.f32 %v307_v6, %v307_v6 }
  0xf4   :  { %v558_v43 = vadd.f32 %v557_v60, %v441_v38  ;;  %v553_v40 = vadd.f32 %v552_v28, %v551_v59  ;;  %v310_v55 = vsub.f32 %v4491_v47, %v4666_v20  ;;  %v420_v7 = vmul.f32 %v308_v25, %v308_v25 }
  0xf5   :  { %v529_v63 = vadd.f32 %v418_v36, %v417_v11  ;;  %v312_v14 = vsub.f32 %v7872_v22, %v4713_v37  ;;  %v313_v15 = vsub.f32 %v7873_v61, %v4713_v37  ;;  %v561_v42 = vsel %vm149_vm0, %v444_v23, 0.0  ;;  %v703_v22 = vld [vmem:[%s7668_s1 + $0x70] sm:$0xff] }
  0xf6   :  { %v559_v34 = vadd.f32 %v558_v43, %v442_v18  ;;  %554 = vadd.xlane.f32.xlu0 %v553_v40  ;;  %v314_v9 = vsub.f32 %v7874_v56, %v4713_v37  ;;  %v315_v4 = vsub.f32 %v4482_v41, %v4713_v37  ;;  %v421_v47 = vmul.f32 %v309_v57, %v309_v57  ;;  %v704_v56 = vld [vmem:[%s7668_s1 + $0x78] sm:$0xff] }
  0xf7   :  { %v423_v24 = vmul.f32 %v311_v35, %v311_v35  ;;  %v530_v13 = vadd.f32 %v529_v63, %v419_v27  ;;  %v316_v48 = vsub.f32 %v4504_v62, %v4713_v37  ;;  %v424_v17 = vmul.f32 %v312_v14, %v312_v14 }
  0xf8   :  { %v560_v12 = vadd.f32 %v559_v34, %v443_v0  ;;  %v425_v19 = vmul.f32 %v313_v15, %v313_v15  ;;  %v426_v3 = vmul.f32 %v314_v9, %v314_v9  ;;  %v422_v38 = vmul.f32 %v310_v55, %v310_v55 }
  0xf9   :  { %v531_v2 = vadd.f32 %v530_v13, %v420_v7  ;;  %v318_v10 = vsub.f32 %v7875_v29, %v4713_v37  ;;  %v317_v32 = vsub.f32 %v4513_v46, %v4713_v37  ;;  %v427_v41 = vmul.f32 %v315_v4, %v315_v4  ;;  %v701_v13 = vld [vmem:[%s7668_s1 + $0x60] sm:$0xff] }
  0xfa   :  { %v562_v28 = vadd.f32 %v561_v42, %v560_v12  ;;  %v538_v44 = vadd.f32 %v425_v19, %v424_v17  ;;  %v7738_v33 = vmov 0   ;;  %v534_v62 = vsel %vm149_vm0, %v423_v24, 0.0 }
  0xfb   :  { %v532_v49 = vadd.f32 %v531_v2, %v421_v47  ;;  %3582 = vset.pattern.permute.xlu0 %v7738_v33  ;;  %v428_v6 = vmul.f32 %v316_v48, %v316_v48  ;;  %3583 = vset.pattern.permute.xlu1 %v7738_v33  ;;  %v430_v60 = vmul.f32 %v318_v10, %v318_v10 }
  0xfc   :  { %563 = vadd.xlane.f32.xlu1 %v562_v28  ;;  %v539_v18 = vadd.f32 %v538_v44, %v426_v3  ;;  %1641 = vmatprep.mubr.bf16.mxu0 %v7738_v33  ;;  %v429_v46 = vmul.f32 %v317_v32, %v317_v32 }
  0xfd   :  { %v533_v0 = vadd.f32 %v532_v49, %v422_v38  ;;  %1881 = vmatprep.mubr.bf16.mxu1 %v7738_v33  ;;  %v543_v23 = vsel %vm149_vm0, %v430_v60, 0.0  ;;  %v702_v38 = vld [vmem:[%s7668_s1 + $0x68] sm:$0xff]  ;;  %v699_v49 = vld [vmem:[%s7668_s1 + $0x50] sm:$0xff] }
  0xfe   :  { %v540_v26 = vadd.f32 %v539_v18, %v427_v41  ;;  %v3703_v33 = vld [vmem:[%s7667_s0 + $0x228] sm:$0xff] }
  0xff   :  { %v535_v25 = vadd.f32 %v534_v62, %v533_v0 }
 0x100   :  { %v541_v59 = vadd.f32 %v540_v26, %v428_v6 }
 0x101   :  { %536 = vadd.xlane.f32.xlu0 %v535_v25 }
 0x102   :  { %v542_v57 = vadd.f32 %v541_v59, %v429_v46  ;;  %v700_v46 = vld [vmem:[%s7668_s1 + $0x58] sm:$0xff] }
 0x104   :  { %v544_v11 = vadd.f32 %v543_v23, %v542_v57 }
 0x106   :  { %545 = vadd.xlane.f32.xlu1 %v544_v11  ;;  %v697_v11 = vld [vmem:[%s7668_s1 + $0x40] sm:$0xff] }
 0x13f   :  { %v663_v43 = vpop.xlane.xlu0 %662 }
 0x140   :  { %v687_v50 = vmul.f32 0.0012755102, %v663_v43 }
 0x142   :  { %v719_v35 = vadd.f32 1e-05, %v687_v50 }
 0x144   :  { %3616 = vrsqrt.f32 %v719_v35  ;;  %v672_v36 = vpop.xlane.xlu1 %671 }
 0x145   :  { %v688_v27 = vmul.f32 0.0012755102, %v672_v36 }
 0x147   :  { %v720_v40 = vadd.f32 1e-05, %v688_v27 }
 0x149   :  { %3618 = vrsqrt.f32 %v720_v40  ;;  %v645_v55 = vpop.xlane.xlu0 %644  ;;  %v698_v40 = vld [vmem:[%s7668_s1 + $0x48] sm:$0xff] }
 0x14a   :  { %v685_v7 = vmul.f32 0.0012755102, %v645_v55 }
 0x14c   :  { %v717_v34 = vadd.f32 1e-05, %v685_v7 }
 0x14e   :  { %3620 = vrsqrt.f32 %v717_v34  ;;  %v654_v63 = vpop.xlane.xlu1 %653 }
 0x14f   :  { %v686_v14 = vmul.f32 0.0012755102, %v654_v63 }
 0x151   :  { %v3617_v61 = vpop.eup %3616  ;;  %v718_v15 = vadd.f32 1e-05, %v686_v14  ;;  %v695_v14 = vld [vmem:[%s7668_s1 + $0x30] sm:$0xff] }
 0x152   :  { %v4799_v42 = vmul.f32 %v3617_v61, %v703_v22 }
 0x153   :  { %3622 = vrsqrt.f32 %v718_v15 }
 0x154   :  { %873 = vperm.xlu0 %3582, %v4799_v42  }
 0x155   :  { %v627_v9 = vpop.xlane.xlu0 %626 }
 0x156   :  { %v3619_v4 = vpop.eup %3618  ;;  %v683_v12 = vmul.f32 0.0012755102, %v627_v9 }
 0x157   :  { %v4805_v47 = vmul.f32 %v3619_v4, %v704_v56 }
 0x158   :  { %v715_v24 = vadd.f32 1e-05, %v683_v12  ;;  %v696_v12 = vld [vmem:[%s7668_s1 + $0x38] sm:$0xff] }
 0x159   :  { %878 = vperm.xlu1 %3583, %v4805_v47  }
 0x15a   :  { %3624 = vrsqrt.f32 %v715_v24  ;;  %v636_v48 = vpop.xlane.xlu1 %635 }
 0x15b   :  { %v3621_v17 = vpop.eup %3620  ;;  %v684_v19 = vmul.f32 0.0012755102, %v636_v48 }
 0x15c   :  { %v4811_v3 = vmul.f32 %v3621_v17, %v701_v13 }
 0x15d   :  { %v716_v28 = vadd.f32 1e-05, %v684_v19 }
 0x15e   :  { %863 = vperm.xlu1 %3583, %v4811_v3  }
 0x15f   :  { %3626 = vrsqrt.f32 %v716_v28 }
 0x160   :  { %v609_v2 = vpop.xlane.xlu0 %608  ;;  %v3623_v29 = vpop.eup %3622 }
 0x161   :  { %v681_v10 = vmul.f32 0.0012755102, %v609_v2  ;;  %v4817_v32 = vmul.f32 %v3623_v29, %v702_v38  ;;  %v693_v38 = vld [vmem:[%s7668_s1 + $0x20] sm:$0xff] }
 0x163   :  { %v713_v41 = vadd.f32 1e-05, %v681_v10  ;;  %868 = vperm.xlu1 %3583, %v4817_v32  }
 0x165   :  { %3628 = vrsqrt.f32 %v713_v41  ;;  %v618_v44 = vpop.xlane.xlu1 %617 }
 0x166   :  { %v682_v62 = vmul.f32 0.0012755102, %v618_v44  ;;  %v694_v44 = vld [vmem:[%s7668_s1 + $0x28] sm:$0xff] }
 0x167   :  { %v3625_v6 = vpop.eup %3624 }
 0x168   :  { %v714_v18 = vadd.f32 1e-05, %v682_v62  ;;  %v4823_v0 = vmul.f32 %v3625_v6, %v699_v49 }
 0x16a   :  { %3630 = vrsqrt.f32 %v714_v18  ;;  %v591_v60 = vpop.xlane.xlu0 %590  ;;  %853 = vperm.xlu1 %3583, %v4823_v0  }
 0x16b   :  { %v679_v26 = vmul.f32 0.0012755102, %v591_v60 }
 0x16c   :  { %v3627_v25 = vpop.eup %3626 }
 0x16d   :  { %v711_v59 = vadd.f32 1e-05, %v679_v26  ;;  %v4829_v23 = vmul.f32 %v3627_v25, %v700_v46  ;;  %v691_v46 = vld [vmem:[%s7668_s1 + $0x10] sm:$0xff] }
 0x16f   :  { %3632 = vrsqrt.f32 %v711_v59  ;;  %858 = vperm.xlu0 %3582, %v4829_v23  }
 0x170   :  { %v600_v57 = vpop.xlane.xlu1 %599 }
 0x171   :  { %v680_v43 = vmul.f32 0.0012755102, %v600_v57 }
 0x172   :  { %v3629_v50 = vpop.eup %3628 }
 0x173   :  { %v712_v35 = vadd.f32 1e-05, %v680_v43  ;;  %v4835_v36 = vmul.f32 %v3629_v50, %v697_v11  ;;  %v692_v11 = vld [vmem:[%s7668_s1 + $0x18] sm:$0xff] }
 0x175   :  { %3634 = vrsqrt.f32 %v712_v35  ;;  %843 = vperm.xlu1 %3583, %v4835_v36   ;;  %v573_v27 = vpop.xlane.xlu0 %572  ;;  %v689_v35 = vld [vmem:[%s7668_s1] sm:$0xff] }
 0x176   :  { %v677_v55 = vmul.f32 0.0012755102, %v573_v27 }
 0x177   :  { %v3631_v7 = vpop.eup %3630 }
 0x178   :  { %v709_v34 = vadd.f32 1e-05, %v677_v55  ;;  %v4841_v63 = vmul.f32 %v3631_v7, %v698_v40  ;;  %v783_v55 = vmul.f32 %v4799_v42, %v4520_v45  ;;  %v767_v7 = vld [vmem:[%s7669_s2 + $0x70] sm:$0xff]  ;;  %v768_v45 = vld [vmem:[%s7669_s2 + $0x78] sm:$0xff] }
 0x179   :  { %v764_v42 = vld [vmem:[%s7669_s2 + $0x58] sm:$0xff] }
 0x17a   :  { %3636 = vrsqrt.f32 %v709_v34  ;;  %v582_v22 = vpop.xlane.xlu1 %581  ;;  %848 = vperm.xlu0 %3582, %v4841_v63   ;;  %v690_v34 = vld [vmem:[%s7668_s1 + $0x8] sm:$0xff] }
 0x17b   :  { %v678_v61 = vmul.f32 0.0012755102, %v582_v22 }
 0x17c   :  { %v3633_v15 = vpop.eup %3632 }
 0x17d   :  { %v710_v56 = vadd.f32 1e-05, %v678_v61  ;;  %v4847_v9 = vmul.f32 %v3633_v15, %v695_v14  ;;  %v799_v14 = vsub.f32 %v767_v7, %v783_v55  ;;  %v784_v61 = vmul.f32 %v4805_v47, %v4538_v39  ;;  %v762_v47 = vld [vmem:[%s7669_s2 + $0x48] sm:$0xff]  ;;  %v3651_v7 = vld [vmem:[%s7667_s0 + $0x338] sm:$0xff] }
 0x17e   :  { %v778_v39 = vmul.f32 %v4841_v63, %v4586_v21  ;;  %v766_v21 = vld [vmem:[%s7669_s2 + $0x68] sm:$0xff] }
 0x17f   :  { %3638 = vrsqrt.f32 %v710_v56  ;;  %v555_v4 = vpop.xlane.xlu0 %554  ;;  %833 = vperm.xlu1 %3583, %v4847_v9   ;;  %v780_v56 = vmul.f32 %v4829_v23, %v4573_v51  ;;  %v765_v51 = vld [vmem:[%s7669_s2 + $0x60] sm:$0xff] }
 0x180   :  { %v675_v24 = vmul.f32 0.0012755102, %v555_v4  ;;  %v800_v4 = vsub.f32 %v768_v45, %v784_v61  ;;  %v3654_v45 = vld [vmem:[%s7667_s0 + $0x330] sm:$0xff] }
 0x182   :  { %v3635_v13 = vpop.eup %3634  ;;  %v707_v48 = vadd.f32 1e-05, %v675_v24  ;;  %v796_v24 = vsub.f32 %v764_v42, %v780_v56 }
 0x183   :  { %v744_v17 = vmul.f32 %v3635_v13, %v696_v12  ;;  %v781_v12 = vmul.f32 %v4811_v3, %v4522_v31  ;;  %v782_v13 = vmul.f32 %v4817_v32, %v4560_v58  ;;  %v760_v3 = vld [vmem:[%s7669_s2 + $0x38] sm:$0xff]  ;;  %v758_v32 = vld [vmem:[%s7669_s2 + $0x28] sm:$0xff] }
 0x184   :  { %3640 = vrsqrt.f32 %v707_v48  ;;  %v794_v48 = vsub.f32 %v762_v47, %v778_v39  ;;  %v3656_v39 = vld [vmem:[%s7667_s0 + $0x348] sm:$0xff]  ;;  %v3657_v47 = vld [vmem:[%s7667_s0 + $0x360] sm:$0xff] }
 0x185   :  { %v564_v19 = vpop.xlane.xlu1 %563  ;;  %838 = vperm.xlu0 %3582, %v744_v17   ;;  %v797_v23 = vsub.f32 %v765_v51, %v781_v12  ;;  %v776_v31 = vmul.f32 %v744_v17, %v4597_v8  ;;  %v798_v63 = vsub.f32 %v766_v21, %v782_v13  ;;  %v763_v8 = vld [vmem:[%s7669_s2 + $0x50] sm:$0xff] }
 0x186   :  { %v676_v28 = vmul.f32 0.0012755102, %v564_v19  ;;  %v779_v19 = vmul.f32 %v4823_v0, %v4563_v30  ;;  %v756_v0 = vld [vmem:[%s7669_s2 + $0x18] sm:$0xff]  ;;  %v3658_v13 = vld [vmem:[%s7667_s0 + $0x370] sm:$0xff] }
 0x187   :  { %v3637_v2 = vpop.eup %3636 }
 0x188   :  { %v708_v29 = vadd.f32 1e-05, %v676_v28  ;;  %v4856_v10 = vmul.f32 %v3637_v2, %v693_v38  ;;  %v792_v28 = vsub.f32 %v760_v3, %v776_v31  ;;  %v795_v17 = vsub.f32 %v763_v8, %v779_v19  ;;  %v3659_v31 = vld [vmem:[%s7667_s0 + $0x358] sm:$0xff]  ;;  %v3660_v3 = vld [vmem:[%s7667_s0 + $0x2a8] sm:$0xff]  ;;  %v3661_v19 = vld [vmem:[%s7667_s0 + $0x2a0] sm:$0xff] }
 0x189   :  { %v777_v38 = vmul.f32 %v4835_v36, %v4575_v5  ;;  %v754_v36 = vld [vmem:[%s7669_s2 + $0x8] sm:$0xff] }
 0x18a   :  { %3642 = vrsqrt.f32 %v708_v29  ;;  %v537_v41 = vpop.xlane.xlu0 %536  ;;  %823 = vperm.xlu1 %3583, %v4856_v10  }
 0x18b   :  { %v673_v49 = vmul.f32 0.0012755102, %v537_v41  ;;  %v775_v41 = vmul.f32 %v4847_v9, %v4592_v1  ;;  %v757_v1 = vld [vmem:[%s7669_s2 + $0x20] sm:$0xff] }
 0x18c   :  { %v3639_v62 = vpop.eup %3638 }
 0x18d   :  { %v705_v6 = vadd.f32 1e-05, %v673_v49  ;;  %v742_v18 = vmul.f32 %v3639_v62, %v694_v44  ;;  %v773_v62 = vmul.f32 %v4856_v10, %v4607_v53  ;;  %v753_v10 = vld [vmem:[%s7669_s2] sm:$0xff] }
 0x18f   :  { %3644 = vrsqrt.f32 %v705_v6  ;;  %v546_v60 = vpop.xlane.xlu1 %545  ;;  %828 = vperm.xlu0 %3582, %v742_v18   ;;  %v774_v58 = vmul.f32 %v742_v18, %v4616_v54  ;;  %v761_v54 = vld [vmem:[%s7669_s2 + $0x40] sm:$0xff]  ;;  %v755_v18 = vld [vmem:[%s7669_s2 + $0x10] sm:$0xff] }
 0x190   :  { %v674_v26 = vmul.f32 0.0012755102, %v546_v60  ;;  %v793_v29 = vsub.f32 %v761_v54, %v777_v38  ;;  %v3664_v38 = vld [vmem:[%s7667_s0 + $0x2b8] sm:$0xff] }
 0x191   :  { %v3641_v25 = vpop.eup %3640  ;;  %v790_v2 = vsub.f32 %v758_v32, %v774_v58  ;;  %v3662_v58 = vld [vmem:[%s7667_s0 + $0x368] sm:$0xff]  ;;  %v3663_v32 = vld [vmem:[%s7667_s0 + $0x378] sm:$0xff] }
 0x192   :  { %v706_v59 = vadd.f32 1e-05, %v674_v26  ;;  %v4865_v57 = vmul.f32 %v3641_v25, %v691_v46 }
 0x194   :  { %3646 = vrsqrt.f32 %v706_v59  ;;  %813 = vperm.xlu1 %3583, %v4865_v57   ;;  %v771_v9 = vmul.f32 %v4865_v57, %v4624_v16 }
 0x196   :  { %v787_v60 = vsub.f32 %v755_v18, %v771_v9  ;;  %v3672_v9 = vld [vmem:[%s7667_s0 + $0x300] sm:$0xff] }
 0x197   :  { %v3643_v43 = vpop.eup %3642 }
 0x198   :  { %v740_v50 = vmul.f32 %v3643_v43, %v692_v11 }
 0x19a   :  { %818 = vperm.xlu0 %3582, %v740_v50   ;;  %v772_v30 = vmul.f32 %v740_v50, %v4633_v52  ;;  %v759_v52 = vld [vmem:[%s7669_s2 + $0x30] sm:$0xff] }
 0x19b   :  { %v791_v49 = vsub.f32 %v759_v52, %v775_v41  ;;  %v3667_v41 = vld [vmem:[%s7667_s0 + $0x2c0] sm:$0xff] }
 0x19c   :  { %v3645_v27 = vpop.eup %3644  ;;  %v788_v44 = vsub.f32 %v756_v0, %v772_v30  ;;  %v3665_v30 = vld [vmem:[%s7667_s0 + $0x2c8] sm:$0xff]  ;;  %v3666_v0 = vld [vmem:[%s7667_s0 + $0x2b0] sm:$0xff] }
 0x19d   :  { %v4874_v40 = vmul.f32 %v3645_v27, %v689_v35  ;;  %v3649_v35 = vld [vmem:[%s7667_s0 + $0x310] sm:$0xff] }
 0x19f   :  { %803 = vperm.xlu1 %3583, %v4874_v40   ;;  %v769_v53 = vmul.f32 %v4874_v40, %v4666_v20  ;;  %v3648_v20 = vld [vmem:[%s7667_s0 + $0x318] sm:$0xff]  ;;  %v3650_v40 = vld [vmem:[%s7667_s0 + $0x328] sm:$0xff] }
 0x1a1   :  { %v3647_v22 = vpop.eup %3646  ;;  %v785_v46 = vsub.f32 %v753_v10, %v769_v53  ;;  %v3674_v10 = vld [vmem:[%s7667_s0 + $0x2f8] sm:$0xff] }
 0x1a2   :  { %v738_v15 = vmul.f32 %v3647_v22, %v690_v34 }
 0x1a3   :  { %1065 = vperm.xlu1 %3583, %v799_v14   ;;  %v3652_v14 = vld [vmem:[%s7667_s0 + $0x350] sm:$0xff] }
 0x1a4   :  { %808 = vperm.xlu0 %3582, %v738_v15   ;;  %v770_v5 = vmul.f32 %v738_v15, %v4713_v37  ;;  %v789_v37 = vsub.f32 %v757_v1, %v773_v62  ;;  %v3653_v15 = vld [vmem:[%s7667_s0 + $0x320] sm:$0xff]  ;;  %v3670_v62 = vld [vmem:[%s7667_s0 + $0x2f0] sm:$0xff] }
 0x1a5   :  { %v3671_v1 = vld [vmem:[%s7667_s0 + $0x2d0] sm:$0xff] }
 0x1a6   :  { %v786_v6 = vsub.f32 %v754_v36, %v770_v5  ;;  %v3668_v5 = vld [vmem:[%s7667_s0 + $0x2e0] sm:$0xff]  ;;  %v3669_v36 = vld [vmem:[%s7667_s0 + $0x2d8] sm:$0xff] }
 0x1a7   :  { %1070 = vperm.xlu1 %3583, %v800_v4   ;;  %v3655_v4 = vld [vmem:[%s7667_s0 + $0x340] sm:$0xff] }
 0x1a8   :  { %1050 = vperm.xlu0 %3582, %v796_v24  }
 0x1ab   :  { %1055 = vperm.xlu1 %3583, %v797_v23  }
 0x1ac   :  { %1040 = vperm.xlu0 %3582, %v794_v48  }
 0x1af   :  { %1060 = vperm.xlu1 %3583, %v798_v63  }
 0x1b0   :  { %1030 = vperm.xlu0 %3582, %v792_v28  }
 0x1b3   :  { %1045 = vperm.xlu1 %3583, %v795_v17  }
 0x1b4   :  { %1020 = vperm.xlu0 %3582, %v790_v2  }
 0x1b7   :  { %1035 = vperm.xlu1 %3583, %v793_v29  }
 0x1b8   :  { %1010 = vperm.xlu0 %3582, %v788_v44  }
 0x1bb   :  { %1025 = vperm.xlu1 %3583, %v791_v49  }
 0x1bc   :  { %1000 = vperm.xlu0 %3582, %v786_v6  }
 0x1bf   :  { %1015 = vperm.xlu1 %3583, %v789_v37  }
 0x1c3   :  { %1005 = vperm.xlu1 %3583, %v787_v60   ;;  %v3673_v60 = vld [vmem:[%s7667_s0 + $0x2e8] sm:$0xff] }
 0x1c7   :  { %995 = vperm.xlu1 %3583, %v785_v46  }
 0x1cf   :  { %v874_v57 = vpop.permute.xlu0 %873 }
 0x1d0   :  { %v4965_v50 = vmul.f32 %v3648_v20, %v874_v57  ;;  %v4970_v27 = vmul.f32 %v3649_v35, %v874_v57  ;;  %v4975_v55 = vmul.f32 %v3650_v40, %v874_v57  ;;  %v4980_v34 = vmul.f32 %v3651_v7, %v874_v57  ;;  %v3676_v20 = vld [vmem:[%s7667_s0 + $0x238] sm:$0xff]  ;;  %v3677_v40 = vld [vmem:[%s7667_s0 + $0x230] sm:$0xff] }
 0x1d1   :  { %v4992_v56 = vmul.f32 %v3653_v15, %v874_v57  ;;  %v4997_v42 = vmul.f32 %v3654_v45, %v874_v57  ;;  %v5002_v12 = vmul.f32 %v3655_v4, %v874_v57  ;;  %v3679_v15 = vld [vmem:[%s7667_s0 + $0x258] sm:$0xff] }
 0x1d3   :  { %7876 = vst [vmem:[#allocation12_spill] sm:$0xff] %v5002_v12  ;;  %v3711_v12 = vld [vmem:[%s7667_s0 + $0x180] sm:$0xff] }
 0x1d4   :  { %v879_v26 = vpop.permute.xlu1 %878 }
 0x1d5   :  { %v4987_v61 = vmul.f32 %v3652_v14, %v879_v26  ;;  %v5009_v51 = vmul.f32 %v3656_v39, %v879_v26  ;;  %v5014_v23 = vmul.f32 %v3657_v47, %v879_v26  ;;  %v5019_v48 = vmul.f32 %v3658_v13, %v879_v26  ;;  %v3680_v39 = vld [vmem:[%s7667_s0 + $0x270] sm:$0xff]  ;;  %v3681_v13 = vld [vmem:[%s7667_s0 + $0x240] sm:$0xff] }
 0x1d6   :  { %v5024_v21 = vmul.f32 %v3659_v31, %v879_v26  ;;  %v5039_v8 = vmul.f32 %v3662_v58, %v879_v26  ;;  %v5044_v17 = vmul.f32 %v3663_v32, %v879_v26  ;;  %v3675_v26 = vld [vmem:[%s7667_s0 + $0x308] sm:$0xff]  ;;  %v3683_v58 = vld [vmem:[%s7667_s0 + $0x260] sm:$0xff] }
 0x1d8   :  { %7877 = vst [vmem:[#allocation8_spill] sm:$0xff] %v5044_v17  ;;  %v3710_v17 = vld [vmem:[%s7667_s0 + $0x170] sm:$0xff] }
 0x1d9   :  { %v864_v25 = vpop.permute.xlu1 %863 }
 0x1da   :  { %v5029_v63 = vmul.f32 %v3660_v3, %v864_v25  ;;  %v5034_v28 = vmul.f32 %v3661_v19, %v864_v25  ;;  %v5049_v2 = vmul.f32 %v3664_v38, %v864_v25  ;;  %v5054_v54 = vmul.f32 %v3665_v30, %v864_v25  ;;  %v3682_v3 = vld [vmem:[%s7667_s0 + $0x250] sm:$0xff]  ;;  %v3684_v38 = vld [vmem:[%s7667_s0 + $0x268] sm:$0xff] }
 0x1db   :  { %v5059_v29 = vmul.f32 %v3666_v0, %v864_v25  ;;  %v5064_v44 = vmul.f32 %v3667_v41, %v864_v25  ;;  %v5084_v37 = vmul.f32 %v3671_v1, %v864_v25  ;;  %v3685_v0 = vld [vmem:[%s7667_s0 + $0x280] sm:$0xff]  ;;  %v3688_v1 = vld [vmem:[%s7667_s0 + $0x1c8] sm:$0xff] }
 0x1dd   :  { %7878 = vst [vmem:[#allocation5_spill] sm:$0xff] %v5084_v37  ;;  %v3709_v37 = vld [vmem:[%s7667_s0 + $0x160] sm:$0xff] }
 0x1de   :  { %v869_v59 = vpop.permute.xlu1 %868 }
 0x1df   :  { %v5069_v52 = vmul.f32 %v3668_v5, %v869_v59  ;;  %v5074_v49 = vmul.f32 %v3669_v36, %v869_v59  ;;  %v5079_v6 = vmul.f32 %v3670_v62, %v869_v59  ;;  %v5089_v18 = vmul.f32 %v3672_v9, %v869_v59  ;;  %v3686_v5 = vld [vmem:[%s7667_s0 + $0x290] sm:$0xff]  ;;  %v3687_v36 = vld [vmem:[%s7667_s0 + $0x278] sm:$0xff] }
 0x1e0   :  { %v5094_v53 = vmul.f32 %v3673_v60, %v869_v59  ;;  %v5099_v46 = vmul.f32 %v3674_v10, %v869_v59  ;;  %v5104_v25 = vmul.f32 %v3675_v26, %v869_v59  ;;  %v3678_v59 = vld [vmem:[%s7667_s0 + $0x248] sm:$0xff]  ;;  %v3689_v60 = vld [vmem:[%s7667_s0 + $0x1c0] sm:$0xff] }
 0x1e1   :  { %v3690_v26 = vld [vmem:[%s7667_s0 + $0x288] sm:$0xff] }
 0x1e2   :  { %7879 = vst [vmem:[#allocation6_spill] sm:$0xff] %v5104_v25  ;;  %v3708_v25 = vld [vmem:[%s7667_s0 + $0x190] sm:$0xff] }
 0x1e5   :  { %v4956_v16 = vpop.permute.xlu1 %853 }
 0x1e6   :  { %v5112_v35 = vmul.f32 %v3676_v20, %v4956_v16  ;;  %v5118_v7 = vmul.f32 %v3677_v40, %v4956_v16  ;;  %v5124_v14 = vmul.f32 %v3678_v59, %v4956_v16  ;;  %v5130_v45 = vmul.f32 %v3679_v15, %v4956_v16  ;;  %v3691_v40 = vld [vmem:[%s7667_s0 + $0x298] sm:$0xff] }
 0x1e7   :  { %v5144_v31 = vmul.f32 %v3681_v13, %v4956_v16  ;;  %v5150_v19 = vmul.f32 %v3682_v3, %v4956_v16  ;;  %v5156_v32 = vmul.f32 %v3683_v58, %v4956_v16  ;;  %v3692_v15 = vld [vmem:[%s7667_s0 + $0x1d8] sm:$0xff]  ;;  %v3693_v13 = vld [vmem:[%s7667_s0 + $0x1e8] sm:$0xff]  ;;  %v3694_v58 = vld [vmem:[%s7667_s0 + $0x1d0] sm:$0xff] }
 0x1e9   :  { %7880 = vst [vmem:[#allocation7_spill] sm:$0xff] %v5150_v19  ;;  %7881 = vst [vmem:[#allocation9_spill] sm:$0xff] %v5156_v32 }
 0x1ea   :  { %v4958_v11 = vpop.permute.xlu0 %858 }
 0x1eb   :  { %v5138_v47 = vmul.f32 %v3680_v39, %v4958_v11  ;;  %v5162_v30 = vmul.f32 %v3684_v38, %v4958_v11  ;;  %v5168_v41 = vmul.f32 %v3685_v0, %v4958_v11  ;;  %v5174_v16 = vmul.f32 %v3686_v5, %v4958_v11  ;;  %v3695_v38 = vld [vmem:[%s7667_s0 + $0x1e0] sm:$0xff] }
 0x1ec   :  { %v5180_v62 = vmul.f32 %v3687_v36, %v4958_v11  ;;  %v5198_v20 = vmul.f32 %v3690_v26, %v4958_v11  ;;  %v5204_v59 = vmul.f32 %v3691_v40, %v4958_v11  ;;  %v3696_v5 = vld [vmem:[%s7667_s0 + $0x200] sm:$0xff]  ;;  %v3698_v26 = vld [vmem:[%s7667_s0 + $0x210] sm:$0xff] }
 0x1ee   :  { %7882 = vst [vmem:[#allocation13_spill] sm:$0xff] %v5198_v20  ;;  %7883 = vst [vmem:[#allocation15_spill] sm:$0xff] %v5204_v59 }
 0x1f0   :  { %v4960_v43 = vpop.permute.xlu1 %843 }
 0x1f1   :  { %v5186_v9 = vmul.f32 %v3688_v1, %v4960_v43  ;;  %v5192_v10 = vmul.f32 %v3689_v60, %v4960_v43  ;;  %v5210_v39 = vmul.f32 %v3692_v15, %v4960_v43  ;;  %v5216_v3 = vmul.f32 %v3693_v13, %v4960_v43  ;;  %v3697_v1 = vld [vmem:[%s7667_s0 + $0x1f8] sm:$0xff]  ;;  %v3699_v15 = vld [vmem:[%s7667_s0 + $0x1f0] sm:$0xff] }
 0x1f2   :  { %v5222_v11 = vmul.f32 %v3694_v58, %v4960_v43  ;;  %v5228_v0 = vmul.f32 %v3695_v38, %v4960_v43  ;;  %v5252_v13 = vmul.f32 %v3699_v15, %v4960_v43  ;;  %v3700_v38 = vld [vmem:[%s7667_s0 + $0x220] sm:$0xff]  ;;  %v3702_v43 = vld [vmem:[%s7667_s0 + $0x218] sm:$0xff] }
 0x1f3   :  { %7884 = vst [vmem:[#allocation18_spill] sm:$0xff] %v5210_v39  ;;  %7885 = vst [vmem:[#allocation10_spill] sm:$0xff] %v5216_v3 }
 0x1f4   :  { %7886 = vst [vmem:[#allocation11_spill] sm:$0xff] %v5222_v11  ;;  %7887 = vst [vmem:[#allocation14_spill] sm:$0xff] %v5228_v0  ;;  %v3740_v11 = vld [vmem:[%s7667_s0 + $0xa8] sm:$0xff] }
 0x1f5   :  { %v4982_v22 = vpop.permute.xlu0 %848  ;;  %7889 = vst [vmem:[#allocation21_spill] sm:$0xff] %v5252_v13 }
 0x1f6   :  { %v5234_v36 = vmul.f32 %v3696_v5, %v4982_v22  ;;  %v5240_v60 = vmul.f32 %v3697_v1, %v4982_v22  ;;  %v5246_v40 = vmul.f32 %v3698_v26, %v4982_v22  ;;  %v5260_v5 = vmul.f32 %v3700_v38, %v4982_v22  ;;  %v3701_v1 = vld [vmem:[%s7667_s0 + $0x208] sm:$0xff] }
 0x1f7   :  { %v5266_v26 = vmul.f32 %v3701_v1, %v4982_v22  ;;  %v5272_v15 = vmul.f32 %v3702_v43, %v4982_v22  ;;  %v5278_v38 = vmul.f32 %v3703_v33, %v4982_v22  ;;  %v3704_v1 = vld [vmem:[%s7667_s0 + $0x158] sm:$0xff]  ;;  %v3705_v43 = vld [vmem:[%s7667_s0 + $0x150] sm:$0xff]  ;;  %v3706_v33 = vld [vmem:[%s7667_s0 + $0x168] sm:$0xff] }
 0x1f8   :  { %7888 = vst [vmem:[#allocation16_spill] sm:$0xff] %v5246_v40  ;;  %7890 = vst [vmem:[#allocation27_spill] sm:$0xff] %v5260_v5  ;;  %v3737_v5 = vld [vmem:[%s7667_s0 + $0x80] sm:$0xff] }
 0x1f9   :  { %7891 = vst [vmem:[#allocation22_spill] sm:$0xff] %v5266_v26  ;;  %7892 = vst [vmem:[#allocation17_spill] sm:$0xff] %v5272_v15  ;;  %v3721_v15 = vld [vmem:[%s7667_s0 + $0x108] sm:$0xff] }
 0x1fa   :  { %v5004_v24 = vpop.permute.xlu1 %833  ;;  %7893 = vst [vmem:[#allocation19_spill] sm:$0xff] %v5278_v38  ;;  %v3707_v38 = vld [vmem:[%s7667_s0 + $0x178] sm:$0xff] }
 0x1fb   :  { %v5286_v59 = vmul.f32 %v3704_v1, %v5004_v24  ;;  %v5292_v32 = vmul.f32 %v3705_v43, %v5004_v24  ;;  %v5298_v22 = vmul.f32 %v3706_v33, %v5004_v24  ;;  %v5304_v1 = vmul.f32 %v3707_v38, %v5004_v24 }
 0x1fc   :  { %v5316_v33 = vmul.f32 %v3709_v37, %v5004_v24  ;;  %v5322_v38 = vmul.f32 %v3710_v17, %v5004_v24 }
 0x1fd   :  { %7894 = vst [vmem:[#allocation20_spill] sm:$0xff] %v5298_v22  ;;  %7895 = vst [vmem:[#allocation23_spill] sm:$0xff] %v5304_v1  ;;  %v3712_v1 = vld [vmem:[%s7667_s0 + $0x188] sm:$0xff]  ;;  %v3720_v22 = vld [vmem:[%s7667_s0 + $0xf8] sm:$0xff] }
 0x1fe   :  { %7896 = vst [vmem:[#allocation28_spill] sm:$0xff] %v5316_v33  ;;  %7897 = vst [vmem:[#allocation33_spill] sm:$0xff] %v5322_v38  ;;  %v3713_v33 = vld [vmem:[%s7667_s0 + $0x1a0] sm:$0xff]  ;;  %v3714_v38 = vld [vmem:[%s7667_s0 + $0x1b0] sm:$0xff] }
 0x200   :  { %v5106_v57 = vpop.permute.xlu0 %838 }
 0x201   :  { %v5310_v43 = vmul.f32 %v3708_v25, %v5106_v57  ;;  %v5328_v25 = vmul.f32 %v3711_v12, %v5004_v24  ;;  %v5334_v37 = vmul.f32 %v3712_v1, %v5106_v57  ;;  %v5340_v17 = vmul.f32 %v3713_v33, %v5106_v57  ;;  %v3715_v24 = vld [vmem:[%s7667_s0 + $0x198] sm:$0xff] }
 0x202   :  { %v5346_v12 = vmul.f32 %v3714_v38, %v5106_v57  ;;  %v5352_v1 = vmul.f32 %v3715_v24, %v5106_v57 }
 0x203   :  { %7898 = vst [vmem:[#allocation29_spill] sm:$0xff] %v5328_v25  ;;  %7899 = vst [vmem:[#allocation24_spill] sm:$0xff] %v5340_v17  ;;  %v3716_v25 = vld [vmem:[%s7667_s0 + $0xe8] sm:$0xff]  ;;  %v3717_v17 = vld [vmem:[%s7667_s0 + $0xe0] sm:$0xff] }
 0x204   :  { %7900 = vst [vmem:[#allocation25_spill] sm:$0xff] %v5346_v12  ;;  %7901 = vst [vmem:[#allocation26_spill] sm:$0xff] %v5352_v1  ;;  %v3718_v12 = vld [vmem:[%s7667_s0 + $0x1a8] sm:$0xff]  ;;  %v3719_v1 = vld [vmem:[%s7667_s0 + $0x1b8] sm:$0xff] }
 0x205   :  { %v5132_v4 = vpop.permute.xlu1 %823  ;;  %v5370_v24 = vmul.f32 %v3718_v12, %v5106_v57 }
 0x206   :  { %v5358_v33 = vmul.f32 %v3716_v25, %v5132_v4  ;;  %v5364_v38 = vmul.f32 %v3717_v17, %v5132_v4  ;;  %v5376_v25 = vmul.f32 %v3719_v1, %v5106_v57  ;;  %v5382_v17 = vmul.f32 %v3720_v22, %v5132_v4  ;;  %v3723_v1 = vld [vmem:[%s7667_s0 + $0x100] sm:$0xff] }
 0x207   :  { %7902 = vst [vmem:[#allocation30_spill] sm:$0xff] %v5370_v24  ;;  %v5388_v12 = vmul.f32 %v3721_v15, %v5132_v4  ;;  %v3722_v24 = vld [vmem:[%s7667_s0 + $0xf0] sm:$0xff]  ;;  %v5400_v22 = vmul.f32 %v3723_v1, %v5132_v4  ;;  %v3724_v15 = vld [vmem:[%s7667_s0 + $0x120] sm:$0xff] }
 0x208   :  { %7903 = vst [vmem:[#allocation34_spill] sm:$0xff] %v5376_v25  ;;  %7904 = vst [vmem:[#allocation36_spill] sm:$0xff] %v5382_v17  ;;  %v5394_v57 = vmul.f32 %v3722_v24, %v5132_v4  ;;  %v3725_v24 = vld [vmem:[%s7667_s0 + $0x118] sm:$0xff]  ;;  %v3726_v1 = vld [vmem:[%s7667_s0 + $0x130] sm:$0xff] }
 0x209   :  { %7905 = vst [vmem:[#allocation39_spill] sm:$0xff] %v5388_v12  ;;  %7907 = vst [vmem:[#allocation32_spill] sm:$0xff] %v5400_v22  ;;  %v3727_v17 = vld [vmem:[%s7667_s0 + $0x110] sm:$0xff] }
 0x20a   :  { %v5254_v58 = vpop.permute.xlu0 %828  ;;  %7906 = vst [vmem:[#allocation31_spill] sm:$0xff] %v5394_v57 }
 0x20b   :  { %v5406_v12 = vmul.f32 %v3724_v15, %v5254_v58  ;;  %v5412_v57 = vmul.f32 %v3725_v24, %v5254_v58  ;;  %v5418_v22 = vmul.f32 %v3726_v1, %v5254_v58  ;;  %v5424_v15 = vmul.f32 %v3727_v17, %v5132_v4  ;;  %v3728_v24 = vld [vmem:[%s7667_s0 + $0x140] sm:$0xff]  ;;  %v3729_v1 = vld [vmem:[%s7667_s0 + $0x128] sm:$0xff]  ;;  %v3730_v4 = vld [vmem:[%s7667_s0 + $0x138] sm:$0xff] }
 0x20c   :  { %v5430_v26 = vmul.f32 %v3728_v24, %v5254_v58  ;;  %v5442_v17 = vmul.f32 %v3730_v4, %v5254_v58 }
 0x20d   :  { %7908 = vst [vmem:[#allocation35_spill] sm:$0xff] %v5418_v22  ;;  %7909 = vst [vmem:[#allocation37_spill] sm:$0xff] %v5424_v15  ;;  %v5436_v22 = vmul.f32 %v3729_v1, %v5254_v58  ;;  %v3731_v15 = vld [vmem:[%s7667_s0 + $0x148] sm:$0xff] }
 0x20e   :  { %7910 = vst [vmem:[#allocation42_spill] sm:$0xff] %v5430_v26  ;;  %7912 = vst [vmem:[#allocation48_spill] sm:$0xff] %v5442_v17  ;;  %v5448_v24 = vmul.f32 %v3731_v15, %v5254_v58  ;;  %v3732_v26 = vld [vmem:[%s7667_s0 + $0x78] sm:$0xff]  ;;  %v3734_v17 = vld [vmem:[%s7667_s0 + $0x88] sm:$0xff] }
 0x20f   :  { %v5280_v13 = vpop.permute.xlu1 %813  ;;  %7911 = vst [vmem:[#allocation43_spill] sm:$0xff] %v5436_v22  ;;  %v3733_v22 = vld [vmem:[%s7667_s0 + $0x70] sm:$0xff]  ;;  %v3735_v15 = vld [vmem:[%s7667_s0 + $0x98] sm:$0xff] }
 0x210   :  { %7913 = vst [vmem:[#allocation38_spill] sm:$0xff] %v5448_v24  ;;  %v5454_v1 = vmul.f32 %v3732_v26, %v5280_v13  ;;  %v5460_v4 = vmul.f32 %v3733_v22, %v5280_v13  ;;  %v5466_v58 = vmul.f32 %v3734_v17, %v5280_v13  ;;  %v5472_v26 = vmul.f32 %v3735_v15, %v5280_v13  ;;  %v3736_v24 = vld [vmem:[%s7667_s0 + $0xb0] sm:$0xff] }
 0x211   :  { %v5483_v17 = vmul.f32 %v3737_v5, %v5280_v13 }
 0x212   :  { %7914 = vst [vmem:[#allocation40_spill] sm:$0xff] %v5454_v1  ;;  %7915 = vst [vmem:[#allocation41_spill] sm:$0xff] %v5460_v4 }
 0x213   :  { %7916 = vst [vmem:[#allocation44_spill] sm:$0xff] %v5466_v58  ;;  %7917 = vst [vmem:[#allocation49_spill] sm:$0xff] %v5472_v26  ;;  %v3738_v58 = vld [vmem:[%s7667_s0 + $0x90] sm:$0xff]  ;;  %v3739_v26 = vld [vmem:[%s7667_s0 + $0xa0] sm:$0xff] }
 0x214   :  { %7918 = vst [vmem:[#allocation54_spill] sm:$0xff] %v5483_v17  ;;  %v5489_v15 = vmul.f32 %v3738_v58, %v5280_v13  ;;  %v3741_v17 = vld [vmem:[%s7667_s0 + $0xc0] sm:$0xff]  ;;  %v3742_v58 = vld [vmem:[%s7667_s0 + $0xd0] sm:$0xff] }
 0x215   :  { %v819_v25 = vpop.permute.xlu0 %818 }
 0x216   :  { %v5477_v22 = vmul.f32 %v3736_v24, %v819_v25  ;;  %7919 = vst [vmem:[#allocation50_spill] sm:$0xff] %v5489_v15  ;;  %v5495_v24 = vmul.f32 %v3739_v26, %v5280_v13  ;;  %v5500_v5 = vmul.f32 %v3740_v11, %v819_v25  ;;  %v5505_v3 = vmul.f32 %v3741_v17, %v819_v25  ;;  %v3743_v13 = vld [vmem:[%s7667_s0 + $0xb8] sm:$0xff] }
 0x217   :  { %v5510_v15 = vmul.f32 %v3742_v58, %v819_v25  ;;  %v5515_v26 = vmul.f32 %v3743_v13, %v819_v25 }
 0x218   :  { %7920 = vst [vmem:[#allocation45_spill] sm:$0xff] %v5495_v24  ;;  %7921 = vst [vmem:[#allocation46_spill] sm:$0xff] %v5505_v3  ;;  %v3744_v24 = vld [vmem:[%s7667_s0 + $0x8] sm:$0xff]  ;;  %v3745_v3 = vld [vmem:[%s7667_s0] sm:$0xff] }
 0x219   :  { %7922 = vst [vmem:[#allocation47_spill] sm:$0xff] %v5510_v15  ;;  %7923 = vst [vmem:[#allocation51_spill] sm:$0xff] %v5515_v26  ;;  %v3746_v15 = vld [vmem:[%s7667_s0 + $0xc8] sm:$0xff]  ;;  %v3747_v26 = vld [vmem:[%s7667_s0 + $0xd8] sm:$0xff] }
 0x21a   :  { %v804_v0 = vpop.permute.xlu1 %803  ;;  %v5532_v13 = vmul.f32 %v3746_v15, %v819_v25  ;;  %v5537_v40 = vmul.f32 %v3747_v26, %v819_v25  ;;  %v3748_v15 = vld [vmem:[%s7667_s0 + $0x18] sm:$0xff]  ;;  %v3749_v26 = vld [vmem:[%s7667_s0 + $0x28] sm:$0xff] }
 0x21b   :  { %v5522_v17 = vmul.f32 %v3744_v24, %v804_v0  ;;  %v5527_v58 = vmul.f32 %v3745_v3, %v804_v0 }
 0x21c   :  { %7927 = vst [vmem:[#allocation53_spill] sm:$0xff] %v5532_v13  ;;  %7928 = vst [vmem:[#allocation56_spill] sm:$0xff] %v5537_v40  ;;  %v5550_v13 = vmul.f32 %v3748_v15, %v804_v0  ;;  %v3751_v15 = vld [vmem:[%s7667_s0 + $0x20] sm:$0xff] }
 0x21d   :  { %7925 = vst [vmem:[#allocation57_spill] sm:$0xff] %v5522_v17  ;;  %7926 = vst [vmem:[#allocation52_spill] sm:$0xff] %v5527_v58  ;;  %v5567_v40 = vmul.f32 %v3751_v15, %v804_v0  ;;  %v3754_v15 = vld [vmem:[%s7667_s0 + $0x30] sm:$0xff] }
 0x21e   :  { %v5517_v11 = vpop.permute.xlu1 %1065  ;;  %7930 = vst [vmem:[#allocation63_spill] sm:$0xff] %v5550_v13 }
 0x21f   :  { %7924 = vst [vmem:[#allocation55_spill] sm:$0xff] %v5517_v11  ;;  %v5539_v24 = vpop.permute.xlu0 %808  ;;  %v1172_v17 = vadd.f32 %v5517_v11, %v4965_v50  ;;  %v1171_v3 = vadd.f32 %v5517_v11, %v4970_v27  ;;  %v1174_v58 = vadd.f32 %v5517_v11, %v4975_v55  ;;  %v1176_v25 = vadd.f32 %v5517_v11, %v4980_v34  ;;  %v3750_v27 = vld [vmem:[%s7667_s0 + $0x10] sm:$0xff]  ;;  %v3752_v34 = vld [vmem:[%s7667_s0 + $0x40] sm:$0xff] }
 0x220   :  { %7929 = vst [vmem:[#allocation58_spill] sm:$0xff] %v5539_v24  ;;  %v5557_v50 = vmul.f32 %v3749_v26, %v804_v0  ;;  %v5562_v55 = vmul.f32 %v3750_v27, %v804_v0  ;;  %7933 = vst [vmem:[#allocation59_spill] sm:$0xff] %v5567_v40  ;;  %v5573_v13 = vmul.f32 %v3752_v34, %v5539_v24  ;;  %v3753_v26 = vld [vmem:[%s7667_s0 + $0x38] sm:$0xff] }
 0x221   :  { %v5579_v27 = vmul.f32 %v3753_v26, %v5539_v24  ;;  %v5586_v40 = vmul.f32 %v3754_v15, %v804_v0  ;;  %v1284_v34 = vmax.f32 %v1172_v17, 0.0  ;;  %v1283_v39 = vmax.f32 %v1171_v3, 0.0 }
 0x222   :  { %7931 = vst [vmem:[#allocation69_spill] sm:$0xff] %v5557_v50  ;;  %7932 = vst [vmem:[#allocation60_spill] sm:$0xff] %v5562_v55  ;;  %v1173_v55 = vadd.f32 %v5517_v11, %v4992_v56  ;;  %v5588_v50 = vpop.permute.xlu1 %1070  ;;  %v1286_v4 = vmax.f32 %v1174_v58, 0.0  ;;  %v1175_v1 = vadd.f32 %v5517_v11, %v4997_v42  ;;  %v1288_v58 = vmax.f32 %v1176_v25, 0.0  ;;  %v3755_v25 = vld [vmem:[%s7667_s0 + $0x50] sm:$0xff] }
 0x223   :  { %7934 = vst [vmem:[#allocation61_spill] sm:$0xff] %v5586_v40  ;;  %7935 = vst [vmem:[#allocation62_spill] sm:$0xff] %v5588_v50  ;;  %v5592_v20 = vpop.permute.xlu0 %1050  ;;  %v1179_v26 = vadd.f32 %v5588_v50, %v4987_v61  ;;  %v1178_v56 = vadd.f32 %v5588_v50, %v5009_v51  ;;  %v1181_v0 = vadd.f32 %v5588_v50, %v5014_v23 }
 0x224   :  { %v1183_v15 = vadd.f32 %v5588_v50, %v5019_v48  ;;  %v5604_v17 = vadd.f32 %v5592_v20, %v5138_v47  ;;  %v1180_v42 = vadd.f32 %v5588_v50, %v5024_v21  ;;  %v1182_v61 = vadd.f32 %v5588_v50, %v5039_v8 }
 0x225   :  { %v1291_v3 = vmax.f32 %v1179_v26, 0.0  ;;  %v1290_v40 = vmax.f32 %v1178_v56, 0.0  ;;  %v5612_v51 = vadd.f32 %v5592_v20, %v5162_v30  ;;  %v1293_v23 = vmax.f32 %v1181_v0, 0.0  ;;  %v3756_v0 = vld [vmem:[%s7667_s0 + $0x60] sm:$0xff] }
 0x226   :  { %v5614_v11 = vpop.permute.xlu1 %1055  ;;  %v1295_v48 = vmax.f32 %v1183_v15, 0.0  ;;  %v1285_v19 = vmax.f32 %v1173_v55, 0.0  ;;  %v1287_v47 = vmax.f32 %v1175_v1, 0.0  ;;  %v5620_v21 = vmul.f32 %v3755_v25, %v5539_v24 }
 0x227   :  { %v5622_v8 = vpop.permute.xlu0 %1040  ;;  %v1411_v26 = vpack.c.bf16 %v1291_v3, %v1284_v34  ;;  %v1410_v56 = vpack.c.bf16 %v1290_v40, %v1283_v39  ;;  %v1158_v30 = vadd.f32 %v5614_v11, %v5029_v63  ;;  %v5630_v1 = vmul.f32 %v3756_v0, %v5539_v24 }
 0x228   :  { %v1157_v55 = vadd.f32 %v5614_v11, %v5034_v28  ;;  %v5636_v15 = vadd.f32 %v5622_v8, %v5234_v36  ;;  %v1292_v25 = vmax.f32 %v1180_v42, 0.0  ;;  %v1294_v34 = vmax.f32 %v1182_v61, 0.0 }
 0x229   :  { %1609 = vmatprep.subr.bf16.mxu0 %v1411_v26  ;;  %3562 = vmatprep.subr.bf16.mxu1 %v1411_v26  ;;  %v1263_v63 = vmax.f32 %v5604_v17, 0.0  ;;  %v1262_v39 = vmax.f32 %v5612_v51, 0.0  ;;  %v5642_v40 = vadd.f32 %v5622_v8, %v5240_v60  ;;  %v5644_v3 = vpack.c.bf16 %v1293_v23, %v1286_v4 }
 0x22a   :  { %v5646_v0 = vpop.permute.xlu1 %1060  ;;  %1610 = vmatpush1.bf16.msra.mxu0 %v1410_v56  ;;  %3570 = vmatpush1.bf16.msra.mxu1 %v1410_v56  ;;  %v1270_v28 = vmax.f32 %v1158_v30, 0.0  ;;  %v5648_v36 = vpack.c.bf16 %v1295_v48, %v1288_v58  ;;  %v1160_v42 = vadd.f32 %v5614_v11, %v5049_v2  ;;  %v1162_v17 = vadd.f32 %v5614_v11, %v5054_v54 }
 0x22b   :  { %v5654_v61 = vpop.permute.xlu0 %1030  ;;  %v1165_v60 = vadd.f32 %v5646_v0, %v5069_v52  ;;  %v1164_v4 = vadd.f32 %v5646_v0, %v5074_v49  ;;  %v1167_v51 = vadd.f32 %v5646_v0, %v5079_v6  ;;  %v1169_v58 = vadd.f32 %v5646_v0, %v5089_v18 }
 0x22c   :  { %v1269_v23 = vmax.f32 %v1157_v55, 0.0  ;;  %v1249_v2 = vmax.f32 %v5636_v15, 0.0  ;;  %v5665_v48 = vpack.c.bf16 %v1292_v25, %v1285_v19  ;;  %v5667_v54 = vpack.c.bf16 %v1294_v34, %v1287_v47 }
 0x22d   :  { %v1277_v26 = vmax.f32 %v1165_v60, 0.0  ;;  %v1276_v56 = vmax.f32 %v1164_v4, 0.0  ;;  %v1279_v30 = vmax.f32 %v1167_v51, 0.0  ;;  %v1281_v52 = vmax.f32 %v1169_v58, 0.0 }
 0x22e   :  { %v5669_v50 = vpop.permute.xlu1 %1045  ;;  %v1272_v49 = vmax.f32 %v1160_v42, 0.0  ;;  %v1274_v24 = vmax.f32 %v1162_v17, 0.0  ;;  %v1159_v6 = vadd.f32 %v5614_v11, %v5059_v29  ;;  %v1166_v18 = vadd.f32 %v5646_v0, %v5094_v53 }
 0x22f   :  { %v5675_v55 = vpop.permute.xlu0 %1020  ;;  %v1404_v19 = vpack.c.bf16 %v1277_v26, %v1270_v28  ;;  %v1403_v15 = vpack.c.bf16 %v1276_v56, %v1269_v23  ;;  %v1144_v47 = vadd.f32 %v5669_v50, %v5112_v35  ;;  %v1143_v25 = vadd.f32 %v5669_v50, %v5118_v7 }
 0x230   :  { %v1123_v34 = vadd.f32 %v5654_v61, %v5310_v43  ;;  %v1122_v42 = vadd.f32 %v5654_v61, %v5334_v37  ;;  %v5685_v29 = vpack.c.bf16 %v1279_v30, %v1272_v49  ;;  %v5687_v17 = vpack.c.bf16 %v1281_v52, %v1274_v24 }
 0x231   :  { %1611 = vmatprep.subr.bf16.mxu0 %v1404_v19  ;;  %3563 = vmatprep.subr.bf16.mxu1 %v1404_v19  ;;  %v1256_v53 = vmax.f32 %v1144_v47, 0.0  ;;  %v1255_v28 = vmax.f32 %v1143_v25, 0.0  ;;  %v5691_v35 = vadd.f32 %v5675_v55, %v5406_v12  ;;  %v1278_v60 = vmax.f32 %v1166_v18, 0.0 }
 0x232   :  { %v5693_v7 = vpop.permute.xlu1 %1035  ;;  %1612 = vmatpush1.bf16.msra.mxu0 %v1403_v15  ;;  %3571 = vmatpush1.bf16.msra.mxu1 %v1403_v15  ;;  %v5697_v43 = vadd.f32 %v5675_v55, %v5412_v57  ;;  %v1271_v37 = vmax.f32 %v1159_v6, 0.0  ;;  %v1161_v24 = vadd.f32 %v5614_v11, %v5064_v44  ;;  %v1168_v4 = vadd.f32 %v5646_v0, %v5099_v46 }
 0x233   :  { %v5703_v51 = vpop.permute.xlu0 %1010  ;;  %v1397_v12 = vpack.c.bf16 %v1263_v63, %v1256_v53  ;;  %v1396_v58 = vpack.c.bf16 %v1262_v39, %v1255_v28  ;;  %v1130_v23 = vadd.f32 %v5693_v7, %v5186_v9  ;;  %v1129_v26 = vadd.f32 %v5693_v7, %v5192_v10 }
 0x234   :  { %v1248_v57 = vmax.f32 %v5642_v40, 0.0  ;;  %v1235_v56 = vmax.f32 %v1123_v34, 0.0  ;;  %v1234_v30 = vmax.f32 %v1122_v42, 0.0  ;;  %v5710_v52 = vpack.c.bf16 %v1278_v60, %v1271_v37 }
 0x235   :  { %1613 = vmatprep.subr.bf16.mxu0 %v1397_v12  ;;  %3564 = vmatprep.subr.bf16.mxu1 %v1397_v12  ;;  %v1242_v44 = vmax.f32 %v1130_v23, 0.0  ;;  %v1241_v46 = vmax.f32 %v1129_v26, 0.0  ;;  %v5714_v63 = vadd.f32 %v5703_v51, %v5477_v22  ;;  %v1280_v39 = vmax.f32 %v1168_v4, 0.0  ;;  %v7936_v23 = vld [vmem:[#allocation7_spill] sm:$0xff] }
 0x236   :  { %v5716_v49 = vpop.permute.xlu1 %1025  ;;  %1614 = vmatpush1.bf16.msra.mxu0 %v1396_v58  ;;  %3572 = vmatpush1.bf16.msra.mxu1 %v1396_v58  ;;  %v1221_v9 = vmax.f32 %v5691_v35, 0.0  ;;  %v1220_v10 = vmax.f32 %v5697_v43, 0.0  ;;  %v5722_v40 = vadd.f32 %v5703_v51, %v5500_v5  ;;  %v1273_v6 = vmax.f32 %v1161_v24, 0.0 }
 0x237   :  { %v5724_v18 = vpop.permute.xlu0 %1000  ;;  %v1390_v19 = vpack.c.bf16 %v1249_v2, %v1242_v44  ;;  %v1389_v15 = vpack.c.bf16 %v1248_v57, %v1241_v46  ;;  %v1116_v22 = vadd.f32 %v5716_v49, %v5286_v59  ;;  %v1115_v47 = vadd.f32 %v5716_v49, %v5292_v32 }
 0x238   :  { %v5732_v25 = vadd.f32 %v5724_v18, %v5573_v13  ;;  %v5734_v34 = vpack.c.bf16 %v1280_v39, %v1273_v6  ;;  %v1146_v5 = vadd.f32 %v5669_v50, %v5124_v14  ;;  %v1153_v42 = vadd.f32 %v5592_v20, %v5168_v41 }
 0x239   :  { %1615 = vmatprep.subr.bf16.mxu0 %v1390_v19  ;;  %3565 = vmatprep.subr.bf16.mxu1 %v1390_v19  ;;  %v1228_v2 = vmax.f32 %v1116_v22, 0.0  ;;  %v1227_v53 = vmax.f32 %v1115_v47, 0.0  ;;  %v1207_v59 = vmax.f32 %v5714_v63, 0.0  ;;  %v1148_v32 = vadd.f32 %v5669_v50, %v5130_v45  ;;  %v7938_v63 = vld [vmem:[#allocation40_spill] sm:$0xff]  ;;  %v7940_v22 = vld [vmem:[#allocation18_spill] sm:$0xff] }
 0x23a   :  { %v5743_v28 = vpop.permute.xlu1 %1015  ;;  %1616 = vmatpush1.bf16.msra.mxu0 %v1389_v15  ;;  %3573 = vmatpush1.bf16.msra.mxu1 %v1389_v15  ;;  %v1206_v13 = vmax.f32 %v5722_v40, 0.0  ;;  %v5748_v14 = vadd.f32 %v5724_v18, %v5579_v27  ;;  %v1155_v41 = vadd.f32 %v5592_v20, %v5174_v16  ;;  %v1145_v35 = vadd.f32 %v5669_v50, %v5144_v31  ;;  %v7939_v40 = vld [vmem:[#allocation41_spill] sm:$0xff] }
 0x23b   :  { %v1383_v60 = vpack.c.bf16 %v1235_v56, %v1228_v2  ;;  %v1382_v43 = vpack.c.bf16 %v1234_v30, %v1227_v53  ;;  %v1102_v45 = vadd.f32 %v5743_v28, %v5358_v33  ;;  %v1101_v37 = vadd.f32 %v5743_v28, %v5364_v38  ;;  %v7937_v30 = vld [vmem:[#allocation13_spill] sm:$0xff] }
 0x23c   :  { %v1193_v24 = vmax.f32 %v5732_v25, 0.0  ;;  %v1258_v4 = vmax.f32 %v1146_v5, 0.0  ;;  %v1265_v12 = vmax.f32 %v1153_v42, 0.0  ;;  %v1152_v27 = vadd.f32 %v5592_v20, %v5180_v62  ;;  %v7941_v25 = vld [vmem:[#allocation16_spill] sm:$0xff] }
 0x23d   :  { %1617 = vmatprep.subr.bf16.mxu0 %v1383_v60  ;;  %3566 = vmatprep.subr.bf16.mxu1 %v1383_v60  ;;  %v1214_v16 = vmax.f32 %v1102_v45, 0.0  ;;  %v1213_v58 = vmax.f32 %v1101_v37, 0.0  ;;  %v1260_v31 = vmax.f32 %v1148_v32, 0.0  ;;  %v1147_v26 = vadd.f32 %v5669_v50, %v7936_v23  ;;  %v7943_v60 = vld [vmem:[#allocation11_spill] sm:$0xff] }
 0x23e   :  { %v5763_v57 = vpop.permute.xlu1 %1005  ;;  %1618 = vmatpush1.bf16.msra.mxu0 %v1382_v43  ;;  %3574 = vmatpush1.bf16.msra.mxu1 %v1382_v43  ;;  %v1192_v33 = vmax.f32 %v5748_v14, 0.0  ;;  %v1267_v38 = vmax.f32 %v1155_v41, 0.0  ;;  %v1257_v56 = vmax.f32 %v1145_v35, 0.0  ;;  %v1154_v44 = vadd.f32 %v5592_v20, %v7937_v30  ;;  %v7942_v41 = vld [vmem:[#allocation10_spill] sm:$0xff]  ;;  %v7946_v23 = vld [vmem:[#allocation27_spill] sm:$0xff] }
 0x23f   :  { %v1376_v62 = vpack.c.bf16 %v1221_v9, %v1214_v16  ;;  %v1375_v46 = vpack.c.bf16 %v1220_v10, %v1213_v58  ;;  %v1088_v39 = vadd.f32 %v5763_v57, %v7938_v63  ;;  %v1087_v6 = vadd.f32 %v5763_v57, %v7939_v40 }
 0x240   :  { %v5772_v19 = vpack.c.bf16 %v1265_v12, %v1258_v4  ;;  %v1264_v15 = vmax.f32 %v1152_v27, 0.0  ;;  %v1132_v47 = vadd.f32 %v5693_v7, %v7940_v22  ;;  %v1139_v5 = vadd.f32 %v5622_v8, %v7941_v25  ;;  %v7944_v4 = vld [vmem:[#allocation57_spill] sm:$0xff]  ;;  %v7945_v27 = vld [vmem:[#allocation52_spill] sm:$0xff] }
 0x241   :  { %1619 = vmatprep.subr.bf16.mxu0 %v1376_v62  ;;  %3567 = vmatprep.subr.bf16.mxu1 %v1376_v62  ;;  %v1200_v42 = vmax.f32 %v1088_v39, 0.0  ;;  %v1199_v9 = vmax.f32 %v1087_v6, 0.0  ;;  %v5778_v10 = vpack.c.bf16 %v1267_v38, %v1260_v31  ;;  %v1259_v2 = vmax.f32 %v1147_v26, 0.0  ;;  %v7947_v38 = vld [vmem:[#allocation22_spill] sm:$0xff]  ;;  %v7949_v39 = vld [vmem:[#allocation17_spill] sm:$0xff]  ;;  %v7950_v6 = vld [vmem:[#allocation20_spill] sm:$0xff] }
 0x242   :  { %v5780_v53 = vpop.permute.xlu1 %995  ;;  %1620 = vmatpush1.bf16.msra.mxu0 %v1375_v46  ;;  %3575 = vmatpush1.bf16.msra.mxu1 %v1375_v46  ;;  %v5782_v32 = vpack.c.bf16 %v1264_v15, %v1257_v56  ;;  %v1266_v14 = vmax.f32 %v1154_v44, 0.0  ;;  %v1134_v35 = vadd.f32 %v5693_v7, %v7942_v41  ;;  %v1131_v43 = vadd.f32 %v5693_v7, %v7943_v60  ;;  %v7952_v41 = vld [vmem:[#allocation23_spill] sm:$0xff] }
 0x243   :  { %v1369_v45 = vpack.c.bf16 %v1207_v59, %v1200_v42  ;;  %v1368_v37 = vpack.c.bf16 %v1206_v13, %v1199_v9  ;;  %v1074_v12 = vadd.f32 %v5780_v53, %v7944_v4  ;;  %v1073_v16 = vadd.f32 %v5780_v53, %v7945_v27  ;;  %v7948_v13 = vld [vmem:[#allocation14_spill] sm:$0xff] }
 0x244   :  { %v1244_v58 = vmax.f32 %v1132_v47, 0.0  ;;  %v1251_v31 = vmax.f32 %v1139_v5, 0.0  ;;  %v1141_v26 = vadd.f32 %v5622_v8, %v7946_v23  ;;  %v1138_v56 = vadd.f32 %v5622_v8, %v7947_v38  ;;  %v7951_v5 = vld [vmem:[#allocation24_spill] sm:$0xff] }
 0x245   :  { %1621 = vmatprep.subr.bf16.mxu0 %v1369_v45  ;;  %3568 = vmatprep.subr.bf16.mxu1 %v1369_v45  ;;  %v1186_v30 = vmax.f32 %v1074_v12, 0.0  ;;  %v1185_v44 = vmax.f32 %v1073_v16, 0.0  ;;  %v5796_v59 = vpack.c.bf16 %v1266_v14, %v1259_v2  ;;  %v1133_v62 = vadd.f32 %v5693_v7, %v7948_v13  ;;  %v7955_v12 = vld [vmem:[#allocation26_spill] sm:$0xff] }
 0x246   :  { %1622 = vmatpush1.bf16.msra.mxu0 %v1368_v37  ;;  %3576 = vmatpush1.bf16.msra.mxu1 %v1368_v37  ;;  %v1246_v46 = vmax.f32 %v1134_v35, 0.0  ;;  %v1243_v63 = vmax.f32 %v1131_v43, 0.0  ;;  %v1140_v40 = vadd.f32 %v5622_v8, %v7949_v39  ;;  %v1118_v15 = vadd.f32 %v5716_v49, %v7950_v6  ;;  %v5808_v35 = vld [vmem:[#allocation2] sm:$0xff]   ;;  %v7959_v6 = vld [vmem:[#allocation35_spill] sm:$0xff] }
 0x247   :  { %v1362_v22 = vpack.c.bf16 %v1193_v24, %v1186_v30  ;;  %v1361_v47 = vpack.c.bf16 %v1192_v33, %v1185_v44  ;;  %v1245_v25 = vmax.f32 %v1133_v62, 0.0  ;;  %v1125_v42 = vadd.f32 %v5654_v61, %v7951_v5  ;;  %v5810_v43 = vld [vmem:[#allocation2 + $0xc0] sm:$0xff]   ;;  %v7954_v33 = vld [vmem:[#allocation28_spill] sm:$0xff] }
 0x248   :  { %v1253_v9 = vmax.f32 %v1141_v26, 0.0  ;;  %v1250_v2 = vmax.f32 %v1138_v56, 0.0  ;;  %v1230_v14 = vmax.f32 %v1118_v15, 0.0  ;;  %v1120_v60 = vadd.f32 %v5716_v49, %v7952_v41  ;;  %v7953_v37 = vld [vmem:[#allocation25_spill] sm:$0xff]  ;;  %v7957_v56 = vld [vmem:[#allocation30_spill] sm:$0xff] }
 0x249   :  { %1623 = vmatprep.subr.bf16.mxu0 %v1362_v22  ;;  %3569 = vmatprep.subr.bf16.mxu1 %v1362_v22  ;;  %v1252_v45 = vmax.f32 %v1140_v40, 0.0  ;;  %v1127_v24 = vadd.f32 %v5654_v61, %v7953_v37  ;;  %v1117_v4 = vadd.f32 %v5716_v49, %v7954_v33  ;;  %v1124_v27 = vadd.f32 %v5654_v61, %v7955_v12  ;;  %v7956_v26 = vld [vmem:[#allocation33_spill] sm:$0xff] }
 0x24a   :  { %1624 = vmatpush1.bf16.msra.mxu0 %v1361_v47  ;;  %3577 = vmatpush1.bf16.msra.mxu1 %v1361_v47  ;;  %v5818_v16 = vpack.c.bf16 %v1251_v31, %v1244_v58  ;;  %v1237_v23 = vmax.f32 %v1125_v42, 0.0  ;;  %v1119_v38 = vadd.f32 %v5716_v49, %v7956_v26  ;;  %v1126_v30 = vadd.f32 %v5654_v61, %v7957_v56  ;;  %v7958_v31 = vld [vmem:[#allocation36_spill] sm:$0xff]  ;;  %v7961_v42 = vld [vmem:[#allocation42_spill] sm:$0xff] }
 0x24b   :  { %1962 = vmatprep.subr.bf16.mxu1 %v5644_v3  ;;  %2315 = vmatprep.subr.bf16.mxu0 %v5648_v36  ;;  %v5826_v44 = vpack.c.bf16 %v1253_v9, %v1246_v46  ;;  %v5828_v13 = vpack.c.bf16 %v1250_v2, %v1243_v63  ;;  %v5830_v62 = vpack.c.bf16 %v1252_v45, %v1245_v25  ;;  %v1232_v58 = vmax.f32 %v1120_v60, 0.0  ;;  %v7960_v63 = vld [vmem:[#allocation39_spill] sm:$0xff] }
 0x24c   :  { %v5832_v39 = vpack.c.bf16 %v1237_v23, %v1230_v14  ;;  %v1104_v40 = vadd.f32 %v5743_v28, %v7958_v31  ;;  %v1111_v15 = vadd.f32 %v5675_v55, %v7959_v6  ;;  %v1239_v3 = vmax.f32 %v1127_v24, 0.0  ;;  %v7962_v14 = vld [vmem:[#allocation31_spill] sm:$0xff]  ;;  %v5862_v23 = vld [vmem:[#allocation2 + $0xc8] sm:$0xff]  }
 0x24d   :  { %1642 = vmatmul.mubr.bf16.vlgmr.msra.gmra.mxu0 %v5808_v35  ;;  %1882 = vmatmul.mubr.bf16.vlgmr.msra.gmra.mxu1 %v5810_v43  ;;  %v1229_v36 = vmax.f32 %v1117_v4, 0.0  ;;  %v1236_v46 = vmax.f32 %v1124_v27, 0.0  ;;  %v1106_v22 = vadd.f32 %v5743_v28, %v7960_v63  ;;  %v1231_v47 = vmax.f32 %v1119_v38, 0.0  ;;  %v7963_v60 = vld [vmem:[#allocation43_spill] sm:$0xff]  ;;  %v7966_v4 = vld [vmem:[#allocation48_spill] sm:$0xff]  ;;  %v5860_v27 = vld [vmem:[#allocation2 + $0x8] sm:$0xff]  }
 0x24e   :  { %1963 = vmatpush1.bf16.msra.mxu1 %v5665_v48  ;;  %2316 = vmatpush1.bf16.msra.mxu0 %v5667_v54  ;;  %v1238_v25 = vmax.f32 %v1126_v30, 0.0  ;;  %v1216_v5 = vmax.f32 %v1104_v40, 0.0  ;;  %v1113_v9 = vadd.f32 %v5675_v55, %v7961_v42  ;;  %v1103_v41 = vadd.f32 %v5743_v28, %v7962_v14  ;;  %v7964_v48 = vld [vmem:[#allocation32_spill] sm:$0xff]  ;;  %v7968_v30 = vld [vmem:[#allocation46_spill] sm:$0xff]  ;;  %v7970_v63 = vld [vmem:[#allocation47_spill] sm:$0xff] }
 0x24f   :  { %1964 = vmatprep.subr.bf16.mxu1 %v5685_v29  ;;  %2317 = vmatprep.subr.bf16.mxu0 %v5687_v17  ;;  %v1218_v2 = vmax.f32 %v1106_v22, 0.0  ;;  %v1110_v45 = vadd.f32 %v5675_v55, %v7963_v60  ;;  %v1105_v54 = vadd.f32 %v5743_v28, %v7964_v48  ;;  %v7965_v37 = vmov 0   ;;  %v7967_v17 = vld [vmem:[#allocation44_spill] sm:$0xff]  ;;  %v7971_v22 = vld [vmem:[#allocation54_spill] sm:$0xff] }
 0x250   :  { %1651 = vmatprep.mubr.bf16.mxu0 %v7965_v37  ;;  %1891 = vmatprep.mubr.bf16.mxu1 %v7965_v37  ;;  %v1387_v24 = vpack.c.bf16 %v1239_v3, %v1232_v58  ;;  %v1223_v33 = vmax.f32 %v1111_v15, 0.0  ;;  %v1112_v29 = vadd.f32 %v5675_v55, %v7966_v4  ;;  %v1090_v12 = vadd.f32 %v5763_v57, %v7967_v17  ;;  %v7969_v15 = vld [vmem:[#allocation49_spill] sm:$0xff] }
 0x251   :  { %v5864_v26 = vpack.c.bf16 %v1236_v46, %v1229_v36  ;;  %v1225_v38 = vmax.f32 %v1113_v9, 0.0  ;;  %v1215_v56 = vmax.f32 %v1103_v41, 0.0  ;;  %v1097_v31 = vadd.f32 %v5703_v51, %v7968_v30  ;;  %v7973_v9 = vld [vmem:[#allocation50_spill] sm:$0xff]  ;;  %v7974_v41 = vld [vmem:[#allocation53_spill] sm:$0xff] }
 0x252   :  { %1965 = vmatpush1.bf16.msra.mxu1 %v5710_v52  ;;  %2318 = vmatpush1.bf16.msra.mxu0 %v5734_v34  ;;  %v5870_v58 = vpack.c.bf16 %v1238_v25, %v1231_v47  ;;  %v5872_v40 = vpack.c.bf16 %v1223_v33, %v1216_v5  ;;  %v1222_v6 = vmax.f32 %v1110_v45, 0.0  ;;  %v1092_v3 = vadd.f32 %v5763_v57, %v7969_v15  ;;  %v7972_v5 = vld [vmem:[#allocation51_spill] sm:$0xff] }
 0x253   :  { %1966 = vmatprep.subr.bf16.mxu1 %v5772_v19  ;;  %2319 = vmatprep.subr.bf16.mxu0 %v5778_v10  ;;  %v5878_v36 = vpack.c.bf16 %v1225_v38, %v1218_v2  ;;  %v1217_v46 = vmax.f32 %v1105_v54, 0.0  ;;  %v1099_v52 = vadd.f32 %v5703_v51, %v7970_v63  ;;  %v1089_v34 = vadd.f32 %v5763_v57, %v7971_v22  ;;  %v7975_v54 = vld [vmem:[#allocation63_spill] sm:$0xff]  ;;  %v7978_v22 = vld [vmem:[#allocation60_spill] sm:$0xff] }
 0x254   :  { %v1224_v47 = vmax.f32 %v1112_v29, 0.0  ;;  %v1202_v25 = vmax.f32 %v1090_v12, 0.0  ;;  %v1096_v42 = vadd.f32 %v5703_v51, %v7972_v5  ;;  %v1091_v14 = vadd.f32 %v5763_v57, %v7973_v9  ;;  %v7976_v12 = vld [vmem:[#allocation69_spill] sm:$0xff]  ;;  %v3758_v9 = vld [vmem:[%s7667_s0 + $0x58] sm:$0xff] }
 0x255   :  { %1652 = vmatmul.mubr.bf16.gmra.mxu0 %v5860_v27  ;;  %1892 = vmatmul.mubr.bf16.gmra.mxu1 %v5862_v23  ;;  %v5890_v19 = vpack.c.bf16 %v1222_v6, %v1215_v56  ;;  %v1209_v10 = vmax.f32 %v1097_v31, 0.0  ;;  %v1204_v2 = vmax.f32 %v1092_v3, 0.0  ;;  %v1098_v60 = vadd.f32 %v5703_v51, %v7974_v41  ;;  %v5908_v31 = vld [vmem:[#allocation2 + $0x10] sm:$0xff]   ;;  %v3757_v3 = vld [vmem:[%s7667_s0 + $0x48] sm:$0xff] }
 0x256   :  { %1967 = vmatpush1.bf16.msra.mxu1 %v5782_v32  ;;  %2320 = vmatpush1.bf16.msra.mxu0 %v5796_v59  ;;  %v1201_v45 = vmax.f32 %v1089_v34, 0.0  ;;  %v1203_v48 = vmax.f32 %v1091_v14, 0.0  ;;  %v1076_v33 = vadd.f32 %v5780_v53, %v7975_v54  ;;  %v1083_v4 = vadd.f32 %v5724_v18, %v5620_v21  ;;  %v7985_v54 = vld [vmem:[#allocation6_spill] sm:$0xff] }
 0x257   :  { %1968 = vmatprep.subr.bf16.mxu1 %v5818_v16  ;;  %2321 = vmatprep.subr.bf16.mxu0 %v5826_v44  ;;  %v1379_v29 = vpack.c.bf16 %v1224_v47, %v1217_v46  ;;  %v1211_v17 = vmax.f32 %v1099_v52, 0.0  ;;  %v1078_v38 = vadd.f32 %v5780_v53, %v7976_v12  ;;  %v1085_v32 = vadd.f32 %v5724_v18, %v5630_v1  ;;  %v5910_v16 = vld [vmem:[#allocation2 + $0xd0] sm:$0xff]   ;;  %v7977_v1 = vld [vmem:[#allocation58_spill] sm:$0xff] }
 0x258   :  { %1661 = vmatprep.mubr.bf16.mxu0 %v7965_v37  ;;  %1901 = vmatprep.mubr.bf16.mxu1 %v7965_v37  ;;  %v1371_v59 = vpack.c.bf16 %v1209_v10, %v1202_v25  ;;  %v1208_v56 = vmax.f32 %v1096_v42, 0.0  ;;  %v1210_v30 = vmax.f32 %v1098_v60, 0.0  ;;  %v1188_v21 = vmax.f32 %v1076_v33, 0.0  ;;  %v7980_v42 = vld [vmem:[#allocation55_spill] sm:$0xff]  ;;  %v7984_v60 = vld [vmem:[#allocation5_spill] sm:$0xff] }
 0x259   :  { %v1373_v44 = vpack.c.bf16 %v1211_v17, %v1204_v2  ;;  %v1195_v6 = vmax.f32 %v1083_v4, 0.0  ;;  %v1190_v15 = vmax.f32 %v1078_v38, 0.0  ;;  %v890_v46 = vmul.f32 %v3757_v3, %v7977_v1  ;;  %v7981_v10 = vld [vmem:[#allocation59_spill] sm:$0xff]  ;;  %v7986_v4 = vld [vmem:[#allocation9_spill] sm:$0xff]  ;;  %v5969_v3 = vld [vmem:[#allocation2 + $0x18] sm:$0xff]  }
 0x25a   :  { %1969 = vmatpush1.bf16.msra.mxu1 %v5828_v13  ;;  %2322 = vmatpush1.bf16.msra.mxu0 %v5830_v62  ;;  %v5918_v63 = vpack.c.bf16 %v1208_v56, %v1201_v45  ;;  %v5920_v52 = vpack.c.bf16 %v1210_v30, %v1203_v48  ;;  %v5924_v34 = vadd.f32 %v5780_v53, %v7978_v22  ;;  %v1197_v25 = vmax.f32 %v1085_v32, 0.0  ;;  %v7979_v13 = vld [vmem:[#allocation12_spill] sm:$0xff]  ;;  %v7987_v30 = vld [vmem:[#allocation15_spill] sm:$0xff] }
 0x25b   :  { %1970 = vmatprep.subr.bf16.mxu1 %v5832_v39  ;;  %2323 = vmatprep.subr.bf16.mxu0 %v1387_v24  ;;  %v5927_v47 = vpack.c.bf16 %v1195_v6, %v1188_v21  ;;  %v5930_v5 = vadd.f32 %v5724_v18, %v890_v46  ;;  %v1177_v62 = vadd.f32 %v7980_v42, %v7979_v13  ;;  %v7982_v39 = vld [vmem:[#allocation8_spill] sm:$0xff]  ;;  %v7983_v24 = vld [vmem:[#allocation62_spill] sm:$0xff]  ;;  %v7988_v6 = vld [vmem:[#allocation21_spill] sm:$0xff] }
 0x25c   :  { %v892_v14 = vmul.f32 %v3758_v9, %v7977_v1  ;;  %v5940_v2 = vadd.f32 %v5780_v53, %v7981_v10  ;;  %v1184_v41 = vadd.f32 %v7983_v24, %v7982_v39  ;;  %v1163_v45 = vadd.f32 %v5614_v11, %v7984_v60  ;;  %v7991_v42 = vld [vmem:[#allocation34_spill] sm:$0xff]  ;;  %v7992_v9 = vld [vmem:[#allocation37_spill] sm:$0xff] }
 0x25d   :  { %1662 = vmatmul.mubr.bf16.gmra.mxu0 %v5908_v31  ;;  %1902 = vmatmul.mubr.bf16.gmra.mxu1 %v5910_v16  ;;  %v1366_v48 = vpack.c.bf16 %v1197_v25, %v1190_v15  ;;  %v1170_v33 = vadd.f32 %v5646_v0, %v7985_v54  ;;  %v1149_v17 = vadd.f32 %v5669_v50, %v7986_v4  ;;  %v1187_v12 = vmax.f32 %v5924_v34, 0.0  ;;  %v7990_v34 = vld [vmem:[#allocation29_spill] sm:$0xff] }
 0x25e   :  { %1971 = vmatpush1.bf16.msra.mxu1 %v5864_v26  ;;  %2324 = vmatpush1.bf16.msra.mxu0 %v5870_v58  ;;  %v1289_v38 = vmax.f32 %v1177_v62, 0.0  ;;  %v1296_v32 = vmax.f32 %v1184_v41, 0.0  ;;  %v1275_v11 = vmax.f32 %v1163_v45, 0.0  ;;  %v1156_v0 = vadd.f32 %v5592_v20, %v7987_v30  ;;  %v5971_v20 = vld [vmem:[#allocation2 + $0xd8] sm:$0xff]   ;;  %v7994_v24 = vld [vmem:[#allocation45_spill] sm:$0xff] }
 0x25f   :  { %1972 = vmatprep.subr.bf16.mxu1 %v5872_v40  ;;  %2325 = vmatprep.subr.bf16.mxu0 %v5878_v36  ;;  %v1282_v56 = vmax.f32 %v1170_v33, 0.0  ;;  %v1261_v21 = vmax.f32 %v1149_v17, 0.0  ;;  %v1135_v50 = vadd.f32 %v5693_v7, %v7988_v6  ;;  %v1084_v26 = vadd.f32 %v5724_v18, %v892_v14  ;;  %v7989_v40 = vld [vmem:[#allocation19_spill] sm:$0xff]  ;;  %v7993_v14 = vld [vmem:[#allocation38_spill] sm:$0xff]  ;;  %v6036_v30 = vld [vmem:[#allocation2 + $0x38] sm:$0xff]  }
 0x260   :  { %1671 = vmatprep.mubr.bf16.mxu0 %v7965_v37  ;;  %1911 = vmatprep.mubr.bf16.mxu1 %v7965_v37  ;;  %v1189_v58 = vmax.f32 %v5940_v2, 0.0  ;;  %v5965_v15 = vpack.c.bf16 %v1296_v32, %v1289_v38  ;;  %v1142_v36 = vadd.f32 %v5622_v8, %v7989_v40  ;;  %v1268_v7 = vmax.f32 %v1156_v0, 0.0  ;;  %v6038_v0 = vld [vmem:[#allocation2 + $0xf8] sm:$0xff]   ;;  %v6052_v6 = vld [vmem:[#allocation2 + $0x48] sm:$0xff]   ;;  %v6091_v40 = vld [vmem:[#allocation2 + $0x70] sm:$0xff]  }
 0x261   :  { %v5973_v46 = vpack.c.bf16 %v1282_v56, %v1275_v11  ;;  %v1247_v22 = vmax.f32 %v1135_v50, 0.0  ;;  %v1121_v25 = vadd.f32 %v5716_v49, %v7990_v34  ;;  %v1128_v62 = vadd.f32 %v5654_v61, %v7991_v42  ;;  %v6030_v56 = vld [vmem:[#allocation2 + $0xf0] sm:$0xff]   ;;  %v6121_v34 = vld [vmem:[#allocation2 + $0x98] sm:$0xff]  }
 0x262   :  { %1973 = vmatpush1.bf16.msra.mxu1 %v5890_v19  ;;  %2326 = vmatpush1.bf16.msra.mxu0 %v1379_v29  ;;  %v1254_v13 = vmax.f32 %v1142_v36, 0.0  ;;  %v1107_v8 = vadd.f32 %v5743_v28, %v7992_v9  ;;  %v1114_v10 = vadd.f32 %v5675_v55, %v7993_v14  ;;  %v5984_v2 = vpack.c.bf16 %v1268_v7, %v1261_v21  ;;  %v7995_v19 = vld [vmem:[#allocation56_spill] sm:$0xff]  ;;  %v6044_v21 = vld [vmem:[#allocation2 + $0x40] sm:$0xff]   ;;  %v6062_v50 = vld [vmem:[#allocation2 + $0x50] sm:$0xff]  }
 0x263   :  { %1974 = vmatprep.subr.bf16.mxu1 %v1371_v59  ;;  %2327 = vmatprep.subr.bf16.mxu0 %v1373_v44  ;;  %v1233_v39 = vmax.f32 %v1121_v25, 0.0  ;;  %v1093_v49 = vadd.f32 %v5763_v57, %v7994_v24  ;;  %v1100_v29 = vadd.f32 %v5703_v51, %v7995_v19  ;;  %v1240_v61 = vmax.f32 %v1128_v62, 0.0  ;;  %v3759_v59 = vld [vmem:[%s7667_s0 + $0x68] sm:$0xff]  ;;  %v7996_v44 = vld [vmem:[#allocation61_spill] sm:$0xff]  ;;  %v6097_v36 = vld [vmem:[#allocation2 + $0x78] sm:$0xff]  }
 0x264   :  { %v5990_v41 = vpack.c.bf16 %v1254_v13, %v1247_v22  ;;  %v1219_v60 = vmax.f32 %v1107_v8, 0.0  ;;  %v1226_v45 = vmax.f32 %v1114_v10, 0.0  ;;  %v894_v57 = vmul.f32 %v3759_v59, %v7977_v1  ;;  %v6109_v7 = vld [vmem:[#allocation2 + $0x88] sm:$0xff]   ;;  %v6115_v22 = vld [vmem:[#allocation2 + $0x90] sm:$0xff]   ;;  %v6127_v25 = vld [vmem:[#allocation2 + $0xa0] sm:$0xff]  }
 0x265   :  { %1672 = vmatmul.mubr.bf16.gmra.mxu0 %v5969_v3  ;;  %1912 = vmatmul.mubr.bf16.gmra.mxu1 %v5971_v20  ;;  %v1205_v55 = vmax.f32 %v1093_v49, 0.0  ;;  %v1212_v28 = vmax.f32 %v1100_v29, 0.0  ;;  %v1079_v51 = vadd.f32 %v5780_v53, %v7996_v44  ;;  %v1194_v54 = vmax.f32 %v5930_v5, 0.0  ;;  %v6133_v13 = vld [vmem:[#allocation2 + $0xa8] sm:$0xff]   ;;  %v6139_v42 = vld [vmem:[#allocation2 + $0xb0] sm:$0xff]   ;;  %v6145_v62 = vld [vmem:[#allocation2 + $0xb8] sm:$0xff]  }
 0x266   :  { %1975 = vmatpush1.bf16.msra.mxu1 %v5918_v63  ;;  %2328 = vmatpush1.bf16.msra.mxu0 %v5920_v52  ;;  %v1196_v33 = vmax.f32 %v1084_v26, 0.0  ;;  %v1388_v4 = vpack.c.bf16 %v1240_v61, %v1233_v39  ;;  %v6003_v17 = vpack.c.bf16 %v1226_v45, %v1219_v60  ;;  %v1086_v1 = vadd.f32 %v5724_v18, %v894_v57  ;;  %v6011_v63 = vld [vmem:[#allocation2 + $0x20] sm:$0xff]   ;;  %v6020_v18 = vld [vmem:[#allocation2 + $0x28] sm:$0xff]   ;;  %v6070_v26 = vld [vmem:[#allocation2 + $0x58] sm:$0xff]  }
 0x267   :  { %1976 = vmatprep.subr.bf16.mxu1 %v5927_v47  ;;  %2329 = vmatprep.subr.bf16.mxu0 %v1366_v48  ;;  %v6006_v38 = vpack.c.bf16 %v1212_v28, %v1205_v55  ;;  %v1191_v32 = vmax.f32 %v1079_v51, 0.0  ;;  %v1363_v11 = vpack.c.bf16 %v1194_v54, %v1187_v12  ;;  %v6013_v52 = vld [vmem:[#allocation2 + $0xe0] sm:$0xff]   ;;  %v6022_v48 = vld [vmem:[#allocation2 + $0xe8] sm:$0xff]   ;;  %v6028_v12 = vld [vmem:[#allocation2 + $0x30] sm:$0xff]  }
 0x268   :  { %v1365_v53 = vpack.c.bf16 %v1196_v33, %v1189_v58  ;;  %1681 = vmatprep.mubr.bf16.mxu0 %v7965_v37  ;;  %1921 = vmatprep.mubr.bf16.mxu1 %v7965_v37  ;;  %v1198_v5 = vmax.f32 %v1086_v1, 0.0  ;;  %v6079_v58 = vld [vmem:[#allocation2 + $0x60] sm:$0xff]  }
 0x26a   :  { %1977 = vmatpush1.bf16.msra.mxu1 %v1363_v11  ;;  %2330 = vmatpush1.bf16.msra.mxu0 %v1365_v53  ;;  %v1367_v47 = vpack.c.bf16 %v1198_v5, %v1191_v32 }
 0x26b   :  { %3482 = vmatprep.subr.bf16.mxu1 %v5965_v15 }
 0x26d   :  { %1682 = vmatmul.mubr.bf16.gmra.mxu0 %v6011_v63  ;;  %1922 = vmatmul.mubr.bf16.gmra.mxu1 %v6013_v52 }
 0x26e   :  { %1691 = vmatprep.mubr.bf16.mxu0 %v7965_v37  ;;  %1931 = vmatprep.mubr.bf16.mxu1 %v7965_v37 }
 0x275   :  { %1692 = vmatmul.mubr.bf16.gmra.mxu0 %v6020_v18  ;;  %1932 = vmatmul.mubr.bf16.gmra.mxu1 %v6022_v48 }
 0x276   :  { %1701 = vmatprep.mubr.bf16.mxu0 %v7965_v37  ;;  %1941 = vmatprep.mubr.bf16.mxu1 %v7965_v37 }
 0x27d   :  { %1702 = vmatmul.mubr.bf16.gmra.mxu0 %v6028_v12  ;;  %1942 = vmatmul.mubr.bf16.gmra.mxu1 %v6030_v56 }
 0x27e   :  { %1711 = vmatprep.mubr.bf16.mxu0 %v7965_v37  ;;  %1951 = vmatprep.mubr.bf16.mxu1 %v7965_v37 }
 0x285   :  { %1712 = vmatmul.mubr.bf16.gmra.mxu0 %v6036_v30  ;;  %1952 = vmatmul.mubr.bf16.gmra.mxu1 %v6038_v0 }
 0x286   :  { %1721 = vmatprep.mubr.bf16.mxu0 %v7965_v37  ;;  %1994 = vmatprep.mubr.bf16.mxu1 %v7965_v37 }
 0x28d   :  { %1722 = vmatmul.mubr.bf16.gmra.mxu0 %v6044_v21  ;;  %1995 = vmatmul.mubr.bf16.vlgmr.msra.gmra.mxu1 %v5808_v35 }
 0x28e   :  { %3483 = vmatpush3.bf16.msra.mxu1 %v5965_v15  ;;  %1731 = vmatprep.mubr.bf16.mxu0 %v7965_v37  ;;  %v6085_v15 = vld [vmem:[#allocation2 + $0x68] sm:$0xff]  }
 0x28f   :  { %3484 = vmatprep.subr.bf16.mxu1 %v5973_v46  ;;  %2004 = vmatprep.mubr.bf16.mxu1 %v7965_v37 }
 0x292   :  { %3485 = vmatpush3.bf16.msra.mxu1 %v5973_v46  ;;  %v6103_v46 = vld [vmem:[#allocation2 + $0x80] sm:$0xff]  }
 0x293   :  { %3486 = vmatprep.subr.bf16.mxu1 %v5984_v2 }
 0x295   :  { %1732 = vmatmul.mubr.bf16.gmra.mxu0 %v6052_v6  ;;  %2005 = vmatmul.mubr.bf16.gmra.mxu1 %v5860_v27 }
 0x296   :  { %3487 = vmatpush3.bf16.msra.mxu1 %v5984_v2  ;;  %1741 = vmatprep.mubr.bf16.mxu0 %v7965_v37 }
 0x297   :  { %3488 = vmatprep.subr.bf16.mxu1 %v5990_v41  ;;  %2014 = vmatprep.mubr.bf16.mxu1 %v7965_v37 }
 0x29a   :  { %3489 = vmatpush3.bf16.msra.mxu1 %v5990_v41 }
 0x29b   :  { %3490 = vmatprep.subr.bf16.mxu1 %v1388_v4 }
 0x29d   :  { %1742 = vmatmul.mubr.bf16.gmra.mxu0 %v6062_v50  ;;  %2015 = vmatmul.mubr.bf16.gmra.mxu1 %v5908_v31 }
 0x29e   :  { %3491 = vmatpush3.bf16.msra.mxu1 %v1388_v4  ;;  %1751 = vmatprep.mubr.bf16.mxu0 %v7965_v37 }
 0x29f   :  { %3492 = vmatprep.subr.bf16.mxu1 %v6003_v17  ;;  %2024 = vmatprep.mubr.bf16.mxu1 %v7965_v37 }
 0x2a2   :  { %3493 = vmatpush3.bf16.msra.mxu1 %v6003_v17 }
 0x2a3   :  { %3494 = vmatprep.subr.bf16.mxu1 %v6006_v38 }
 0x2a5   :  { %1752 = vmatmul.mubr.bf16.gmra.mxu0 %v6070_v26  ;;  %2025 = vmatmul.mubr.bf16.gmra.mxu1 %v5969_v3 }
 0x2a6   :  { %3495 = vmatpush3.bf16.msra.mxu1 %v6006_v38  ;;  %1761 = vmatprep.mubr.bf16.mxu0 %v7965_v37 }
 0x2a7   :  { %3496 = vmatprep.subr.bf16.mxu1 %v1367_v47  ;;  %2034 = vmatprep.mubr.bf16.mxu1 %v7965_v37 }
 0x2aa   :  { %3497 = vmatpush3.bf16.msra.mxu1 %v1367_v47 }
 0x2ad   :  { %1762 = vmatmul.mubr.bf16.gmra.mxu0 %v6079_v58  ;;  %2035 = vmatmul.mubr.bf16.gmra.mxu1 %v6011_v63 }
 0x2ae   :  { %1771 = vmatprep.mubr.bf16.mxu0 %v7965_v37  ;;  %2044 = vmatprep.mubr.bf16.mxu1 %v7965_v37 }
 0x2b5   :  { %1772 = vmatmul.mubr.bf16.gmra.mxu0 %v6085_v15  ;;  %2045 = vmatmul.mubr.bf16.gmra.mxu1 %v6020_v18 }
 0x2b6   :  { %1781 = vmatprep.mubr.bf16.mxu0 %v7965_v37  ;;  %2054 = vmatprep.mubr.bf16.mxu1 %v7965_v37 }
 0x2bd   :  { %1782 = vmatmul.mubr.bf16.gmra.mxu0 %v6091_v40  ;;  %2055 = vmatmul.mubr.bf16.gmra.mxu1 %v6028_v12 }
 0x2be   :  { %1791 = vmatprep.mubr.bf16.mxu0 %v7965_v37  ;;  %2064 = vmatprep.mubr.bf16.mxu1 %v7965_v37 }
 0x2c5   :  { %1792 = vmatmul.mubr.bf16.gmra.mxu0 %v6097_v36  ;;  %2065 = vmatmul.mubr.bf16.gmra.mxu1 %v6036_v30 }
 0x2c6   :  { %1801 = vmatprep.mubr.bf16.mxu0 %v7965_v37  ;;  %2074 = vmatprep.mubr.bf16.mxu1 %v7965_v37 }
 0x2cd   :  { %1802 = vmatmul.mubr.bf16.gmra.mxu0 %v6103_v46  ;;  %2075 = vmatmul.mubr.bf16.gmra.mxu1 %v6044_v21 }
 0x2ce   :  { %1811 = vmatprep.mubr.bf16.mxu0 %v7965_v37  ;;  %2084 = vmatprep.mubr.bf16.mxu1 %v7965_v37 }
 0x2d5   :  { %1812 = vmatmul.mubr.bf16.gmra.mxu0 %v6109_v7  ;;  %2085 = vmatmul.mubr.bf16.gmra.mxu1 %v6052_v6 }
 0x2d6   :  { %1821 = vmatprep.mubr.bf16.mxu0 %v7965_v37  ;;  %2094 = vmatprep.mubr.bf16.mxu1 %v7965_v37 }
 0x2dd   :  { %1822 = vmatmul.mubr.bf16.gmra.mxu0 %v6115_v22  ;;  %2095 = vmatmul.mubr.bf16.gmra.mxu1 %v6062_v50 }
 0x2de   :  { %1831 = vmatprep.mubr.bf16.mxu0 %v7965_v37  ;;  %2104 = vmatprep.mubr.bf16.mxu1 %v7965_v37 }
 0x2e5   :  { %1832 = vmatmul.mubr.bf16.gmra.mxu0 %v6121_v34  ;;  %2105 = vmatmul.mubr.bf16.gmra.mxu1 %v6070_v26 }
 0x2e6   :  { %1841 = vmatprep.mubr.bf16.mxu0 %v7965_v37  ;;  %2114 = vmatprep.mubr.bf16.mxu1 %v7965_v37 }
 0x2ed   :  { %1842 = vmatmul.mubr.bf16.gmra.mxu0 %v6127_v25  ;;  %2115 = vmatmul.mubr.bf16.gmra.mxu1 %v6079_v58 }
 0x2ee   :  { %1851 = vmatprep.mubr.bf16.mxu0 %v7965_v37  ;;  %2124 = vmatprep.mubr.bf16.mxu1 %v7965_v37 }
 0x2f5   :  { %1852 = vmatmul.mubr.bf16.gmra.mxu0 %v6133_v13  ;;  %2125 = vmatmul.mubr.bf16.gmra.mxu1 %v6085_v15 }
 0x2f6   :  { %1861 = vmatprep.mubr.bf16.mxu0 %v7965_v37  ;;  %2134 = vmatprep.mubr.bf16.mxu1 %v7965_v37 }
 0x2fd   :  { %1862 = vmatmul.mubr.bf16.gmra.mxu0 %v6139_v42  ;;  %2135 = vmatmul.mubr.bf16.gmra.mxu1 %v6091_v40 }
 0x2fe   :  { %1871 = vmatprep.mubr.bf16.mxu0 %v7965_v37  ;;  %2144 = vmatprep.mubr.bf16.mxu1 %v7965_v37 }
 0x305   :  { %1872 = vmatmul.mubr.bf16.gmra.mxu0 %v6145_v62  ;;  %2145 = vmatmul.mubr.bf16.gmra.mxu1 %v6097_v36 }
 0x306   :  { %2154 = vmatprep.mubr.bf16.mxu1 %v7965_v37  ;;  %2347 = vmatprep.mubr.bf16.mxu0 %v7965_v37 }
 0x30d   :  { %v1643_v9 = vpop.f32.mrf.mxu0  ;;  %v1883_v8 = vpop.f32.mrf.mxu1  ;;  %2155 = vmatmul.mubr.bf16.gmra.mxu1 %v6103_v46  ;;  %2348 = vmatmul.mubr.bf16.vlgmr.msra.gmra.mxu0 %v5808_v35 }
 0x30e   :  { %2957 = vst [vmem:[%s7671_s4] sm:$0xff] %v1643_v9  ;;  %3293 = vst [vmem:[%s7671_s4 + $0xa80] sm:$0xff] %v1883_v8  ;;  %2164 = vmatprep.mubr.bf16.mxu1 %v7965_v37  ;;  %2357 = vmatprep.mubr.bf16.mxu0 %v7965_v37 }
 0x30f   :  { %v1645_v14 = vpop.f32.mrf.mxu0  ;;  %v1885_v10 = vpop.f32.mrf.mxu1 }
 0x310   :  { %2958 = vst [vmem:[%s7671_s4 + $0x8] sm:$0xff] %v1645_v14  ;;  %3294 = vst [vmem:[%s7671_s4 + $0xa88] sm:$0xff] %v1885_v10 }
 0x311   :  { %v1647_v35 = vpop.f32.mrf.mxu0  ;;  %v1887_v2 = vpop.f32.mrf.mxu1 }
 0x312   :  { %2964 = vst [vmem:[%s7671_s4 + $0x38] sm:$0xff] %v1647_v35  ;;  %3300 = vst [vmem:[%s7671_s4 + $0xab8] sm:$0xff] %v1887_v2 }
 0x313   :  { %v1649_v39 = vpop.f32.mrf.mxu0  ;;  %v1889_v24 = vpop.f32.mrf.mxu1 }
 0x314   :  { %2965 = vst [vmem:[%s7671_s4 + $0x40] sm:$0xff] %v1649_v39  ;;  %3301 = vst [vmem:[%s7671_s4 + $0xac0] sm:$0xff] %v1889_v24 }
 0x315   :  { %v1653_v49 = vpop.f32.mrf.mxu0  ;;  %v1893_v19 = vpop.f32.mrf.mxu1  ;;  %2165 = vmatmul.mubr.bf16.gmra.mxu1 %v6109_v7  ;;  %2358 = vmatmul.mubr.bf16.gmra.mxu0 %v5860_v27 }
 0x316   :  { %2971 = vst [vmem:[%s7671_s4 + $0x70] sm:$0xff] %v1653_v49  ;;  %3307 = vst [vmem:[%s7671_s4 + $0xaf0] sm:$0xff] %v1893_v19  ;;  %2174 = vmatprep.mubr.bf16.mxu1 %v7965_v37  ;;  %2367 = vmatprep.mubr.bf16.mxu0 %v7965_v37 }
 0x317   :  { %v1655_v29 = vpop.f32.mrf.mxu0  ;;  %v1895_v41 = vpop.f32.mrf.mxu1 }
 0x318   :  { %2972 = vst [vmem:[%s7671_s4 + $0x78] sm:$0xff] %v1655_v29  ;;  %3308 = vst [vmem:[%s7671_s4 + $0xaf8] sm:$0xff] %v1895_v41 }
 0x319   :  { %v1657_v27 = vpop.f32.mrf.mxu0  ;;  %v1897_v61 = vpop.f32.mrf.mxu1 }
 0x31a   :  { %2978 = vst [vmem:[%s7671_s4 + $0xa8] sm:$0xff] %v1657_v27  ;;  %3314 = vst [vmem:[%s7671_s4 + $0xb28] sm:$0xff] %v1897_v61 }
 0x31b   :  { %v1659_v60 = vpop.f32.mrf.mxu0  ;;  %v1899_v45 = vpop.f32.mrf.mxu1 }
 0x31c   :  { %2979 = vst [vmem:[%s7671_s4 + $0xb0] sm:$0xff] %v1659_v60  ;;  %3315 = vst [vmem:[%s7671_s4 + $0xb30] sm:$0xff] %v1899_v45 }
 0x31d   :  { %v1663_v55 = vpop.f32.mrf.mxu0  ;;  %v1903_v28 = vpop.f32.mrf.mxu1  ;;  %2175 = vmatmul.mubr.bf16.gmra.mxu1 %v6115_v22  ;;  %2368 = vmatmul.mubr.bf16.gmra.mxu0 %v5908_v31 }
 0x31e   :  { %2985 = vst [vmem:[%s7671_s4 + $0xe0] sm:$0xff] %v1663_v55  ;;  %3321 = vst [vmem:[%s7671_s4 + $0xb60] sm:$0xff] %v1903_v28  ;;  %2184 = vmatprep.mubr.bf16.mxu1 %v7965_v37  ;;  %2377 = vmatprep.mubr.bf16.mxu0 %v7965_v37 }
 0x31f   :  { %v1665_v59 = vpop.f32.mrf.mxu0  ;;  %v1905_v57 = vpop.f32.mrf.mxu1 }
 0x320   :  { %2986 = vst [vmem:[%s7671_s4 + $0xe8] sm:$0xff] %v1665_v59  ;;  %3322 = vst [vmem:[%s7671_s4 + $0xb68] sm:$0xff] %v1905_v57 }
 0x321   :  { %v1667_v31 = vpop.f32.mrf.mxu0  ;;  %v1907_v44 = vpop.f32.mrf.mxu1 }
 0x322   :  { %2992 = vst [vmem:[%s7671_s4 + $0x118] sm:$0xff] %v1667_v31  ;;  %3328 = vst [vmem:[%s7671_s4 + $0xb98] sm:$0xff] %v1907_v44 }
 0x323   :  { %v1669_v51 = vpop.f32.mrf.mxu0  ;;  %v1909_v54 = vpop.f32.mrf.mxu1 }
 0x324   :  { %2993 = vst [vmem:[%s7671_s4 + $0x120] sm:$0xff] %v1669_v51  ;;  %3329 = vst [vmem:[%s7671_s4 + $0xba0] sm:$0xff] %v1909_v54 }
 0x325   :  { %v1673_v33 = vpop.f32.mrf.mxu0  ;;  %v1913_v4 = vpop.f32.mrf.mxu1  ;;  %2185 = vmatmul.mubr.bf16.gmra.mxu1 %v6121_v34  ;;  %2378 = vmatmul.mubr.bf16.gmra.mxu0 %v5969_v3 }
 0x326   :  { %2999 = vst [vmem:[%s7671_s4 + $0x150] sm:$0xff] %v1673_v33  ;;  %3335 = vst [vmem:[%s7671_s4 + $0xbd0] sm:$0xff] %v1913_v4  ;;  %2194 = vmatprep.mubr.bf16.mxu1 %v7965_v37  ;;  %2387 = vmatprep.mubr.bf16.mxu0 %v7965_v37 }
 0x327   :  { %v1675_v17 = vpop.f32.mrf.mxu0  ;;  %v1915_v38 = vpop.f32.mrf.mxu1 }
 0x328   :  { %3000 = vst [vmem:[%s7671_s4 + $0x158] sm:$0xff] %v1675_v17  ;;  %3336 = vst [vmem:[%s7671_s4 + $0xbd8] sm:$0xff] %v1915_v38 }
 0x329   :  { %v1677_v1 = vpop.f32.mrf.mxu0  ;;  %v1917_v32 = vpop.f32.mrf.mxu1 }
 0x32a   :  { %3006 = vst [vmem:[%s7671_s4 + $0x188] sm:$0xff] %v1677_v1  ;;  %3342 = vst [vmem:[%s7671_s4 + $0xc08] sm:$0xff] %v1917_v32 }
 0x32b   :  { %v1679_v11 = vpop.f32.mrf.mxu0  ;;  %v1919_v53 = vpop.f32.mrf.mxu1 }
 0x32c   :  { %3007 = vst [vmem:[%s7671_s4 + $0x190] sm:$0xff] %v1679_v11  ;;  %3343 = vst [vmem:[%s7671_s4 + $0xc10] sm:$0xff] %v1919_v53 }
 0x32d   :  { %v1683_v5 = vpop.f32.mrf.mxu0  ;;  %v1923_v47 = vpop.f32.mrf.mxu1  ;;  %2195 = vmatmul.mubr.bf16.gmra.mxu1 %v6127_v25  ;;  %2388 = vmatmul.mubr.bf16.gmra.mxu0 %v6011_v63 }
 0x32e   :  { %3013 = vst [vmem:[%s7671_s4 + $0x1c0] sm:$0xff] %v1683_v5  ;;  %3349 = vst [vmem:[%s7671_s4 + $0xc40] sm:$0xff] %v1923_v47  ;;  %2204 = vmatprep.mubr.bf16.mxu1 %v7965_v37  ;;  %2397 = vmatprep.mubr.bf16.mxu0 %v7965_v37 }
 0x32f   :  { %v1685_v9 = vpop.f32.mrf.mxu0  ;;  %v1925_v8 = vpop.f32.mrf.mxu1 }
 0x330   :  { %3014 = vst [vmem:[%s7671_s4 + $0x1c8] sm:$0xff] %v1685_v9  ;;  %3350 = vst [vmem:[%s7671_s4 + $0xc48] sm:$0xff] %v1925_v8 }
 0x331   :  { %v1687_v14 = vpop.f32.mrf.mxu0  ;;  %v1927_v10 = vpop.f32.mrf.mxu1 }
 0x332   :  { %3020 = vst [vmem:[%s7671_s4 + $0x1f8] sm:$0xff] %v1687_v14  ;;  %3356 = vst [vmem:[%s7671_s4 + $0xc78] sm:$0xff] %v1927_v10 }
 0x333   :  { %v1689_v35 = vpop.f32.mrf.mxu0  ;;  %v1929_v2 = vpop.f32.mrf.mxu1 }
 0x334   :  { %3021 = vst [vmem:[%s7671_s4 + $0x200] sm:$0xff] %v1689_v35  ;;  %3357 = vst [vmem:[%s7671_s4 + $0xc80] sm:$0xff] %v1929_v2 }
 0x335   :  { %v1693_v39 = vpop.f32.mrf.mxu0  ;;  %v1933_v24 = vpop.f32.mrf.mxu1  ;;  %2205 = vmatmul.mubr.bf16.gmra.mxu1 %v6133_v13  ;;  %2398 = vmatmul.mubr.bf16.gmra.mxu0 %v6020_v18 }
 0x336   :  { %3027 = vst [vmem:[%s7671_s4 + $0x230] sm:$0xff] %v1693_v39  ;;  %3363 = vst [vmem:[%s7671_s4 + $0xcb0] sm:$0xff] %v1933_v24  ;;  %2214 = vmatprep.mubr.bf16.mxu1 %v7965_v37  ;;  %2407 = vmatprep.mubr.bf16.mxu0 %v7965_v37 }
 0x337   :  { %v1695_v49 = vpop.f32.mrf.mxu0  ;;  %v1935_v19 = vpop.f32.mrf.mxu1 }
 0x338   :  { %3028 = vst [vmem:[%s7671_s4 + $0x238] sm:$0xff] %v1695_v49  ;;  %3364 = vst [vmem:[%s7671_s4 + $0xcb8] sm:$0xff] %v1935_v19 }
 0x339   :  { %v1697_v29 = vpop.f32.mrf.mxu0  ;;  %v1937_v41 = vpop.f32.mrf.mxu1 }
 0x33a   :  { %3034 = vst [vmem:[%s7671_s4 + $0x268] sm:$0xff] %v1697_v29  ;;  %3370 = vst [vmem:[%s7671_s4 + $0xce8] sm:$0xff] %v1937_v41 }
 0x33b   :  { %v1699_v27 = vpop.f32.mrf.mxu0  ;;  %v1939_v61 = vpop.f32.mrf.mxu1 }
 0x33c   :  { %3035 = vst [vmem:[%s7671_s4 + $0x270] sm:$0xff] %v1699_v27  ;;  %3371 = vst [vmem:[%s7671_s4 + $0xcf0] sm:$0xff] %v1939_v61 }
 0x33d   :  { %v1703_v60 = vpop.f32.mrf.mxu0  ;;  %v1943_v45 = vpop.f32.mrf.mxu1  ;;  %2215 = vmatmul.mubr.bf16.gmra.mxu1 %v6139_v42  ;;  %2408 = vmatmul.mubr.bf16.gmra.mxu0 %v6028_v12 }
 0x33e   :  { %3041 = vst [vmem:[%s7671_s4 + $0x2a0] sm:$0xff] %v1703_v60  ;;  %3377 = vst [vmem:[%s7671_s4 + $0xd20] sm:$0xff] %v1943_v45  ;;  %2224 = vmatprep.mubr.bf16.mxu1 %v7965_v37  ;;  %2417 = vmatprep.mubr.bf16.mxu0 %v7965_v37 }
 0x33f   :  { %v1705_v55 = vpop.f32.mrf.mxu0  ;;  %v1945_v28 = vpop.f32.mrf.mxu1 }
 0x340   :  { %3042 = vst [vmem:[%s7671_s4 + $0x2a8] sm:$0xff] %v1705_v55  ;;  %3378 = vst [vmem:[%s7671_s4 + $0xd28] sm:$0xff] %v1945_v28 }
 0x341   :  { %v1707_v59 = vpop.f32.mrf.mxu0  ;;  %v1947_v57 = vpop.f32.mrf.mxu1 }
 0x342   :  { %3048 = vst [vmem:[%s7671_s4 + $0x2d8] sm:$0xff] %v1707_v59  ;;  %3384 = vst [vmem:[%s7671_s4 + $0xd58] sm:$0xff] %v1947_v57 }
 0x343   :  { %v1709_v31 = vpop.f32.mrf.mxu0  ;;  %v1949_v44 = vpop.f32.mrf.mxu1 }
 0x344   :  { %3049 = vst [vmem:[%s7671_s4 + $0x2e0] sm:$0xff] %v1709_v31  ;;  %3385 = vst [vmem:[%s7671_s4 + $0xd60] sm:$0xff] %v1949_v44 }
 0x345   :  { %v1713_v51 = vpop.f32.mrf.mxu0  ;;  %v1953_v54 = vpop.f32.mrf.mxu1  ;;  %2225 = vmatmul.mubr.bf16.gmra.mxu1 %v6145_v62  ;;  %2418 = vmatmul.mubr.bf16.gmra.mxu0 %v6036_v30 }
 0x346   :  { %3055 = vst [vmem:[%s7671_s4 + $0x310] sm:$0xff] %v1713_v51  ;;  %3391 = vst [vmem:[%s7671_s4 + $0xd90] sm:$0xff] %v1953_v54  ;;  %2234 = vmatprep.mubr.bf16.mxu1 %v7965_v37  ;;  %2427 = vmatprep.mubr.bf16.mxu0 %v7965_v37 }
 0x347   :  { %v1715_v33 = vpop.f32.mrf.mxu0  ;;  %v1955_v4 = vpop.f32.mrf.mxu1 }
 0x348   :  { %3056 = vst [vmem:[%s7671_s4 + $0x318] sm:$0xff] %v1715_v33  ;;  %3392 = vst [vmem:[%s7671_s4 + $0xd98] sm:$0xff] %v1955_v4 }
 0x349   :  { %v1717_v17 = vpop.f32.mrf.mxu0  ;;  %v1957_v38 = vpop.f32.mrf.mxu1 }
 0x34a   :  { %3062 = vst [vmem:[%s7671_s4 + $0x348] sm:$0xff] %v1717_v17  ;;  %3398 = vst [vmem:[%s7671_s4 + $0xdc8] sm:$0xff] %v1957_v38 }
 0x34b   :  { %v1719_v1 = vpop.f32.mrf.mxu0  ;;  %v1959_v32 = vpop.f32.mrf.mxu1 }
 0x34c   :  { %3063 = vst [vmem:[%s7671_s4 + $0x350] sm:$0xff] %v1719_v1  ;;  %3399 = vst [vmem:[%s7671_s4 + $0xdd0] sm:$0xff] %v1959_v32 }
 0x34d   :  { %v1723_v11 = vpop.f32.mrf.mxu0  ;;  %v1996_v53 = vpop.f32.mrf.mxu1  ;;  %2235 = vmatmul.mubr.bf16.gmra.mxu1 %v5810_v43  ;;  %2428 = vmatmul.mubr.bf16.gmra.mxu0 %v6044_v21 }
 0x34e   :  { %3069 = vst [vmem:[%s7671_s4 + $0x380] sm:$0xff] %v1723_v11  ;;  %2959 = vst [vmem:[%s7671_s4 + $0x10] sm:$0xff] %v1996_v53  ;;  %2244 = vmatprep.mubr.bf16.mxu1 %v7965_v37  ;;  %2437 = vmatprep.mubr.bf16.mxu0 %v7965_v37 }
 0x34f   :  { %v1725_v5 = vpop.f32.mrf.mxu0  ;;  %v1998_v47 = vpop.f32.mrf.mxu1 }
 0x350   :  { %3070 = vst [vmem:[%s7671_s4 + $0x388] sm:$0xff] %v1725_v5  ;;  %2960 = vst [vmem:[%s7671_s4 + $0x18] sm:$0xff] %v1998_v47 }
 0x351   :  { %v1727_v43 = vpop.f32.mrf.mxu0  ;;  %v2000_v9 = vpop.f32.mrf.mxu1 }
 0x352   :  { %3076 = vst [vmem:[%s7671_s4 + $0x3b8] sm:$0xff] %v1727_v43  ;;  %2966 = vst [vmem:[%s7671_s4 + $0x48] sm:$0xff] %v2000_v9 }
 0x353   :  { %v1729_v8 = vpop.f32.mrf.mxu0  ;;  %v2002_v14 = vpop.f32.mrf.mxu1 }
 0x354   :  { %3077 = vst [vmem:[%s7671_s4 + $0x3c0] sm:$0xff] %v1729_v8  ;;  %2967 = vst [vmem:[%s7671_s4 + $0x50] sm:$0xff] %v2002_v14 }
 0x355   :  { %v1733_v10 = vpop.f32.mrf.mxu0  ;;  %v2006_v35 = vpop.f32.mrf.mxu1  ;;  %2245 = vmatmul.mubr.bf16.gmra.mxu1 %v5862_v23  ;;  %2438 = vmatmul.mubr.bf16.gmra.mxu0 %v6052_v6 }
 0x356   :  { %3083 = vst [vmem:[%s7671_s4 + $0x3f0] sm:$0xff] %v1733_v10  ;;  %2973 = vst [vmem:[%s7671_s4 + $0x80] sm:$0xff] %v2006_v35  ;;  %2254 = vmatprep.mubr.bf16.mxu1 %v7965_v37  ;;  %2447 = vmatprep.mubr.bf16.mxu0 %v7965_v37 }
 0x357   :  { %v1735_v2 = vpop.f32.mrf.mxu0  ;;  %v2008_v39 = vpop.f32.mrf.mxu1 }
 0x358   :  { %3084 = vst [vmem:[%s7671_s4 + $0x3f8] sm:$0xff] %v1735_v2  ;;  %2974 = vst [vmem:[%s7671_s4 + $0x88] sm:$0xff] %v2008_v39 }
 0x359   :  { %v1737_v23 = vpop.f32.mrf.mxu0  ;;  %v2010_v24 = vpop.f32.mrf.mxu1 }
 0x35a   :  { %3090 = vst [vmem:[%s7671_s4 + $0x428] sm:$0xff] %v1737_v23  ;;  %2980 = vst [vmem:[%s7671_s4 + $0xb8] sm:$0xff] %v2010_v24 }
 0x35b   :  { %v1739_v49 = vpop.f32.mrf.mxu0  ;;  %v2012_v19 = vpop.f32.mrf.mxu1 }
 0x35c   :  { %3091 = vst [vmem:[%s7671_s4 + $0x430] sm:$0xff] %v1739_v49  ;;  %2981 = vst [vmem:[%s7671_s4 + $0xc0] sm:$0xff] %v2012_v19 }
 0x35d   :  { %v1743_v29 = vpop.f32.mrf.mxu0  ;;  %v2016_v41 = vpop.f32.mrf.mxu1  ;;  %2255 = vmatmul.mubr.bf16.gmra.mxu1 %v5910_v16  ;;  %2448 = vmatmul.mubr.bf16.gmra.mxu0 %v6062_v50 }
 0x35e   :  { %3097 = vst [vmem:[%s7671_s4 + $0x460] sm:$0xff] %v1743_v29  ;;  %2987 = vst [vmem:[%s7671_s4 + $0xf0] sm:$0xff] %v2016_v41  ;;  %2264 = vmatprep.mubr.bf16.mxu1 %v7965_v37  ;;  %2457 = vmatprep.mubr.bf16.mxu0 %v7965_v37  ;;  %v3760_v41 = vld [vmem:[#allocation2] sm:$0xff]  }
 0x35f   :  { %v1745_v27 = vpop.f32.mrf.mxu0  ;;  %v2018_v61 = vpop.f32.mrf.mxu1 }
 0x360   :  { %3098 = vst [vmem:[%s7671_s4 + $0x468] sm:$0xff] %v1745_v27  ;;  %2988 = vst [vmem:[%s7671_s4 + $0xf8] sm:$0xff] %v2018_v61 }
 0x361   :  { %v1747_v16 = vpop.f32.mrf.mxu0  ;;  %v2020_v60 = vpop.f32.mrf.mxu1 }
 0x362   :  { %3104 = vst [vmem:[%s7671_s4 + $0x498] sm:$0xff] %v1747_v16  ;;  %2994 = vst [vmem:[%s7671_s4 + $0x128] sm:$0xff] %v2020_v60 }
 0x363   :  { %v1749_v45 = vpop.f32.mrf.mxu0  ;;  %v2022_v55 = vpop.f32.mrf.mxu1 }
 0x364   :  { %3105 = vst [vmem:[%s7671_s4 + $0x4a0] sm:$0xff] %v1749_v45  ;;  %2995 = vst [vmem:[%s7671_s4 + $0x130] sm:$0xff] %v2022_v55 }
 0x365   :  { %v1753_v28 = vpop.f32.mrf.mxu0  ;;  %v2026_v59 = vpop.f32.mrf.mxu1  ;;  %2265 = vmatmul.mubr.bf16.gmra.mxu1 %v5971_v20  ;;  %2458 = vmatmul.mubr.bf16.gmra.mxu0 %v6070_v26 }
 0x366   :  { %3111 = vst [vmem:[%s7671_s4 + $0x4d0] sm:$0xff] %v1753_v28  ;;  %3001 = vst [vmem:[%s7671_s4 + $0x160] sm:$0xff] %v2026_v59  ;;  %2274 = vmatprep.mubr.bf16.mxu1 %v7965_v37  ;;  %2467 = vmatprep.mubr.bf16.mxu0 %v7965_v37  ;;  %v3761_v59 = vld [vmem:[#allocation2 + $0x8] sm:$0xff]  }
 0x367   :  { %v1755_v57 = vpop.f32.mrf.mxu0  ;;  %v2028_v31 = vpop.f32.mrf.mxu1 }
 0x368   :  { %3112 = vst [vmem:[%s7671_s4 + $0x4d8] sm:$0xff] %v1755_v57  ;;  %3002 = vst [vmem:[%s7671_s4 + $0x168] sm:$0xff] %v2028_v31  ;;  %v3762_v57 = vld [vmem:[#allocation2 + $0x10] sm:$0xff]  }
 0x369   :  { %v1757_v20 = vpop.f32.mrf.mxu0  ;;  %v2030_v44 = vpop.f32.mrf.mxu1 }
 0x36a   :  { %3118 = vst [vmem:[%s7671_s4 + $0x508] sm:$0xff] %v1757_v20  ;;  %3008 = vst [vmem:[%s7671_s4 + $0x198] sm:$0xff] %v2030_v44 }
 0x36b   :  { %v1759_v51 = vpop.f32.mrf.mxu0  ;;  %v2032_v54 = vpop.f32.mrf.mxu1 }
 0x36c   :  { %3119 = vst [vmem:[%s7671_s4 + $0x510] sm:$0xff] %v1759_v51  ;;  %3009 = vst [vmem:[%s7671_s4 + $0x1a0] sm:$0xff] %v2032_v54 }
 0x36d   :  { %v1763_v33 = vpop.f32.mrf.mxu0  ;;  %v2036_v4 = vpop.f32.mrf.mxu1  ;;  %2275 = vmatmul.mubr.bf16.gmra.mxu1 %v6013_v52  ;;  %2468 = vmatmul.mubr.bf16.gmra.mxu0 %v6079_v58 }
 0x36e   :  { %3125 = vst [vmem:[%s7671_s4 + $0x540] sm:$0xff] %v1763_v33  ;;  %3015 = vst [vmem:[%s7671_s4 + $0x1d0] sm:$0xff] %v2036_v4  ;;  %2284 = vmatprep.mubr.bf16.mxu1 %v7965_v37  ;;  %2477 = vmatprep.mubr.bf16.mxu0 %v7965_v37 }
 0x36f   :  { %v1765_v17 = vpop.f32.mrf.mxu0  ;;  %v2038_v38 = vpop.f32.mrf.mxu1 }
 0x370   :  { %3126 = vst [vmem:[%s7671_s4 + $0x548] sm:$0xff] %v1765_v17  ;;  %3016 = vst [vmem:[%s7671_s4 + $0x1d8] sm:$0xff] %v2038_v38 }
 0x371   :  { %v1767_v52 = vpop.f32.mrf.mxu0  ;;  %v2040_v1 = vpop.f32.mrf.mxu1 }
 0x372   :  { %3132 = vst [vmem:[%s7671_s4 + $0x578] sm:$0xff] %v1767_v52  ;;  %3022 = vst [vmem:[%s7671_s4 + $0x208] sm:$0xff] %v2040_v1 }
 0x373   :  { %v1769_v32 = vpop.f32.mrf.mxu0  ;;  %v2042_v11 = vpop.f32.mrf.mxu1 }
 0x374   :  { %3133 = vst [vmem:[%s7671_s4 + $0x580] sm:$0xff] %v1769_v32  ;;  %3023 = vst [vmem:[%s7671_s4 + $0x210] sm:$0xff] %v2042_v11 }
 0x375   :  { %v1773_v53 = vpop.f32.mrf.mxu0  ;;  %v2046_v5 = vpop.f32.mrf.mxu1  ;;  %2285 = vmatmul.mubr.bf16.gmra.mxu1 %v6022_v48  ;;  %2478 = vmatmul.mubr.bf16.gmra.mxu0 %v6085_v15 }
 0x376   :  { %3139 = vst [vmem:[%s7671_s4 + $0x5b0] sm:$0xff] %v1773_v53  ;;  %3029 = vst [vmem:[%s7671_s4 + $0x240] sm:$0xff] %v2046_v5  ;;  %2294 = vmatprep.mubr.bf16.mxu1 %v7965_v37  ;;  %2487 = vmatprep.mubr.bf16.mxu0 %v7965_v37 }
 0x377   :  { %v1775_v47 = vpop.f32.mrf.mxu0  ;;  %v2048_v43 = vpop.f32.mrf.mxu1 }
 0x378   :  { %3140 = vst [vmem:[%s7671_s4 + $0x5b8] sm:$0xff] %v1775_v47  ;;  %3030 = vst [vmem:[%s7671_s4 + $0x248] sm:$0xff] %v2048_v43 }
 0x379   :  { %v1777_v48 = vpop.f32.mrf.mxu0  ;;  %v2050_v9 = vpop.f32.mrf.mxu1 }
 0x37a   :  { %3146 = vst [vmem:[%s7671_s4 + $0x5e8] sm:$0xff] %v1777_v48  ;;  %3036 = vst [vmem:[%s7671_s4 + $0x278] sm:$0xff] %v2050_v9 }
 0x37b   :  { %v1779_v8 = vpop.f32.mrf.mxu0  ;;  %v2052_v14 = vpop.f32.mrf.mxu1 }
 0x37c   :  { %3147 = vst [vmem:[%s7671_s4 + $0x5f0] sm:$0xff] %v1779_v8  ;;  %3037 = vst [vmem:[%s7671_s4 + $0x280] sm:$0xff] %v2052_v14 }
 0x37d   :  { %v1783_v10 = vpop.f32.mrf.mxu0  ;;  %v2056_v35 = vpop.f32.mrf.mxu1  ;;  %2295 = vmatmul.mubr.bf16.gmra.mxu1 %v6030_v56  ;;  %2488 = vmatmul.mubr.bf16.gmra.mxu0 %v6091_v40 }
 0x37e   :  { %3153 = vst [vmem:[%s7671_s4 + $0x620] sm:$0xff] %v1783_v10  ;;  %3043 = vst [vmem:[%s7671_s4 + $0x2b0] sm:$0xff] %v2056_v35  ;;  %2304 = vmatprep.mubr.bf16.mxu1 %v7965_v37  ;;  %2497 = vmatprep.mubr.bf16.mxu0 %v7965_v37 }
 0x37f   :  { %v1785_v2 = vpop.f32.mrf.mxu0  ;;  %v2058_v39 = vpop.f32.mrf.mxu1 }
 0x380   :  { %3154 = vst [vmem:[%s7671_s4 + $0x628] sm:$0xff] %v1785_v2  ;;  %3044 = vst [vmem:[%s7671_s4 + $0x2b8] sm:$0xff] %v2058_v39 }
 0x381   :  { %v1787_v56 = vpop.f32.mrf.mxu0  ;;  %v2060_v23 = vpop.f32.mrf.mxu1 }
 0x382   :  { %3160 = vst [vmem:[%s7671_s4 + $0x658] sm:$0xff] %v1787_v56  ;;  %3050 = vst [vmem:[%s7671_s4 + $0x2e8] sm:$0xff] %v2060_v23 }
 0x383   :  { %v1789_v24 = vpop.f32.mrf.mxu0  ;;  %v2062_v49 = vpop.f32.mrf.mxu1 }
 0x384   :  { %3161 = vst [vmem:[%s7671_s4 + $0x660] sm:$0xff] %v1789_v24  ;;  %3051 = vst [vmem:[%s7671_s4 + $0x2f0] sm:$0xff] %v2062_v49 }
 0x385   :  { %v1793_v19 = vpop.f32.mrf.mxu0  ;;  %v2066_v29 = vpop.f32.mrf.mxu1  ;;  %2305 = vmatmul.mubr.bf16.gmra.mxu1 %v6038_v0  ;;  %2498 = vmatmul.mubr.bf16.gmra.mxu0 %v6097_v36 }
 0x386   :  { %3167 = vst [vmem:[%s7671_s4 + $0x690] sm:$0xff] %v1793_v19  ;;  %3057 = vst [vmem:[%s7671_s4 + $0x320] sm:$0xff] %v2066_v29  ;;  %2507 = vmatprep.mubr.bf16.mxu0 %v7965_v37  ;;  %3498 = vmatprep.mubr.bf16.mxu1 %v3760_v41 }
 0x387   :  { %v1795_v27 = vpop.f32.mrf.mxu0  ;;  %v2068_v61 = vpop.f32.mrf.mxu1 }
 0x388   :  { %3168 = vst [vmem:[%s7671_s4 + $0x698] sm:$0xff] %v1795_v27  ;;  %3058 = vst [vmem:[%s7671_s4 + $0x328] sm:$0xff] %v2068_v61 }
 0x389   :  { %v1797_v0 = vpop.f32.mrf.mxu0  ;;  %v2070_v16 = vpop.f32.mrf.mxu1 }
 0x38a   :  { %3174 = vst [vmem:[%s7671_s4 + $0x6c8] sm:$0xff] %v1797_v0  ;;  %3064 = vst [vmem:[%s7671_s4 + $0x358] sm:$0xff] %v2070_v16 }
 0x38b   :  { %v1799_v60 = vpop.f32.mrf.mxu0  ;;  %v2072_v45 = vpop.f32.mrf.mxu1 }
 0x38c   :  { %3175 = vst [vmem:[%s7671_s4 + $0x6d0] sm:$0xff] %v1799_v60  ;;  %3065 = vst [vmem:[%s7671_s4 + $0x360] sm:$0xff] %v2072_v45 }
 0x38d   :  { %v1803_v55 = vpop.f32.mrf.mxu0  ;;  %v2076_v28 = vpop.f32.mrf.mxu1  ;;  %2508 = vmatmul.mubr.bf16.gmra.mxu0 %v6103_v46  ;;  %3499 = vmatmul.mubr.bf16.vlgmr.msra.gmra.mxu1 %v3761_v59 }
 0x38e   :  { %3181 = vst [vmem:[%s7671_s4 + $0x700] sm:$0xff] %v1803_v55  ;;  %3071 = vst [vmem:[%s7671_s4 + $0x390] sm:$0xff] %v2076_v28  ;;  %2517 = vmatprep.mubr.bf16.mxu0 %v7965_v37  ;;  %3502 = vmatprep.mubr.bf16.mxu1 %v3762_v57 }
 0x38f   :  { %v1805_v31 = vpop.f32.mrf.mxu0  ;;  %v2078_v20 = vpop.f32.mrf.mxu1 }
 0x390   :  { %3182 = vst [vmem:[%s7671_s4 + $0x708] sm:$0xff] %v1805_v31  ;;  %3072 = vst [vmem:[%s7671_s4 + $0x398] sm:$0xff] %v2078_v20  ;;  %v6820_v20 = vld [vmem:[#allocation2 + $0xc0] sm:$0xff]  }
 0x391   :  { %v1807_v44 = vpop.f32.mrf.mxu0  ;;  %v2080_v51 = vpop.f32.mrf.mxu1 }
 0x392   :  { %3188 = vst [vmem:[%s7671_s4 + $0x738] sm:$0xff] %v1807_v44  ;;  %3078 = vst [vmem:[%s7671_s4 + $0x3c8] sm:$0xff] %v2080_v51  ;;  %v3764_v44 = vld [vmem:[#allocation2 + $0x88] sm:$0xff]   ;;  %v3765_v51 = vld [vmem:[#allocation2 + $0x90] sm:$0xff]  }
 0x393   :  { %v1809_v54 = vpop.f32.mrf.mxu0  ;;  %v2082_v33 = vpop.f32.mrf.mxu1 }
 0x394   :  { %3189 = vst [vmem:[%s7671_s4 + $0x740] sm:$0xff] %v1809_v54  ;;  %3079 = vst [vmem:[%s7671_s4 + $0x3d0] sm:$0xff] %v2082_v33 }
 0x395   :  { %v1813_v4 = vpop.f32.mrf.mxu0  ;;  %v2086_v17 = vpop.f32.mrf.mxu1  ;;  %2518 = vmatmul.mubr.bf16.gmra.mxu0 %v6109_v7  ;;  %3503 = vmatmul.mubr.bf16.gmra.mxu1 %v5969_v3 }
 0x396   :  { %3195 = vst [vmem:[%s7671_s4 + $0x770] sm:$0xff] %v1813_v4  ;;  %3085 = vst [vmem:[%s7671_s4 + $0x400] sm:$0xff] %v2086_v17  ;;  %2527 = vmatprep.mubr.bf16.mxu0 %v7965_v37  ;;  %3506 = vmatprep.mubr.bf16.mxu1 %v6011_v63 }
 0x397   :  { %v1815_v38 = vpop.f32.mrf.mxu0  ;;  %v2088_v52 = vpop.f32.mrf.mxu1 }
 0x398   :  { %3196 = vst [vmem:[%s7671_s4 + $0x778] sm:$0xff] %v1815_v38  ;;  %3086 = vst [vmem:[%s7671_s4 + $0x408] sm:$0xff] %v2088_v52 }
 0x399   :  { %v1817_v3 = vpop.f32.mrf.mxu0  ;;  %v2090_v7 = vpop.f32.mrf.mxu1 }
 0x39a   :  { %3202 = vst [vmem:[%s7671_s4 + $0x7a8] sm:$0xff] %v1817_v3  ;;  %3092 = vst [vmem:[%s7671_s4 + $0x438] sm:$0xff] %v2090_v7 }
 0x39b   :  { %v1819_v63 = vpop.f32.mrf.mxu0  ;;  %v2092_v1 = vpop.f32.mrf.mxu1 }
 0x39c   :  { %3203 = vst [vmem:[%s7671_s4 + $0x7b0] sm:$0xff] %v1819_v63  ;;  %3093 = vst [vmem:[%s7671_s4 + $0x440] sm:$0xff] %v2092_v1  ;;  %v6848_v63 = vld [vmem:[#allocation2 + $0xc8] sm:$0xff]   ;;  %v3767_v1 = vld [vmem:[#allocation2 + $0x98] sm:$0xff]  }
 0x39d   :  { %v1823_v32 = vpop.f32.mrf.mxu0  ;;  %v2096_v11 = vpop.f32.mrf.mxu1  ;;  %2528 = vmatmul.mubr.bf16.gmra.mxu0 %v6115_v22  ;;  %3507 = vmatmul.mubr.bf16.gmra.mxu1 %v6020_v18 }
 0x39e   :  { %3209 = vst [vmem:[%s7671_s4 + $0x7e0] sm:$0xff] %v1823_v32  ;;  %3099 = vst [vmem:[%s7671_s4 + $0x470] sm:$0xff] %v2096_v11  ;;  %2537 = vmatprep.mubr.bf16.mxu0 %v7965_v37  ;;  %3510 = vmatprep.mubr.bf16.mxu1 %v6028_v12  ;;  %v3768_v32 = vld [vmem:[#allocation2 + $0xa0] sm:$0xff]  }
 0x39f   :  { %v1825_v53 = vpop.f32.mrf.mxu0  ;;  %v2098_v5 = vpop.f32.mrf.mxu1 }
 0x3a0   :  { %3210 = vst [vmem:[%s7671_s4 + $0x7e8] sm:$0xff] %v1825_v53  ;;  %3100 = vst [vmem:[%s7671_s4 + $0x478] sm:$0xff] %v2098_v5 }
 0x3a1   :  { %v1827_v18 = vpop.f32.mrf.mxu0  ;;  %v2100_v22 = vpop.f32.mrf.mxu1 }
 0x3a2   :  { %3216 = vst [vmem:[%s7671_s4 + $0x818] sm:$0xff] %v1827_v18  ;;  %3106 = vst [vmem:[%s7671_s4 + $0x4a8] sm:$0xff] %v2100_v22 }
 0x3a3   :  { %v1829_v12 = vpop.f32.mrf.mxu0  ;;  %v2102_v47 = vpop.f32.mrf.mxu1 }
 0x3a4   :  { %3217 = vst [vmem:[%s7671_s4 + $0x820] sm:$0xff] %v1829_v12  ;;  %3107 = vst [vmem:[%s7671_s4 + $0x4b0] sm:$0xff] %v2102_v47 }
 0x3a5   :  { %v1833_v43 = vpop.f32.mrf.mxu0  ;;  %v2106_v48 = vpop.f32.mrf.mxu1  ;;  %2538 = vmatmul.mubr.bf16.gmra.mxu0 %v6121_v34  ;;  %3511 = vmatmul.mubr.bf16.gmra.mxu1 %v6036_v30 }
 0x3a6   :  { %3223 = vst [vmem:[%s7671_s4 + $0x850] sm:$0xff] %v1833_v43  ;;  %3113 = vst [vmem:[%s7671_s4 + $0x4e0] sm:$0xff] %v2106_v48  ;;  %2547 = vmatprep.mubr.bf16.mxu0 %v7965_v37  ;;  %3514 = vmatprep.mubr.bf16.mxu1 %v6044_v21  ;;  %v3769_v48 = vld [vmem:[#allocation2 + $0xd0] sm:$0xff]  }
 0x3a7   :  { %v1835_v9 = vpop.f32.mrf.mxu0  ;;  %v2108_v8 = vpop.f32.mrf.mxu1 }
 0x3a8   :  { %3224 = vst [vmem:[%s7671_s4 + $0x858] sm:$0xff] %v1835_v9  ;;  %3114 = vst [vmem:[%s7671_s4 + $0x4e8] sm:$0xff] %v2108_v8  ;;  %v3770_v9 = vld [vmem:[#allocation2 + $0xa8] sm:$0xff]   ;;  %v3771_v8 = vld [vmem:[#allocation2 + $0xb0] sm:$0xff]  }
 0x3a9   :  { %v1837_v30 = vpop.f32.mrf.mxu0  ;;  %v2110_v34 = vpop.f32.mrf.mxu1 }
 0x3aa   :  { %3230 = vst [vmem:[%s7671_s4 + $0x888] sm:$0xff] %v1837_v30  ;;  %3120 = vst [vmem:[%s7671_s4 + $0x518] sm:$0xff] %v2110_v34 }
 0x3ab   :  { %v1839_v21 = vpop.f32.mrf.mxu0  ;;  %v2112_v14 = vpop.f32.mrf.mxu1 }
 0x3ac   :  { %3231 = vst [vmem:[%s7671_s4 + $0x890] sm:$0xff] %v1839_v21  ;;  %3121 = vst [vmem:[%s7671_s4 + $0x520] sm:$0xff] %v2112_v14 }
 0x3ad   :  { %v1843_v10 = vpop.f32.mrf.mxu0  ;;  %v2116_v35 = vpop.f32.mrf.mxu1  ;;  %2548 = vmatmul.mubr.bf16.gmra.mxu0 %v6127_v25  ;;  %3515 = vmatmul.mubr.bf16.gmra.mxu1 %v6052_v6 }
 0x3ae   :  { %3237 = vst [vmem:[%s7671_s4 + $0x8c0] sm:$0xff] %v1843_v10  ;;  %3127 = vst [vmem:[%s7671_s4 + $0x550] sm:$0xff] %v2116_v35  ;;  %2557 = vmatprep.mubr.bf16.mxu0 %v7965_v37  ;;  %3518 = vmatprep.mubr.bf16.mxu1 %v6062_v50 }
 0x3af   :  { %v1845_v2 = vpop.f32.mrf.mxu0  ;;  %v2118_v39 = vpop.f32.mrf.mxu1 }
 0x3b0   :  { %3238 = vst [vmem:[%s7671_s4 + $0x8c8] sm:$0xff] %v1845_v2  ;;  %3128 = vst [vmem:[%s7671_s4 + $0x558] sm:$0xff] %v2118_v39 }
 0x3b1   :  { %v1847_v6 = vpop.f32.mrf.mxu0  ;;  %v2120_v25 = vpop.f32.mrf.mxu1 }
 0x3b2   :  { %3244 = vst [vmem:[%s7671_s4 + $0x8f8] sm:$0xff] %v1847_v6  ;;  %3134 = vst [vmem:[%s7671_s4 + $0x588] sm:$0xff] %v2120_v25  ;;  %v3772_v6 = vld [vmem:[#allocation2 + $0xd8] sm:$0xff]  }
 0x3b3   :  { %v1849_v50 = vpop.f32.mrf.mxu0  ;;  %v2122_v56 = vpop.f32.mrf.mxu1  ;;  %v3773_v25 = vld [vmem:[#allocation2 + $0xb8] sm:$0xff]  }
 0x3b4   :  { %3245 = vst [vmem:[%s7671_s4 + $0x900] sm:$0xff] %v1849_v50  ;;  %3135 = vst [vmem:[%s7671_s4 + $0x590] sm:$0xff] %v2122_v56 }
 0x3b5   :  { %v1853_v23 = vpop.f32.mrf.mxu0  ;;  %v2126_v24 = vpop.f32.mrf.mxu1  ;;  %2558 = vmatmul.mubr.bf16.gmra.mxu0 %v6133_v13  ;;  %3519 = vmatmul.mubr.bf16.gmra.mxu1 %v6070_v26 }
 0x3b6   :  { %3251 = vst [vmem:[%s7671_s4 + $0x930] sm:$0xff] %v1853_v23  ;;  %3141 = vst [vmem:[%s7671_s4 + $0x5c0] sm:$0xff] %v2126_v24  ;;  %2567 = vmatprep.mubr.bf16.mxu0 %v7965_v37  ;;  %3522 = vmatprep.mubr.bf16.mxu1 %v6079_v58 }
 0x3b7   :  { %v1855_v49 = vpop.f32.mrf.mxu0  ;;  %v2128_v19 = vpop.f32.mrf.mxu1 }
 0x3b8   :  { %3252 = vst [vmem:[%s7671_s4 + $0x938] sm:$0xff] %v1855_v49  ;;  %3142 = vst [vmem:[%s7671_s4 + $0x5c8] sm:$0xff] %v2128_v19 }
 0x3b9   :  { %v1857_v26 = vpop.f32.mrf.mxu0  ;;  %v2130_v13 = vpop.f32.mrf.mxu1 }
 0x3ba   :  { %3258 = vst [vmem:[%s7671_s4 + $0x968] sm:$0xff] %v1857_v26  ;;  %3148 = vst [vmem:[%s7671_s4 + $0x5f8] sm:$0xff] %v2130_v13 }
 0x3bb   :  { %v1859_v58 = vpop.f32.mrf.mxu0  ;;  %v2132_v29 = vpop.f32.mrf.mxu1 }
 0x3bc   :  { %3259 = vst [vmem:[%s7671_s4 + $0x970] sm:$0xff] %v1859_v58  ;;  %3149 = vst [vmem:[%s7671_s4 + $0x600] sm:$0xff] %v2132_v29  ;;  %v3774_v58 = vld [vmem:[#allocation2 + $0xe0] sm:$0xff]  }
 0x3bd   :  { %v1863_v41 = vpop.f32.mrf.mxu0  ;;  %v2136_v27 = vpop.f32.mrf.mxu1  ;;  %2568 = vmatmul.mubr.bf16.gmra.mxu0 %v6139_v42  ;;  %3523 = vmatmul.mubr.bf16.gmra.mxu1 %v6085_v15 }
 0x3be   :  { %3265 = vst [vmem:[%s7671_s4 + $0x9a0] sm:$0xff] %v1863_v41  ;;  %3155 = vst [vmem:[%s7671_s4 + $0x630] sm:$0xff] %v2136_v27  ;;  %2577 = vmatprep.mubr.bf16.mxu0 %v7965_v37  ;;  %3526 = vmatprep.mubr.bf16.mxu1 %v6091_v40 }
 0x3bf   :  { %v1865_v61 = vpop.f32.mrf.mxu0  ;;  %v2138_v0 = vpop.f32.mrf.mxu1 }
 0x3c0   :  { %3266 = vst [vmem:[%s7671_s4 + $0x9a8] sm:$0xff] %v1865_v61  ;;  %3156 = vst [vmem:[%s7671_s4 + $0x638] sm:$0xff] %v2138_v0 }
 0x3c1   :  { %v1867_v15 = vpop.f32.mrf.mxu0  ;;  %v2140_v42 = vpop.f32.mrf.mxu1 }
 0x3c2   :  { %3272 = vst [vmem:[%s7671_s4 + $0x9d8] sm:$0xff] %v1867_v15  ;;  %3162 = vst [vmem:[%s7671_s4 + $0x668] sm:$0xff] %v2140_v42 }
 0x3c3   :  { %v1869_v40 = vpop.f32.mrf.mxu0  ;;  %v2142_v16 = vpop.f32.mrf.mxu1 }
 0x3c4   :  { %3273 = vst [vmem:[%s7671_s4 + $0x9e0] sm:$0xff] %v1869_v40  ;;  %3163 = vst [vmem:[%s7671_s4 + $0x670] sm:$0xff] %v2142_v16  ;;  %v3775_v16 = vld [vmem:[#allocation2 + $0xe8] sm:$0xff]  }
 0x3c5   :  { %v1873_v60 = vpop.f32.mrf.mxu0  ;;  %v2146_v45 = vpop.f32.mrf.mxu1  ;;  %2578 = vmatmul.mubr.bf16.gmra.mxu0 %v6145_v62  ;;  %3527 = vmatmul.mubr.bf16.gmra.mxu1 %v6097_v36 }
 0x3c6   :  { %3279 = vst [vmem:[%s7671_s4 + $0xa10] sm:$0xff] %v1873_v60  ;;  %3169 = vst [vmem:[%s7671_s4 + $0x6a0] sm:$0xff] %v2146_v45  ;;  %2587 = vmatprep.mubr.bf16.mxu0 %v7965_v37  ;;  %3530 = vmatprep.mubr.bf16.mxu1 %v6103_v46 }
 0x3c7   :  { %v1875_v55 = vpop.f32.mrf.mxu0  ;;  %v2148_v28 = vpop.f32.mrf.mxu1 }
 0x3c8   :  { %3280 = vst [vmem:[%s7671_s4 + $0xa18] sm:$0xff] %v1875_v55  ;;  %3170 = vst [vmem:[%s7671_s4 + $0x6a8] sm:$0xff] %v2148_v28 }
 0x3c9   :  { %v1877_v36 = vpop.f32.mrf.mxu0  ;;  %v2150_v62 = vpop.f32.mrf.mxu1 }
 0x3ca   :  { %3286 = vst [vmem:[%s7671_s4 + $0xa48] sm:$0xff] %v1877_v36  ;;  %3176 = vst [vmem:[%s7671_s4 + $0x6d8] sm:$0xff] %v2150_v62 }
 0x3cb   :  { %v1879_v46 = vpop.f32.mrf.mxu0  ;;  %v2152_v59 = vpop.f32.mrf.mxu1 }
 0x3cc   :  { %3287 = vst [vmem:[%s7671_s4 + $0xa50] sm:$0xff] %v1879_v46  ;;  %3177 = vst [vmem:[%s7671_s4 + $0x6e0] sm:$0xff] %v2152_v59 }
 0x3cd   :  { %v2156_v57 = vpop.f32.mrf.mxu1  ;;  %v2349_v31 = vpop.f32.mrf.mxu0  ;;  %2588 = vmatmul.mubr.bf16.gmra.mxu0 %v6820_v20  ;;  %3531 = vmatmul.mubr.bf16.gmra.mxu1 %v3764_v44 }
 0x3ce   :  { %3183 = vst [vmem:[%s7671_s4 + $0x710] sm:$0xff] %v2156_v57  ;;  %2961 = vst [vmem:[%s7671_s4 + $0x20] sm:$0xff] %v2349_v31  ;;  %2597 = vmatprep.mubr.bf16.mxu0 %v7965_v37  ;;  %3534 = vmatprep.mubr.bf16.mxu1 %v3765_v51  ;;  %v3776_v57 = vld [vmem:[#allocation2 + $0xf0] sm:$0xff]  }
 0x3cf   :  { %v2158_v54 = vpop.f32.mrf.mxu1  ;;  %v2351_v33 = vpop.f32.mrf.mxu0 }
 0x3d0   :  { %3184 = vst [vmem:[%s7671_s4 + $0x718] sm:$0xff] %v2158_v54  ;;  %2962 = vst [vmem:[%s7671_s4 + $0x28] sm:$0xff] %v2351_v33 }
 0x3d1   :  { %v2160_v4 = vpop.f32.mrf.mxu1  ;;  %v2353_v17 = vpop.f32.mrf.mxu0 }
 0x3d2   :  { %3190 = vst [vmem:[%s7671_s4 + $0x748] sm:$0xff] %v2160_v4  ;;  %2968 = vst [vmem:[%s7671_s4 + $0x58] sm:$0xff] %v2353_v17  ;;  %v3777_v17 = vld [vmem:[#allocation2 + $0xf8] sm:$0xff]  }
 0x3d3   :  { %v2162_v38 = vpop.f32.mrf.mxu1  ;;  %v2355_v52 = vpop.f32.mrf.mxu0 }
 0x3d4   :  { %3191 = vst [vmem:[%s7671_s4 + $0x750] sm:$0xff] %v2162_v38  ;;  %2969 = vst [vmem:[%s7671_s4 + $0x60] sm:$0xff] %v2355_v52 }
 0x3d5   :  { %v2166_v3 = vpop.f32.mrf.mxu1  ;;  %v2359_v7 = vpop.f32.mrf.mxu0  ;;  %2598 = vmatmul.mubr.bf16.gmra.mxu0 %v6848_v63  ;;  %3535 = vmatmul.mubr.bf16.gmra.mxu1 %v3767_v1 }
 0x3d6   :  { %3197 = vst [vmem:[%s7671_s4 + $0x780] sm:$0xff] %v2166_v3  ;;  %2975 = vst [vmem:[%s7671_s4 + $0x90] sm:$0xff] %v2359_v7  ;;  %2607 = vmatprep.mubr.bf16.mxu0 %v7965_v37  ;;  %3538 = vmatprep.mubr.bf16.mxu1 %v3768_v32 }
 0x3d7   :  { %v2168_v11 = vpop.f32.mrf.mxu1  ;;  %v2361_v53 = vpop.f32.mrf.mxu0 }
 0x3d8   :  { %3198 = vst [vmem:[%s7671_s4 + $0x788] sm:$0xff] %v2168_v11  ;;  %2976 = vst [vmem:[%s7671_s4 + $0x98] sm:$0xff] %v2361_v53 }
 0x3d9   :  { %v2170_v5 = vpop.f32.mrf.mxu1  ;;  %v2363_v18 = vpop.f32.mrf.mxu0 }
 0x3da   :  { %3204 = vst [vmem:[%s7671_s4 + $0x7b8] sm:$0xff] %v2170_v5  ;;  %2982 = vst [vmem:[%s7671_s4 + $0xc8] sm:$0xff] %v2363_v18 }
 0x3db   :  { %v2172_v22 = vpop.f32.mrf.mxu1  ;;  %v2365_v12 = vpop.f32.mrf.mxu0 }
 0x3dc   :  { %3205 = vst [vmem:[%s7671_s4 + $0x7c0] sm:$0xff] %v2172_v22  ;;  %2983 = vst [vmem:[%s7671_s4 + $0xd0] sm:$0xff] %v2365_v12 }
 0x3dd   :  { %v2176_v47 = vpop.f32.mrf.mxu1  ;;  %v2369_v43 = vpop.f32.mrf.mxu0  ;;  %2608 = vmatmul.mubr.bf16.gmra.mxu0 %v3769_v48  ;;  %3539 = vmatmul.mubr.bf16.gmra.mxu1 %v3770_v9 }
 0x3de   :  { %3211 = vst [vmem:[%s7671_s4 + $0x7f0] sm:$0xff] %v2176_v47  ;;  %2989 = vst [vmem:[%s7671_s4 + $0x100] sm:$0xff] %v2369_v43  ;;  %2617 = vmatprep.mubr.bf16.mxu0 %v7965_v37  ;;  %3542 = vmatprep.mubr.bf16.mxu1 %v3771_v8 }
 0x3df   :  { %v2178_v30 = vpop.f32.mrf.mxu1  ;;  %v2371_v34 = vpop.f32.mrf.mxu0 }
 0x3e0   :  { %3212 = vst [vmem:[%s7671_s4 + $0x7f8] sm:$0xff] %v2178_v30  ;;  %2990 = vst [vmem:[%s7671_s4 + $0x108] sm:$0xff] %v2371_v34 }
 0x3e1   :  { %v2180_v21 = vpop.f32.mrf.mxu1  ;;  %v2373_v14 = vpop.f32.mrf.mxu0 }
 0x3e2   :  { %3218 = vst [vmem:[%s7671_s4 + $0x828] sm:$0xff] %v2180_v21  ;;  %2996 = vst [vmem:[%s7671_s4 + $0x138] sm:$0xff] %v2373_v14 }
 0x3e3   :  { %v2182_v10 = vpop.f32.mrf.mxu1  ;;  %v2375_v35 = vpop.f32.mrf.mxu0 }
 0x3e4   :  { %3219 = vst [vmem:[%s7671_s4 + $0x830] sm:$0xff] %v2182_v10  ;;  %2997 = vst [vmem:[%s7671_s4 + $0x140] sm:$0xff] %v2375_v35 }
 0x3e5   :  { %v2186_v2 = vpop.f32.mrf.mxu1  ;;  %v2379_v39 = vpop.f32.mrf.mxu0  ;;  %2618 = vmatmul.mubr.bf16.gmra.mxu0 %v3772_v6  ;;  %3543 = vmatmul.mubr.bf16.gmra.mxu1 %v3773_v25 }
 0x3e6   :  { %3225 = vst [vmem:[%s7671_s4 + $0x860] sm:$0xff] %v2186_v2  ;;  %3003 = vst [vmem:[%s7671_s4 + $0x170] sm:$0xff] %v2379_v39  ;;  %2627 = vmatprep.mubr.bf16.mxu0 %v7965_v37  ;;  %3546 = vmatprep.mubr.bf16.mxu1 %v6820_v20 }
 0x3e7   :  { %v2188_v50 = vpop.f32.mrf.mxu1  ;;  %v2381_v56 = vpop.f32.mrf.mxu0 }
 0x3e8   :  { %3226 = vst [vmem:[%s7671_s4 + $0x868] sm:$0xff] %v2188_v50  ;;  %3004 = vst [vmem:[%s7671_s4 + $0x178] sm:$0xff] %v2381_v56 }
 0x3e9   :  { %v2190_v23 = vpop.f32.mrf.mxu1  ;;  %v2383_v24 = vpop.f32.mrf.mxu0 }
 0x3ea   :  { %3232 = vst [vmem:[%s7671_s4 + $0x898] sm:$0xff] %v2190_v23  ;;  %3010 = vst [vmem:[%s7671_s4 + $0x1a8] sm:$0xff] %v2383_v24 }
 0x3eb   :  { %v2192_v49 = vpop.f32.mrf.mxu1  ;;  %v2385_v19 = vpop.f32.mrf.mxu0 }
 0x3ec   :  { %3233 = vst [vmem:[%s7671_s4 + $0x8a0] sm:$0xff] %v2192_v49  ;;  %3011 = vst [vmem:[%s7671_s4 + $0x1b0] sm:$0xff] %v2385_v19 }
 0x3ed   :  { %v2196_v26 = vpop.f32.mrf.mxu1  ;;  %v2389_v13 = vpop.f32.mrf.mxu0  ;;  %2628 = vmatmul.mubr.bf16.gmra.mxu0 %v3774_v58  ;;  %3547 = vmatmul.mubr.bf16.gmra.mxu1 %v6848_v63 }
 0x3ee   :  { %3239 = vst [vmem:[%s7671_s4 + $0x8d0] sm:$0xff] %v2196_v26  ;;  %3017 = vst [vmem:[%s7671_s4 + $0x1e0] sm:$0xff] %v2389_v13  ;;  %2637 = vmatprep.mubr.bf16.mxu0 %v7965_v37  ;;  %3550 = vmatprep.mubr.bf16.mxu1 %v3769_v48 }
 0x3ef   :  { %v2198_v29 = vpop.f32.mrf.mxu1  ;;  %v2391_v41 = vpop.f32.mrf.mxu0 }
 0x3f0   :  { %3240 = vst [vmem:[%s7671_s4 + $0x8d8] sm:$0xff] %v2198_v29  ;;  %3018 = vst [vmem:[%s7671_s4 + $0x1e8] sm:$0xff] %v2391_v41 }
 0x3f1   :  { %v2200_v27 = vpop.f32.mrf.mxu1  ;;  %v2393_v61 = vpop.f32.mrf.mxu0 }
 0x3f2   :  { %3246 = vst [vmem:[%s7671_s4 + $0x908] sm:$0xff] %v2200_v27  ;;  %3024 = vst [vmem:[%s7671_s4 + $0x218] sm:$0xff] %v2393_v61 }
 0x3f3   :  { %v2202_v0 = vpop.f32.mrf.mxu1  ;;  %v2395_v15 = vpop.f32.mrf.mxu0 }
 0x3f4   :  { %3247 = vst [vmem:[%s7671_s4 + $0x910] sm:$0xff] %v2202_v0  ;;  %3025 = vst [vmem:[%s7671_s4 + $0x220] sm:$0xff] %v2395_v15 }
 0x3f5   :  { %v2206_v42 = vpop.f32.mrf.mxu1  ;;  %v2399_v40 = vpop.f32.mrf.mxu0  ;;  %2638 = vmatmul.mubr.bf16.gmra.mxu0 %v3775_v16  ;;  %3551 = vmatmul.mubr.bf16.gmra.mxu1 %v3772_v6 }
 0x3f6   :  { %3253 = vst [vmem:[%s7671_s4 + $0x940] sm:$0xff] %v2206_v42  ;;  %3031 = vst [vmem:[%s7671_s4 + $0x250] sm:$0xff] %v2399_v40  ;;  %2647 = vmatprep.mubr.bf16.mxu0 %v7965_v37  ;;  %3554 = vmatprep.mubr.bf16.mxu1 %v3774_v58 }
 0x3f7   :  { %v2208_v60 = vpop.f32.mrf.mxu1  ;;  %v2401_v45 = vpop.f32.mrf.mxu0 }
 0x3f8   :  { %3254 = vst [vmem:[%s7671_s4 + $0x948] sm:$0xff] %v2208_v60  ;;  %3032 = vst [vmem:[%s7671_s4 + $0x258] sm:$0xff] %v2401_v45 }
 0x3f9   :  { %v2210_v55 = vpop.f32.mrf.mxu1  ;;  %v2403_v28 = vpop.f32.mrf.mxu0 }
 0x3fa   :  { %3260 = vst [vmem:[%s7671_s4 + $0x978] sm:$0xff] %v2210_v55  ;;  %3038 = vst [vmem:[%s7671_s4 + $0x288] sm:$0xff] %v2403_v28 }
 0x3fb   :  { %v2212_v36 = vpop.f32.mrf.mxu1  ;;  %v2405_v62 = vpop.f32.mrf.mxu0 }
 0x3fc   :  { %3261 = vst [vmem:[%s7671_s4 + $0x980] sm:$0xff] %v2212_v36  ;;  %3039 = vst [vmem:[%s7671_s4 + $0x290] sm:$0xff] %v2405_v62 }
 0x3fd   :  { %v2216_v46 = vpop.f32.mrf.mxu1  ;;  %v2409_v59 = vpop.f32.mrf.mxu0  ;;  %2648 = vmatmul.mubr.bf16.gmra.mxu0 %v3776_v57  ;;  %3555 = vmatmul.mubr.bf16.gmra.mxu1 %v3775_v16 }
 0x3fe   :  { %3267 = vst [vmem:[%s7671_s4 + $0x9b0] sm:$0xff] %v2216_v46  ;;  %3045 = vst [vmem:[%s7671_s4 + $0x2c0] sm:$0xff] %v2409_v59  ;;  %2657 = vmatprep.mubr.bf16.mxu0 %v7965_v37  ;;  %3558 = vmatprep.mubr.bf16.mxu1 %v3776_v57 }
 0x3ff   :  { %v2218_v31 = vpop.f32.mrf.mxu1  ;;  %v2411_v20 = vpop.f32.mrf.mxu0 }
 0x400   :  { %3268 = vst [vmem:[%s7671_s4 + $0x9b8] sm:$0xff] %v2218_v31  ;;  %3046 = vst [vmem:[%s7671_s4 + $0x2c8] sm:$0xff] %v2411_v20 }
 0x401   :  { %v2220_v44 = vpop.f32.mrf.mxu1  ;;  %v2413_v51 = vpop.f32.mrf.mxu0 }
 0x402   :  { %3274 = vst [vmem:[%s7671_s4 + $0x9e8] sm:$0xff] %v2220_v44  ;;  %3052 = vst [vmem:[%s7671_s4 + $0x2f8] sm:$0xff] %v2413_v51 }
 0x403   :  { %v2222_v37 = vpop.f32.mrf.mxu1  ;;  %v2415_v54 = vpop.f32.mrf.mxu0 }
 0x404   :  { %3275 = vst [vmem:[%s7671_s4 + $0x9f0] sm:$0xff] %v2222_v37  ;;  %3053 = vst [vmem:[%s7671_s4 + $0x300] sm:$0xff] %v2415_v54 }
 0x405   :  { %v2226_v33 = vpop.f32.mrf.mxu1  ;;  %v2419_v4 = vpop.f32.mrf.mxu0  ;;  %2658 = vmatmul.mubr.bf16.gmra.mxu0 %v3777_v17  ;;  %3559 = vmatmul.mubr.bf16.gmra.mxu1 %v3777_v17 }
 0x406   :  { %3281 = vst [vmem:[%s7671_s4 + $0xa20] sm:$0xff] %v2226_v33  ;;  %3059 = vst [vmem:[%s7671_s4 + $0x330] sm:$0xff] %v2419_v4 }
 0x407   :  { %v2228_v38 = vpop.f32.mrf.mxu1  ;;  %v2421_v52 = vpop.f32.mrf.mxu0 }
 0x408   :  { %3282 = vst [vmem:[%s7671_s4 + $0xa28] sm:$0xff] %v2228_v38  ;;  %3060 = vst [vmem:[%s7671_s4 + $0x338] sm:$0xff] %v2421_v52 }
 0x409   :  { %v2230_v3 = vpop.f32.mrf.mxu1  ;;  %v2423_v7 = vpop.f32.mrf.mxu0 }
 0x40a   :  { %3288 = vst [vmem:[%s7671_s4 + $0xa58] sm:$0xff] %v2230_v3  ;;  %3066 = vst [vmem:[%s7671_s4 + $0x368] sm:$0xff] %v2423_v7 }
 0x40b   :  { %v2232_v63 = vpop.f32.mrf.mxu1  ;;  %v2425_v1 = vpop.f32.mrf.mxu0 }
 0x40c   :  { %3289 = vst [vmem:[%s7671_s4 + $0xa60] sm:$0xff] %v2232_v63  ;;  %3067 = vst [vmem:[%s7671_s4 + $0x370] sm:$0xff] %v2425_v1 }
 0x40d   :  { %v2236_v32 = vpop.f32.mrf.mxu1  ;;  %v2429_v11 = vpop.f32.mrf.mxu0 }
 0x40e   :  { %3295 = vst [vmem:[%s7671_s4 + $0xa90] sm:$0xff] %v2236_v32  ;;  %3073 = vst [vmem:[%s7671_s4 + $0x3a0] sm:$0xff] %v2429_v11 }
 0x40f   :  { %v2238_v53 = vpop.f32.mrf.mxu1  ;;  %v2431_v5 = vpop.f32.mrf.mxu0 }
 0x410   :  { %3296 = vst [vmem:[%s7671_s4 + $0xa98] sm:$0xff] %v2238_v53  ;;  %3074 = vst [vmem:[%s7671_s4 + $0x3a8] sm:$0xff] %v2431_v5 }
 0x411   :  { %v2240_v18 = vpop.f32.mrf.mxu1  ;;  %v2433_v22 = vpop.f32.mrf.mxu0 }
 0x412   :  { %3302 = vst [vmem:[%s7671_s4 + $0xac8] sm:$0xff] %v2240_v18  ;;  %3080 = vst [vmem:[%s7671_s4 + $0x3d8] sm:$0xff] %v2433_v22 }
 0x413   :  { %v2242_v12 = vpop.f32.mrf.mxu1  ;;  %v2435_v47 = vpop.f32.mrf.mxu0 }
 0x414   :  { %3303 = vst [vmem:[%s7671_s4 + $0xad0] sm:$0xff] %v2242_v12  ;;  %3081 = vst [vmem:[%s7671_s4 + $0x3e0] sm:$0xff] %v2435_v47 }
 0x415   :  { %v2246_v43 = vpop.f32.mrf.mxu1  ;;  %v2439_v48 = vpop.f32.mrf.mxu0 }
 0x416   :  { %3309 = vst [vmem:[%s7671_s4 + $0xb00] sm:$0xff] %v2246_v43  ;;  %3087 = vst [vmem:[%s7671_s4 + $0x410] sm:$0xff] %v2439_v48 }
 0x417   :  { %v2248_v9 = vpop.f32.mrf.mxu1  ;;  %v2441_v8 = vpop.f32.mrf.mxu0 }
 0x418   :  { %3310 = vst [vmem:[%s7671_s4 + $0xb08] sm:$0xff] %v2248_v9  ;;  %3088 = vst [vmem:[%s7671_s4 + $0x418] sm:$0xff] %v2441_v8 }
 0x419   :  { %v2250_v30 = vpop.f32.mrf.mxu1  ;;  %v2443_v34 = vpop.f32.mrf.mxu0 }
 0x41a   :  { %3316 = vst [vmem:[%s7671_s4 + $0xb38] sm:$0xff] %v2250_v30  ;;  %3094 = vst [vmem:[%s7671_s4 + $0x448] sm:$0xff] %v2443_v34 }
 0x41b   :  { %v2252_v21 = vpop.f32.mrf.mxu1  ;;  %v2445_v14 = vpop.f32.mrf.mxu0 }
 0x41c   :  { %3317 = vst [vmem:[%s7671_s4 + $0xb40] sm:$0xff] %v2252_v21  ;;  %3095 = vst [vmem:[%s7671_s4 + $0x450] sm:$0xff] %v2445_v14 }
 0x41d   :  { %v2256_v10 = vpop.f32.mrf.mxu1  ;;  %v2449_v35 = vpop.f32.mrf.mxu0 }
 0x41e   :  { %3323 = vst [vmem:[%s7671_s4 + $0xb70] sm:$0xff] %v2256_v10  ;;  %3101 = vst [vmem:[%s7671_s4 + $0x480] sm:$0xff] %v2449_v35 }
 0x41f   :  { %v2258_v2 = vpop.f32.mrf.mxu1  ;;  %v2451_v39 = vpop.f32.mrf.mxu0 }
 0x420   :  { %3324 = vst [vmem:[%s7671_s4 + $0xb78] sm:$0xff] %v2258_v2  ;;  %3102 = vst [vmem:[%s7671_s4 + $0x488] sm:$0xff] %v2451_v39 }
 0x421   :  { %v2260_v6 = vpop.f32.mrf.mxu1  ;;  %v2453_v25 = vpop.f32.mrf.mxu0 }
 0x422   :  { %3330 = vst [vmem:[%s7671_s4 + $0xba8] sm:$0xff] %v2260_v6  ;;  %3108 = vst [vmem:[%s7671_s4 + $0x4b8] sm:$0xff] %v2453_v25 }
 0x423   :  { %v2262_v50 = vpop.f32.mrf.mxu1  ;;  %v2455_v56 = vpop.f32.mrf.mxu0 }
 0x424   :  { %3331 = vst [vmem:[%s7671_s4 + $0xbb0] sm:$0xff] %v2262_v50  ;;  %3109 = vst [vmem:[%s7671_s4 + $0x4c0] sm:$0xff] %v2455_v56 }
 0x425   :  { %v2266_v23 = vpop.f32.mrf.mxu1  ;;  %v2459_v24 = vpop.f32.mrf.mxu0 }
 0x426   :  { %3337 = vst [vmem:[%s7671_s4 + $0xbe0] sm:$0xff] %v2266_v23  ;;  %3115 = vst [vmem:[%s7671_s4 + $0x4f0] sm:$0xff] %v2459_v24 }
 0x427   :  { %v2268_v49 = vpop.f32.mrf.mxu1  ;;  %v2461_v19 = vpop.f32.mrf.mxu0 }
 0x428   :  { %3338 = vst [vmem:[%s7671_s4 + $0xbe8] sm:$0xff] %v2268_v49  ;;  %3116 = vst [vmem:[%s7671_s4 + $0x4f8] sm:$0xff] %v2461_v19 }
 0x429   :  { %v2270_v26 = vpop.f32.mrf.mxu1  ;;  %v2463_v13 = vpop.f32.mrf.mxu0 }
 0x42a   :  { %3344 = vst [vmem:[%s7671_s4 + $0xc18] sm:$0xff] %v2270_v26  ;;  %3122 = vst [vmem:[%s7671_s4 + $0x528] sm:$0xff] %v2463_v13 }
 0x42b   :  { %v2272_v58 = vpop.f32.mrf.mxu1  ;;  %v2465_v29 = vpop.f32.mrf.mxu0 }
 0x42c   :  { %3345 = vst [vmem:[%s7671_s4 + $0xc20] sm:$0xff] %v2272_v58  ;;  %3123 = vst [vmem:[%s7671_s4 + $0x530] sm:$0xff] %v2465_v29 }
 0x42d   :  { %v2276_v41 = vpop.f32.mrf.mxu1  ;;  %v2469_v27 = vpop.f32.mrf.mxu0 }
 0x42e   :  { %3351 = vst [vmem:[%s7671_s4 + $0xc50] sm:$0xff] %v2276_v41  ;;  %3129 = vst [vmem:[%s7671_s4 + $0x560] sm:$0xff] %v2469_v27 }
 0x42f   :  { %v2278_v61 = vpop.f32.mrf.mxu1  ;;  %v2471_v0 = vpop.f32.mrf.mxu0 }
 0x430   :  { %3352 = vst [vmem:[%s7671_s4 + $0xc58] sm:$0xff] %v2278_v61  ;;  %3130 = vst [vmem:[%s7671_s4 + $0x568] sm:$0xff] %v2471_v0 }
 0x431   :  { %v2280_v15 = vpop.f32.mrf.mxu1  ;;  %v2473_v42 = vpop.f32.mrf.mxu0 }
 0x432   :  { %3358 = vst [vmem:[%s7671_s4 + $0xc88] sm:$0xff] %v2280_v15  ;;  %3136 = vst [vmem:[%s7671_s4 + $0x598] sm:$0xff] %v2473_v42 }
 0x433   :  { %v2282_v40 = vpop.f32.mrf.mxu1  ;;  %v2475_v16 = vpop.f32.mrf.mxu0 }
 0x434   :  { %3359 = vst [vmem:[%s7671_s4 + $0xc90] sm:$0xff] %v2282_v40  ;;  %3137 = vst [vmem:[%s7671_s4 + $0x5a0] sm:$0xff] %v2475_v16 }
 0x435   :  { %v2286_v60 = vpop.f32.mrf.mxu1  ;;  %v2479_v45 = vpop.f32.mrf.mxu0 }
 0x436   :  { %3365 = vst [vmem:[%s7671_s4 + $0xcc0] sm:$0xff] %v2286_v60  ;;  %3143 = vst [vmem:[%s7671_s4 + $0x5d0] sm:$0xff] %v2479_v45 }
 0x437   :  { %v2288_v55 = vpop.f32.mrf.mxu1  ;;  %v2481_v28 = vpop.f32.mrf.mxu0 }
 0x438   :  { %3366 = vst [vmem:[%s7671_s4 + $0xcc8] sm:$0xff] %v2288_v55  ;;  %3144 = vst [vmem:[%s7671_s4 + $0x5d8] sm:$0xff] %v2481_v28 }
 0x439   :  { %v2290_v36 = vpop.f32.mrf.mxu1  ;;  %v2483_v62 = vpop.f32.mrf.mxu0 }
 0x43a   :  { %3372 = vst [vmem:[%s7671_s4 + $0xcf8] sm:$0xff] %v2290_v36  ;;  %3150 = vst [vmem:[%s7671_s4 + $0x608] sm:$0xff] %v2483_v62 }
 0x43b   :  { %v2292_v46 = vpop.f32.mrf.mxu1  ;;  %v2485_v59 = vpop.f32.mrf.mxu0 }
 0x43c   :  { %3373 = vst [vmem:[%s7671_s4 + $0xd00] sm:$0xff] %v2292_v46  ;;  %3151 = vst [vmem:[%s7671_s4 + $0x610] sm:$0xff] %v2485_v59 }
 0x43d   :  { %v2296_v57 = vpop.f32.mrf.mxu1  ;;  %v2489_v31 = vpop.f32.mrf.mxu0 }
 0x43e   :  { %3379 = vst [vmem:[%s7671_s4 + $0xd30] sm:$0xff] %v2296_v57  ;;  %3157 = vst [vmem:[%s7671_s4 + $0x640] sm:$0xff] %v2489_v31 }
 0x43f   :  { %v2298_v20 = vpop.f32.mrf.mxu1  ;;  %v2491_v44 = vpop.f32.mrf.mxu0 }
 0x440   :  { %3380 = vst [vmem:[%s7671_s4 + $0xd38] sm:$0xff] %v2298_v20  ;;  %3158 = vst [vmem:[%s7671_s4 + $0x648] sm:$0xff] %v2491_v44 }
 0x441   :  { %v2300_v51 = vpop.f32.mrf.mxu1  ;;  %v2493_v37 = vpop.f32.mrf.mxu0 }
 0x442   :  { %3386 = vst [vmem:[%s7671_s4 + $0xd68] sm:$0xff] %v2300_v51  ;;  %3164 = vst [vmem:[%s7671_s4 + $0x678] sm:$0xff] %v2493_v37 }
 0x443   :  { %v2302_v54 = vpop.f32.mrf.mxu1  ;;  %v2495_v33 = vpop.f32.mrf.mxu0 }
 0x444   :  { %3387 = vst [vmem:[%s7671_s4 + $0xd70] sm:$0xff] %v2302_v54  ;;  %3165 = vst [vmem:[%s7671_s4 + $0x680] sm:$0xff] %v2495_v33 }
 0x445   :  { %v2306_v4 = vpop.f32.mrf.mxu1  ;;  %v2499_v17 = vpop.f32.mrf.mxu0 }
 0x446   :  { %3393 = vst [vmem:[%s7671_s4 + $0xda0] sm:$0xff] %v2306_v4  ;;  %3171 = vst [vmem:[%s7671_s4 + $0x6b0] sm:$0xff] %v2499_v17 }
 0x447   :  { %v2308_v38 = vpop.f32.mrf.mxu1  ;;  %v2501_v52 = vpop.f32.mrf.mxu0 }
 0x448   :  { %3394 = vst [vmem:[%s7671_s4 + $0xda8] sm:$0xff] %v2308_v38  ;;  %3172 = vst [vmem:[%s7671_s4 + $0x6b8] sm:$0xff] %v2501_v52 }
 0x449   :  { %v2310_v3 = vpop.f32.mrf.mxu1  ;;  %v2503_v7 = vpop.f32.mrf.mxu0 }
 0x44a   :  { %3400 = vst [vmem:[%s7671_s4 + $0xdd8] sm:$0xff] %v2310_v3  ;;  %3178 = vst [vmem:[%s7671_s4 + $0x6e8] sm:$0xff] %v2503_v7 }
 0x44b   :  { %v2312_v63 = vpop.f32.mrf.mxu1  ;;  %v2505_v1 = vpop.f32.mrf.mxu0 }
 0x44c   :  { %3401 = vst [vmem:[%s7671_s4 + $0xde0] sm:$0xff] %v2312_v63  ;;  %3179 = vst [vmem:[%s7671_s4 + $0x6f0] sm:$0xff] %v2505_v1 }
 0x44d   :  { %v2509_v32 = vpop.f32.mrf.mxu0  ;;  %v3500_v11 = vpop.f32.mrf.mxu1 }
 0x44e   :  { %3185 = vst [vmem:[%s7671_s4 + $0x720] sm:$0xff] %v2509_v32  ;;  %2977 = vst.msk [vmem:[%s7671_s4 + $0xa0] sm:$0xff] %vm149_vm0, %v3500_v11 }
 0x44f   :  { %v2511_v53 = vpop.f32.mrf.mxu0  ;;  %v2702_v5 = vpop.f32.mrf.mxu1 }
 0x450   :  { %3186 = vst [vmem:[%s7671_s4 + $0x728] sm:$0xff] %v2511_v53  ;;  %2963 = vst.msk [vmem:[%s7671_s4 + $0x30] sm:$0xff] %vm149_vm0, %v2702_v5 }
 0x451   :  { %v2513_v18 = vpop.f32.mrf.mxu0  ;;  %v3501_v22 = vpop.f32.mrf.mxu1 }
 0x452   :  { %3192 = vst [vmem:[%s7671_s4 + $0x758] sm:$0xff] %v2513_v18  ;;  %2984 = vst.msk [vmem:[%s7671_s4 + $0xd8] sm:$0xff] %vm149_vm0, %v3501_v22 }
 0x453   :  { %v2515_v12 = vpop.f32.mrf.mxu0  ;;  %v2705_v47 = vpop.f32.mrf.mxu1 }
 0x454   :  { %3193 = vst [vmem:[%s7671_s4 + $0x760] sm:$0xff] %v2515_v12  ;;  %2970 = vst.msk [vmem:[%s7671_s4 + $0x68] sm:$0xff] %vm149_vm0, %v2705_v47 }
 0x455   :  { %v2519_v43 = vpop.f32.mrf.mxu0  ;;  %v3504_v48 = vpop.f32.mrf.mxu1 }
 0x456   :  { %3199 = vst [vmem:[%s7671_s4 + $0x790] sm:$0xff] %v2519_v43  ;;  %3005 = vst.msk [vmem:[%s7671_s4 + $0x180] sm:$0xff] %vm149_vm0, %v3504_v48 }
 0x457   :  { %v2521_v9 = vpop.f32.mrf.mxu0  ;;  %v2718_v8 = vpop.f32.mrf.mxu1 }
 0x458   :  { %3200 = vst [vmem:[%s7671_s4 + $0x798] sm:$0xff] %v2521_v9  ;;  %2991 = vst.msk [vmem:[%s7671_s4 + $0x110] sm:$0xff] %vm149_vm0, %v2718_v8 }
 0x459   :  { %v2523_v30 = vpop.f32.mrf.mxu0  ;;  %v3505_v34 = vpop.f32.mrf.mxu1 }
 0x45a   :  { %3206 = vst [vmem:[%s7671_s4 + $0x7c8] sm:$0xff] %v2523_v30  ;;  %3012 = vst.msk [vmem:[%s7671_s4 + $0x1b8] sm:$0xff] %vm149_vm0, %v3505_v34 }
 0x45b   :  { %v2525_v21 = vpop.f32.mrf.mxu0  ;;  %v2721_v14 = vpop.f32.mrf.mxu1 }
 0x45c   :  { %3207 = vst [vmem:[%s7671_s4 + $0x7d0] sm:$0xff] %v2525_v21  ;;  %2998 = vst.msk [vmem:[%s7671_s4 + $0x148] sm:$0xff] %vm149_vm0, %v2721_v14 }
 0x45d   :  { %v2529_v10 = vpop.f32.mrf.mxu0  ;;  %v3508_v35 = vpop.f32.mrf.mxu1 }
 0x45e   :  { %3213 = vst [vmem:[%s7671_s4 + $0x800] sm:$0xff] %v2529_v10  ;;  %3033 = vst.msk [vmem:[%s7671_s4 + $0x260] sm:$0xff] %vm149_vm0, %v3508_v35 }
 0x45f   :  { %v2531_v2 = vpop.f32.mrf.mxu0  ;;  %v2734_v39 = vpop.f32.mrf.mxu1 }
 0x460   :  { %3214 = vst [vmem:[%s7671_s4 + $0x808] sm:$0xff] %v2531_v2  ;;  %3019 = vst.msk [vmem:[%s7671_s4 + $0x1f0] sm:$0xff] %vm149_vm0, %v2734_v39 }
 0x461   :  { %v2533_v6 = vpop.f32.mrf.mxu0  ;;  %v3509_v25 = vpop.f32.mrf.mxu1 }
 0x462   :  { %3220 = vst [vmem:[%s7671_s4 + $0x838] sm:$0xff] %v2533_v6  ;;  %3040 = vst.msk [vmem:[%s7671_s4 + $0x298] sm:$0xff] %vm149_vm0, %v3509_v25 }
 0x463   :  { %v2535_v50 = vpop.f32.mrf.mxu0  ;;  %v2737_v56 = vpop.f32.mrf.mxu1 }
 0x464   :  { %3221 = vst [vmem:[%s7671_s4 + $0x840] sm:$0xff] %v2535_v50  ;;  %3026 = vst.msk [vmem:[%s7671_s4 + $0x228] sm:$0xff] %vm149_vm0, %v2737_v56 }
 0x465   :  { %v2539_v23 = vpop.f32.mrf.mxu0  ;;  %v3512_v24 = vpop.f32.mrf.mxu1 }
 0x466   :  { %3227 = vst [vmem:[%s7671_s4 + $0x870] sm:$0xff] %v2539_v23  ;;  %3061 = vst.msk [vmem:[%s7671_s4 + $0x340] sm:$0xff] %vm149_vm0, %v3512_v24 }
 0x467   :  { %v2541_v49 = vpop.f32.mrf.mxu0  ;;  %v2750_v19 = vpop.f32.mrf.mxu1 }
 0x468   :  { %3228 = vst [vmem:[%s7671_s4 + $0x878] sm:$0xff] %v2541_v49  ;;  %3047 = vst.msk [vmem:[%s7671_s4 + $0x2d0] sm:$0xff] %vm149_vm0, %v2750_v19 }
 0x469   :  { %v2543_v26 = vpop.f32.mrf.mxu0  ;;  %v3513_v13 = vpop.f32.mrf.mxu1 }
 0x46a   :  { %3234 = vst [vmem:[%s7671_s4 + $0x8a8] sm:$0xff] %v2543_v26  ;;  %3068 = vst.msk [vmem:[%s7671_s4 + $0x378] sm:$0xff] %vm149_vm0, %v3513_v13 }
 0x46b   :  { %v2545_v58 = vpop.f32.mrf.mxu0  ;;  %v2753_v29 = vpop.f32.mrf.mxu1 }
 0x46c   :  { %3235 = vst [vmem:[%s7671_s4 + $0x8b0] sm:$0xff] %v2545_v58  ;;  %3054 = vst.msk [vmem:[%s7671_s4 + $0x308] sm:$0xff] %vm149_vm0, %v2753_v29 }
 0x46d   :  { %v2549_v41 = vpop.f32.mrf.mxu0  ;;  %v3516_v27 = vpop.f32.mrf.mxu1 }
 0x46e   :  { %3241 = vst [vmem:[%s7671_s4 + $0x8e0] sm:$0xff] %v2549_v41  ;;  %3089 = vst.msk [vmem:[%s7671_s4 + $0x420] sm:$0xff] %vm149_vm0, %v3516_v27 }
 0x46f   :  { %v2551_v61 = vpop.f32.mrf.mxu0  ;;  %v2766_v0 = vpop.f32.mrf.mxu1 }
 0x470   :  { %3242 = vst [vmem:[%s7671_s4 + $0x8e8] sm:$0xff] %v2551_v61  ;;  %3075 = vst.msk [vmem:[%s7671_s4 + $0x3b0] sm:$0xff] %vm149_vm0, %v2766_v0 }
 0x471   :  { %v2553_v15 = vpop.f32.mrf.mxu0  ;;  %v3517_v42 = vpop.f32.mrf.mxu1 }
 0x472   :  { %3248 = vst [vmem:[%s7671_s4 + $0x918] sm:$0xff] %v2553_v15  ;;  %3096 = vst.msk [vmem:[%s7671_s4 + $0x458] sm:$0xff] %vm149_vm0, %v3517_v42 }
 0x473   :  { %v2555_v40 = vpop.f32.mrf.mxu0  ;;  %v2769_v16 = vpop.f32.mrf.mxu1 }
 0x474   :  { %3249 = vst [vmem:[%s7671_s4 + $0x920] sm:$0xff] %v2555_v40  ;;  %3082 = vst.msk [vmem:[%s7671_s4 + $0x3e8] sm:$0xff] %vm149_vm0, %v2769_v16 }
 0x475   :  { %v2559_v60 = vpop.f32.mrf.mxu0  ;;  %v3520_v45 = vpop.f32.mrf.mxu1 }
 0x476   :  { %3255 = vst [vmem:[%s7671_s4 + $0x950] sm:$0xff] %v2559_v60  ;;  %3117 = vst.msk [vmem:[%s7671_s4 + $0x500] sm:$0xff] %vm149_vm0, %v3520_v45 }
 0x477   :  { %v2561_v55 = vpop.f32.mrf.mxu0  ;;  %v2782_v28 = vpop.f32.mrf.mxu1 }
 0x478   :  { %3256 = vst [vmem:[%s7671_s4 + $0x958] sm:$0xff] %v2561_v55  ;;  %3103 = vst.msk [vmem:[%s7671_s4 + $0x490] sm:$0xff] %vm149_vm0, %v2782_v28 }
 0x479   :  { %v2563_v36 = vpop.f32.mrf.mxu0  ;;  %v3521_v62 = vpop.f32.mrf.mxu1 }
 0x47a   :  { %3262 = vst [vmem:[%s7671_s4 + $0x988] sm:$0xff] %v2563_v36  ;;  %3124 = vst.msk [vmem:[%s7671_s4 + $0x538] sm:$0xff] %vm149_vm0, %v3521_v62 }
 0x47b   :  { %v2565_v46 = vpop.f32.mrf.mxu0  ;;  %v2785_v59 = vpop.f32.mrf.mxu1 }
 0x47c   :  { %3263 = vst [vmem:[%s7671_s4 + $0x990] sm:$0xff] %v2565_v46  ;;  %3110 = vst.msk [vmem:[%s7671_s4 + $0x4c8] sm:$0xff] %vm149_vm0, %v2785_v59 }
 0x47d   :  { %v2569_v57 = vpop.f32.mrf.mxu0  ;;  %v3524_v31 = vpop.f32.mrf.mxu1 }
 0x47e   :  { %3269 = vst [vmem:[%s7671_s4 + $0x9c0] sm:$0xff] %v2569_v57  ;;  %3145 = vst.msk [vmem:[%s7671_s4 + $0x5e0] sm:$0xff] %vm149_vm0, %v3524_v31 }
 0x47f   :  { %v2571_v20 = vpop.f32.mrf.mxu0  ;;  %v2798_v44 = vpop.f32.mrf.mxu1 }
 0x480   :  { %3270 = vst [vmem:[%s7671_s4 + $0x9c8] sm:$0xff] %v2571_v20  ;;  %3131 = vst.msk [vmem:[%s7671_s4 + $0x570] sm:$0xff] %vm149_vm0, %v2798_v44 }
 0x481   :  { %v2573_v51 = vpop.f32.mrf.mxu0  ;;  %v3525_v37 = vpop.f32.mrf.mxu1 }
 0x482   :  { %3276 = vst [vmem:[%s7671_s4 + $0x9f8] sm:$0xff] %v2573_v51  ;;  %3152 = vst.msk [vmem:[%s7671_s4 + $0x618] sm:$0xff] %vm149_vm0, %v3525_v37 }
 0x483   :  { %v2575_v54 = vpop.f32.mrf.mxu0  ;;  %v2801_v33 = vpop.f32.mrf.mxu1 }
 0x484   :  { %3277 = vst [vmem:[%s7671_s4 + $0xa00] sm:$0xff] %v2575_v54  ;;  %3138 = vst.msk [vmem:[%s7671_s4 + $0x5a8] sm:$0xff] %vm149_vm0, %v2801_v33 }
 0x485   :  { %v2579_v4 = vpop.f32.mrf.mxu0  ;;  %v3528_v17 = vpop.f32.mrf.mxu1 }
 0x486   :  { %3283 = vst [vmem:[%s7671_s4 + $0xa30] sm:$0xff] %v2579_v4  ;;  %3173 = vst.msk [vmem:[%s7671_s4 + $0x6c0] sm:$0xff] %vm149_vm0, %v3528_v17 }
 0x487   :  { %v2581_v38 = vpop.f32.mrf.mxu0  ;;  %v2814_v52 = vpop.f32.mrf.mxu1 }
 0x488   :  { %3284 = vst [vmem:[%s7671_s4 + $0xa38] sm:$0xff] %v2581_v38  ;;  %3159 = vst.msk [vmem:[%s7671_s4 + $0x650] sm:$0xff] %vm149_vm0, %v2814_v52 }
 0x489   :  { %v2583_v3 = vpop.f32.mrf.mxu0  ;;  %v3529_v7 = vpop.f32.mrf.mxu1 }
 0x48a   :  { %3290 = vst [vmem:[%s7671_s4 + $0xa68] sm:$0xff] %v2583_v3  ;;  %3180 = vst.msk [vmem:[%s7671_s4 + $0x6f8] sm:$0xff] %vm149_vm0, %v3529_v7 }
 0x48b   :  { %v2585_v63 = vpop.f32.mrf.mxu0  ;;  %v2817_v1 = vpop.f32.mrf.mxu1 }
 0x48c   :  { %3291 = vst [vmem:[%s7671_s4 + $0xa70] sm:$0xff] %v2585_v63  ;;  %3166 = vst.msk [vmem:[%s7671_s4 + $0x688] sm:$0xff] %vm149_vm0, %v2817_v1 }
 0x48d   :  { %v2589_v32 = vpop.f32.mrf.mxu0  ;;  %v3532_v11 = vpop.f32.mrf.mxu1 }
 0x48e   :  { %3297 = vst [vmem:[%s7671_s4 + $0xaa0] sm:$0xff] %v2589_v32  ;;  %3201 = vst.msk [vmem:[%s7671_s4 + $0x7a0] sm:$0xff] %vm149_vm0, %v3532_v11 }
 0x48f   :  { %v2591_v53 = vpop.f32.mrf.mxu0  ;;  %v2830_v5 = vpop.f32.mrf.mxu1 }
 0x490   :  { %3298 = vst [vmem:[%s7671_s4 + $0xaa8] sm:$0xff] %v2591_v53  ;;  %3187 = vst.msk [vmem:[%s7671_s4 + $0x730] sm:$0xff] %vm149_vm0, %v2830_v5 }
 0x491   :  { %v2593_v18 = vpop.f32.mrf.mxu0  ;;  %v3533_v22 = vpop.f32.mrf.mxu1 }
 0x492   :  { %3304 = vst [vmem:[%s7671_s4 + $0xad8] sm:$0xff] %v2593_v18  ;;  %3208 = vst.msk [vmem:[%s7671_s4 + $0x7d8] sm:$0xff] %vm149_vm0, %v3533_v22 }
 0x493   :  { %v2595_v12 = vpop.f32.mrf.mxu0  ;;  %v2833_v47 = vpop.f32.mrf.mxu1 }
 0x494   :  { %3305 = vst [vmem:[%s7671_s4 + $0xae0] sm:$0xff] %v2595_v12  ;;  %3194 = vst.msk [vmem:[%s7671_s4 + $0x768] sm:$0xff] %vm149_vm0, %v2833_v47 }
 0x495   :  { %v2599_v43 = vpop.f32.mrf.mxu0  ;;  %v3536_v48 = vpop.f32.mrf.mxu1 }
 0x496   :  { %3311 = vst [vmem:[%s7671_s4 + $0xb10] sm:$0xff] %v2599_v43  ;;  %3229 = vst.msk [vmem:[%s7671_s4 + $0x880] sm:$0xff] %vm149_vm0, %v3536_v48 }
 0x497   :  { %v2601_v9 = vpop.f32.mrf.mxu0  ;;  %v2846_v8 = vpop.f32.mrf.mxu1 }
 0x498   :  { %3312 = vst [vmem:[%s7671_s4 + $0xb18] sm:$0xff] %v2601_v9  ;;  %3215 = vst.msk [vmem:[%s7671_s4 + $0x810] sm:$0xff] %vm149_vm0, %v2846_v8 }
 0x499   :  { %v2603_v30 = vpop.f32.mrf.mxu0  ;;  %v3537_v34 = vpop.f32.mrf.mxu1 }
 0x49a   :  { %3318 = vst [vmem:[%s7671_s4 + $0xb48] sm:$0xff] %v2603_v30  ;;  %3236 = vst.msk [vmem:[%s7671_s4 + $0x8b8] sm:$0xff] %vm149_vm0, %v3537_v34 }
 0x49b   :  { %v2605_v21 = vpop.f32.mrf.mxu0  ;;  %v2849_v14 = vpop.f32.mrf.mxu1 }
 0x49c   :  { %3319 = vst [vmem:[%s7671_s4 + $0xb50] sm:$0xff] %v2605_v21  ;;  %3222 = vst.msk [vmem:[%s7671_s4 + $0x848] sm:$0xff] %vm149_vm0, %v2849_v14 }
 0x49d   :  { %v2609_v10 = vpop.f32.mrf.mxu0  ;;  %v3540_v35 = vpop.f32.mrf.mxu1 }
 0x49e   :  { %3325 = vst [vmem:[%s7671_s4 + $0xb80] sm:$0xff] %v2609_v10  ;;  %3257 = vst.msk [vmem:[%s7671_s4 + $0x960] sm:$0xff] %vm149_vm0, %v3540_v35 }
 0x49f   :  { %v2611_v2 = vpop.f32.mrf.mxu0  ;;  %v2862_v39 = vpop.f32.mrf.mxu1 }
 0x4a0   :  { %3326 = vst [vmem:[%s7671_s4 + $0xb88] sm:$0xff] %v2611_v2  ;;  %3243 = vst.msk [vmem:[%s7671_s4 + $0x8f0] sm:$0xff] %vm149_vm0, %v2862_v39 }
 0x4a1   :  { %v2613_v6 = vpop.f32.mrf.mxu0  ;;  %v3541_v25 = vpop.f32.mrf.mxu1 }
 0x4a2   :  { %3332 = vst [vmem:[%s7671_s4 + $0xbb8] sm:$0xff] %v2613_v6  ;;  %3264 = vst.msk [vmem:[%s7671_s4 + $0x998] sm:$0xff] %vm149_vm0, %v3541_v25 }
 0x4a3   :  { %v2615_v50 = vpop.f32.mrf.mxu0  ;;  %v2865_v56 = vpop.f32.mrf.mxu1 }
 0x4a4   :  { %3333 = vst [vmem:[%s7671_s4 + $0xbc0] sm:$0xff] %v2615_v50  ;;  %3250 = vst.msk [vmem:[%s7671_s4 + $0x928] sm:$0xff] %vm149_vm0, %v2865_v56 }
 0x4a5   :  { %v2619_v23 = vpop.f32.mrf.mxu0  ;;  %v3544_v24 = vpop.f32.mrf.mxu1 }
 0x4a6   :  { %3339 = vst [vmem:[%s7671_s4 + $0xbf0] sm:$0xff] %v2619_v23  ;;  %3285 = vst.msk [vmem:[%s7671_s4 + $0xa40] sm:$0xff] %vm149_vm0, %v3544_v24 }
 0x4a7   :  { %v2621_v49 = vpop.f32.mrf.mxu0  ;;  %v2878_v19 = vpop.f32.mrf.mxu1 }
 0x4a8   :  { %3340 = vst [vmem:[%s7671_s4 + $0xbf8] sm:$0xff] %v2621_v49  ;;  %3271 = vst.msk [vmem:[%s7671_s4 + $0x9d0] sm:$0xff] %vm149_vm0, %v2878_v19 }
 0x4a9   :  { %v2623_v26 = vpop.f32.mrf.mxu0  ;;  %v3545_v13 = vpop.f32.mrf.mxu1 }
 0x4aa   :  { %3346 = vst [vmem:[%s7671_s4 + $0xc28] sm:$0xff] %v2623_v26  ;;  %3292 = vst.msk [vmem:[%s7671_s4 + $0xa78] sm:$0xff] %vm149_vm0, %v3545_v13 }
 0x4ab   :  { %v2625_v58 = vpop.f32.mrf.mxu0  ;;  %v2881_v29 = vpop.f32.mrf.mxu1 }
 0x4ac   :  { %3347 = vst [vmem:[%s7671_s4 + $0xc30] sm:$0xff] %v2625_v58  ;;  %3278 = vst.msk [vmem:[%s7671_s4 + $0xa08] sm:$0xff] %vm149_vm0, %v2881_v29 }
 0x4ad   :  { %v2629_v41 = vpop.f32.mrf.mxu0  ;;  %v3548_v27 = vpop.f32.mrf.mxu1 }
 0x4ae   :  { %3353 = vst [vmem:[%s7671_s4 + $0xc60] sm:$0xff] %v2629_v41  ;;  %3313 = vst.msk [vmem:[%s7671_s4 + $0xb20] sm:$0xff] %vm149_vm0, %v3548_v27 }
 0x4af   :  { %v2631_v61 = vpop.f32.mrf.mxu0  ;;  %v2894_v0 = vpop.f32.mrf.mxu1 }
 0x4b0   :  { %3354 = vst [vmem:[%s7671_s4 + $0xc68] sm:$0xff] %v2631_v61  ;;  %3299 = vst.msk [vmem:[%s7671_s4 + $0xab0] sm:$0xff] %vm149_vm0, %v2894_v0 }
 0x4b1   :  { %v2633_v15 = vpop.f32.mrf.mxu0  ;;  %v3549_v42 = vpop.f32.mrf.mxu1 }
 0x4b2   :  { %3360 = vst [vmem:[%s7671_s4 + $0xc98] sm:$0xff] %v2633_v15  ;;  %3320 = vst.msk [vmem:[%s7671_s4 + $0xb58] sm:$0xff] %vm149_vm0, %v3549_v42 }
 0x4b3   :  { %v2635_v40 = vpop.f32.mrf.mxu0  ;;  %v2897_v16 = vpop.f32.mrf.mxu1 }
 0x4b4   :  { %3361 = vst [vmem:[%s7671_s4 + $0xca0] sm:$0xff] %v2635_v40  ;;  %3306 = vst.msk [vmem:[%s7671_s4 + $0xae8] sm:$0xff] %vm149_vm0, %v2897_v16 }
 0x4b5   :  { %v2639_v60 = vpop.f32.mrf.mxu0  ;;  %v3552_v45 = vpop.f32.mrf.mxu1 }
 0x4b6   :  { %3367 = vst [vmem:[%s7671_s4 + $0xcd0] sm:$0xff] %v2639_v60  ;;  %3341 = vst.msk [vmem:[%s7671_s4 + $0xc00] sm:$0xff] %vm149_vm0, %v3552_v45 }
 0x4b7   :  { %v2641_v55 = vpop.f32.mrf.mxu0  ;;  %v2910_v28 = vpop.f32.mrf.mxu1 }
 0x4b8   :  { %3368 = vst [vmem:[%s7671_s4 + $0xcd8] sm:$0xff] %v2641_v55  ;;  %3327 = vst.msk [vmem:[%s7671_s4 + $0xb90] sm:$0xff] %vm149_vm0, %v2910_v28 }
 0x4b9   :  { %v2643_v36 = vpop.f32.mrf.mxu0  ;;  %v3553_v62 = vpop.f32.mrf.mxu1 }
 0x4ba   :  { %3374 = vst [vmem:[%s7671_s4 + $0xd08] sm:$0xff] %v2643_v36  ;;  %3348 = vst.msk [vmem:[%s7671_s4 + $0xc38] sm:$0xff] %vm149_vm0, %v3553_v62 }
 0x4bb   :  { %v2645_v46 = vpop.f32.mrf.mxu0  ;;  %v2913_v59 = vpop.f32.mrf.mxu1 }
 0x4bc   :  { %3375 = vst [vmem:[%s7671_s4 + $0xd10] sm:$0xff] %v2645_v46  ;;  %3334 = vst.msk [vmem:[%s7671_s4 + $0xbc8] sm:$0xff] %vm149_vm0, %v2913_v59 }
 0x4bd   :  { %v2649_v57 = vpop.f32.mrf.mxu0  ;;  %v3556_v31 = vpop.f32.mrf.mxu1 }
 0x4be   :  { %3381 = vst [vmem:[%s7671_s4 + $0xd40] sm:$0xff] %v2649_v57  ;;  %3369 = vst.msk [vmem:[%s7671_s4 + $0xce0] sm:$0xff] %vm149_vm0, %v3556_v31 }
 0x4bf   :  { %v2651_v20 = vpop.f32.mrf.mxu0  ;;  %v2926_v44 = vpop.f32.mrf.mxu1 }
 0x4c0   :  { %3382 = vst [vmem:[%s7671_s4 + $0xd48] sm:$0xff] %v2651_v20  ;;  %3355 = vst.msk [vmem:[%s7671_s4 + $0xc70] sm:$0xff] %vm149_vm0, %v2926_v44 }
 0x4c1   :  { %v2653_v51 = vpop.f32.mrf.mxu0  ;;  %v3557_v37 = vpop.f32.mrf.mxu1 }
 0x4c2   :  { %3388 = vst [vmem:[%s7671_s4 + $0xd78] sm:$0xff] %v2653_v51  ;;  %3376 = vst.msk [vmem:[%s7671_s4 + $0xd18] sm:$0xff] %vm149_vm0, %v3557_v37 }
 0x4c3   :  { %v2655_v54 = vpop.f32.mrf.mxu0  ;;  %v2929_v33 = vpop.f32.mrf.mxu1 }
 0x4c4   :  { %3389 = vst [vmem:[%s7671_s4 + $0xd80] sm:$0xff] %v2655_v54  ;;  %3362 = vst.msk [vmem:[%s7671_s4 + $0xca8] sm:$0xff] %vm149_vm0, %v2929_v33 }
 0x4c5   :  { %v2659_v4 = vpop.f32.mrf.mxu0  ;;  %v3560_v17 = vpop.f32.mrf.mxu1 }
 0x4c6   :  { %3395 = vst [vmem:[%s7671_s4 + $0xdb0] sm:$0xff] %v2659_v4  ;;  %3397 = vst.msk [vmem:[%s7671_s4 + $0xdc0] sm:$0xff] %vm149_vm0, %v3560_v17 }
 0x4c7   :  { %v2661_v38 = vpop.f32.mrf.mxu0  ;;  %v2942_v52 = vpop.f32.mrf.mxu1 }
 0x4c8   :  { %3396 = vst [vmem:[%s7671_s4 + $0xdb8] sm:$0xff] %v2661_v38  ;;  %3383 = vst.msk [vmem:[%s7671_s4 + $0xd50] sm:$0xff] %vm149_vm0, %v2942_v52 }
 0x4c9   :  { %v2663_v3 = vpop.f32.mrf.mxu0  ;;  %v3561_v7 = vpop.f32.mrf.mxu1 }
 0x4ca   :  { %3402 = vst [vmem:[%s7671_s4 + $0xde8] sm:$0xff] %v2663_v3  ;;  %3404 = vst.msk [vmem:[%s7671_s4 + $0xdf8] sm:$0xff] %vm149_vm0, %v3561_v7 }
 0x4cb   :  { %v2665_v63 = vpop.f32.mrf.mxu0  ;;  %v2945_v1 = vpop.f32.mrf.mxu1 }
 0x4cc   :  { %3403 = vst [vmem:[%s7671_s4 + $0xdf0] sm:$0xff] %v2665_v63  ;;  %3390 = vst.msk [vmem:[%s7671_s4 + $0xd88] sm:$0xff] %vm149_vm0, %v2945_v1 }
 0x4cd   :  { %3409 = vsyncpa [#allocation3], 1 }

</bundles_post_ra>
